<compile_context>
chip_gen: v7x
topology: tpu7x:2x2x1
jax: 0.10.0
libtpu: 0.0.40
codegen_flags: <defaults>
</compile_context>

<pallas_src>
import functools

import jax
import jax.numpy as jnp
from jax import lax
from jax.experimental import pallas as pl
from jax.experimental.pallas import tpu as pltpu


# ----------------------------------------------------------------------------
# Fused kernel: conv1 -> conv2 -> pool -> conv3 -> pool -> flatten -> FC
# ----------------------------------------------------------------------------
def _conv_stack_kernel(T, M, x_ref, w1_ref, b1_ref, w2_ref, b2_ref,
                       w3_ref, b3_ref, wfc_ref, bfc_ref, o_ref):
    """One batch element per grid step.

    Activations are phase-decomposed along the frequency axis (4 phases for
    the width-F stages, 2 phases after the first MaxPool).  Each phase array
    is a 2D channels-last matrix of shape (M*T, C) with row index m*T + t, so
    every conv tap is a static row slice of a zero-padded copy, plus an iota
    mask for the time boundary.  Each conv / FC is a plain MXU matmul.
    """
    R = M * T
    f32 = jnp.float32

    # Time-boundary masks: tap dy=0 needs t-1 >= 0, tap dy=2 needs t+1 < T.
    t_idx = lax.broadcasted_iota(jnp.int32, (R, 1), 0) % T
    is_t_first = t_idx == 0
    is_t_last = t_idx == T - 1

    def conv3x3(phases, w, b):
        """phases: list of P arrays (R, Cin) -> list of P arrays (R, Cout)."""
        P = len(phases)
        cin = phases[0].shape[-1]
        zpad = jnp.zeros((T + 1, cin), f32)
        padded = [jnp.concatenate([zpad, ph, zpad], axis=0) for ph in phases]
        outs = []
        for k in range(P):                       # output phase k
            pieces = []
            for dy in range(3):
                for dx in range(3):
                    v = k + dx - 1               # frequency offset in full grid
                    q = v % P                    # source phase
                    o = (v - q) // P             # source sub-column offset
                    start = (o + 1) * T + dy     # static row offset into pad
                    piece = padded[q][start:start + R, :]
                    if dy == 0:
                        piece = jnp.where(is_t_first, 0.0, piece)
                    elif dy == 2:
                        piece = jnp.where(is_t_last, 0.0, piece)
                    pieces.append(piece)
            patches = jnp.concatenate(pieces, axis=-1)          # (R, 9*Cin)
            y = jnp.dot(patches, w, preferred_element_type=f32) + b
            outs.append(jnp.maximum(y, 0.0))                    # bias + ReLU
        return outs

    # ---- operands --------------------------------------------------------
    x_phases = [x_ref[0, q] for q in range(4)]                  # 4 x (R, 1)
    w1, b1 = w1_ref[...], b1_ref[...]
    w2, b2 = w2_ref[...], b2_ref[...]
    w3, b3 = w3_ref[...], b3_ref[...]

    # ---- conv1 + BN + ReLU (width F, 4 phases) ----------------------------
    h1 = conv3x3(x_phases, w1, b1)
    # ---- conv2 + BN + ReLU + MaxPool(1,2): width F -> F/2 ------------------
    h2 = conv3x3(h1, w2, b2)
    q0 = jnp.maximum(h2[0], h2[1])               # pooled even columns
    q1 = jnp.maximum(h2[2], h2[3])               # pooled odd columns
    # ---- conv3 + BN + ReLU + MaxPool(1,2): width F/2 -> F/4 ----------------
    h3ph = conv3x3([q0, q1], w3, b3)
    h3 = jnp.maximum(h3ph[0], h3ph[1])           # (R, C2), rows = j*T + t

    # ---- flatten + FC on the MXU ------------------------------------------
    out_f = bfc_ref.shape[1]
    acc = jnp.zeros((T, out_f), f32)
    for j in range(M):                           # static, M = F//4
        acc = acc + jnp.dot(h3[j * T:(j + 1) * T, :], wfc_ref[j],
                            preferred_element_type=f32)
    o_ref[0] = acc + bfc_ref[...]                # (T, OUT), OUT on lanes


# ----------------------------------------------------------------------------
# Wrapper glue: BN folding, weight reshapes, phase split, pallas_call
# ----------------------------------------------------------------------------
def fold_bn(w, b, gamma, beta, mean, var, eps=1e-5):
    """Fold eval-mode BatchNorm2d into the preceding conv's weight/bias."""
    scale = gamma / jnp.sqrt(var + eps)
    return w * scale[:, None, None, None], (b - mean) * scale + beta


def _conv_w_mat(w):
    """(Cout, Cin, 3, 3) -> (9*Cin, Cout) with row index (dy*3+dx)*Cin + ci."""
    cout, cin = w.shape[0], w.shape[1]
    return w.transpose(2, 3, 1, 0).reshape(9 * cin, cout).astype(jnp.float32)


def conv_stack_forward(data, p):
    B, _, T, F = data.shape
    assert F % 4 == 0, "input_features must be divisible by 4"
    M = F // 4

    w1, b1 = fold_bn(p['w1'], p['b1'], p['g1'], p['be1'], p['m1'], p['v1'])
    w2, b2 = fold_bn(p['w2'], p['b2'], p['g2'], p['be2'], p['m2'], p['v2'])
    w3, b3 = fold_bn(p['w3'], p['b3'], p['g3'], p['be3'], p['m3'], p['v3'])
    C1, C2 = w1.shape[0], w3.shape[0]
    OUT = p['bfc'].shape[0]

    # Phase-split the input (plain XLA glue, one pass): phase q holds columns
    # q, q+4, ... as a (M*T, 1) channels-last matrix with row index m*T + t.
    x = data[:, 0].astype(jnp.float32)                            # (B, T, F)
    xph = jnp.stack([x[:, :, q::4] for q in range(4)], axis=1)    # (B, 4, T, M)
    xph = jnp.transpose(xph, (0, 1, 3, 2)).reshape(B, 4, M * T, 1)

    w1m, w2m, w3m = _conv_w_mat(w1), _conv_w_mat(w2), _conv_w_mat(w3)
    b1m = b1.reshape(1, C1).astype(jnp.float32)
    b2m = b2.reshape(1, C1).astype(jnp.float32)
    b3m = b3.reshape(1, C2).astype(jnp.float32)
    # FC weight permuted so the kernel's (freq-major, channel-minor) layout
    # matches PyTorch's x.transpose(1, 2).flatten(-2) ordering: Wp[j, c, :].
    wfc = p['wfc_t'].reshape(C2, M, OUT).transpose(1, 0, 2).astype(jnp.float32)
    bfc = p['bfc'].reshape(1, OUT).astype(jnp.float32)

    kernel = functools.partial(_conv_stack_kernel, T, M)
    R = M * T

    def full_spec(shape):
        return pl.BlockSpec(shape, lambda b: (0,) * len(shape))

    return pl.pallas_call(
        kernel,
        out_shape=jax.ShapeDtypeStruct((B, T, OUT), jnp.float32),
        grid=(B,),
        in_specs=[
            pl.BlockSpec((1, 4, R, 1), lambda b: (b, 0, 0, 0)),   # input phases
            full_spec((9, C1)), full_spec((1, C1)),               # conv1
            full_spec((9 * C1, C1)), full_spec((1, C1)),          # conv2
            full_spec((9 * C1, C2)), full_spec((1, C2)),          # conv3
            full_spec((M, C2, OUT)), full_spec((1, OUT)),         # fc
        ],
        out_specs=pl.BlockSpec((1, T, OUT), lambda b: (b, 0, 0)),
        compiler_params=pltpu.CompilerParams(
            dimension_semantics=("parallel",)),
    )(xph, w1m, b1m, w2m, b2m, w3m, b3m, wfc, bfc)


# ----------------------------------------------------------------------------
# Deterministic parameter init (synthetic; not a checkpoint load)
# ----------------------------------------------------------------------------
def init_params(key, input_features, output_features):
    c1 = output_features // 16
    c2 = output_features // 8
    fc_in = c2 * (input_features // 4)
    ks = jax.random.split(key, 8)

    def conv_w(k, cout, cin):
        return 0.2 * jax.random.normal(k, (cout, cin, 3, 3), jnp.float32)

    p = {}
    p['w1'] = conv_w(ks[0], c1, 1)
    p['b1'] = 0.1 * jax.random.normal(ks[1], (c1,), jnp.float32)
    p['w2'] = conv_w(ks[2], c1, c1)
    p['b2'] = 0.1 * jax.random.normal(ks[3], (c1,), jnp.float32)
    p['w3'] = conv_w(ks[4], c2, c1)
    p['b3'] = 0.1 * jax.random.normal(ks[5], (c2,), jnp.float32)
    # BatchNorm (eval-mode) params: gamma, beta, running_mean, running_var
    for i, c in zip((1, 2, 3), (c1, c1, c2)):
        p[f'g{i}'] = 1.0 + 0.05 * jnp.arange(c, dtype=jnp.float32)
        p[f'be{i}'] = 0.02 * jnp.arange(c, dtype=jnp.float32)
        p[f'm{i}'] = 0.01 * jnp.arange(c, dtype=jnp.float32)
        p[f'v{i}'] = 1.0 + 0.1 * jnp.arange(c, dtype=jnp.float32)
    wfc = 0.1 * jax.random.normal(ks[6], (output_features, fc_in), jnp.float32)
    p['wfc_t'] = wfc.T                                   # (fc_in, OUT)
    p['bfc'] = 0.05 * jax.random.normal(ks[7], (output_features,), jnp.float32)
    return p


# ----------------------------------------------------------------------------
# Pure-JAX reference (for correctness check)
# ----------------------------------------------------------------------------
def ref_forward(data, p):
    def conv(x, w, b):
        y = jax.lax.conv_general_dilated(
            x, w, window_strides=(1, 1), padding=((1, 1), (1, 1)),
            dimension_numbers=('NCHW', 'OIHW', 'NCHW'))
        return y + b[None, :, None, None]

    def pool(x):
        B, C, T, W = x.shape
        return x.reshape(B, C, T, W // 2, 2).max(-1)

    w1, b1 = fold_bn(p['w1'], p['b1'], p['g1'], p['be1'], p['m1'], p['v1'])
    w2, b2 = fold_bn(p['w2'], p['b2'], p['g2'], p['be2'], p['m2'], p['v2'])
    w3, b3 = fold_bn(p['w3'], p['b3'], p['g3'], p['be3'], p['m3'], p['v3'])
    h = jnp.maximum(conv(data, w1, b1), 0.0)
    h = pool(jnp.maximum(conv(h, w2, b2), 0.0))
    h = pool(jnp.maximum(conv(h, w3, b3), 0.0))
    B, C2, T, F4 = h.shape
    flat = jnp.transpose(h, (0, 2, 1, 3)).reshape(B, T, C2 * F4)
    return flat @ p['wfc_t'] + p['bfc']


if __name__ == "__main__":
    B, T = 2, 8
    input_features, output_features = 16, 32   # C1=2, C2=4, fc_in=16

    key = jax.random.PRNGKey(0)
    kp, kx = jax.random.split(key)
    params = init_params(kp, input_features, output_features)
    data = jax.random.normal(kx, (B, 1, T, input_features), dtype=jnp.float32)

    y = jax.jit(conv_stack_forward)(data, params)
    y = jax.block_until_ready(y)
    assert y.shape == (B, T, output_features), y.shape

    y_ref = ref_forward(data, params)
    assert jnp.allclose(y, y_ref, rtol=1e-4, atol=1e-4), \
        float(jnp.max(jnp.abs(y - y_ref)))

    print("KERNEL_OK")
</pallas_src>

<mosaic_0001>
module attributes {stable_mosaic.version = 11 : i64} {
  func.func @_conv_stack_kernel(%arg0: i32, %arg1: memref<1x4x32x1xf32, #tpu.memory_space<vmem>>, %arg2: memref<9x2xf32, #tpu.memory_space<vmem>>, %arg3: memref<1x2xf32, #tpu.memory_space<vmem>>, %arg4: memref<18x2xf32, #tpu.memory_space<vmem>>, %arg5: memref<1x2xf32, #tpu.memory_space<vmem>>, %arg6: memref<18x4xf32, #tpu.memory_space<vmem>>, %arg7: memref<1x4xf32, #tpu.memory_space<vmem>>, %arg8: memref<4x4x32xf32, #tpu.memory_space<vmem>>, %arg9: memref<1x32xf32, #tpu.memory_space<vmem>>, %arg10: memref<1x8x32xf32, #tpu.memory_space<vmem>>) attributes {dimension_semantics = [#tpu.dimension_semantics<parallel>], iteration_bounds = array<i64: 2>, scalar_prefetch = 0 : i64, scratch_operands = 0 : i64, tpu.core_type = #tpu.core_type<tc>, window_params = [{transform_indices = @transform_0, window_bounds = array<i64: 1, 4, 32, 1>}, {pipeline_mode = #tpu.pipeline_mode<synchronous>, transform_indices = @transform_1, window_bounds = array<i64: 9, 2>}, {pipeline_mode = #tpu.pipeline_mode<synchronous>, transform_indices = @transform_2, window_bounds = array<i64: 1, 2>}, {pipeline_mode = #tpu.pipeline_mode<synchronous>, transform_indices = @transform_3, window_bounds = array<i64: 18, 2>}, {pipeline_mode = #tpu.pipeline_mode<synchronous>, transform_indices = @transform_4, window_bounds = array<i64: 1, 2>}, {pipeline_mode = #tpu.pipeline_mode<synchronous>, transform_indices = @transform_5, window_bounds = array<i64: 18, 4>}, {pipeline_mode = #tpu.pipeline_mode<synchronous>, transform_indices = @transform_6, window_bounds = array<i64: 1, 4>}, {pipeline_mode = #tpu.pipeline_mode<synchronous>, transform_indices = @transform_7, window_bounds = array<i64: 4, 4, 32>}, {pipeline_mode = #tpu.pipeline_mode<synchronous>, transform_indices = @transform_8, window_bounds = array<i64: 1, 32>}, {transform_indices = @transform_9, window_bounds = array<i64: 1, 8, 32>}]} {
    %0 = tpu.iota {dimensions = array<i32: 0>} : vector<32x1xi32>
    %c8_i32 = arith.constant 8 : i32
    %c0_i32 = arith.constant 0 : i32
    %1 = arith.cmpi eq, %c8_i32, %c0_i32 : i32
    %c1_i32 = arith.constant 1 : i32
    %2 = arith.select %1, %c1_i32, %c8_i32 : i32
    %3 = vector.broadcast %2 : i32 to vector<32x1xi32>
    %4 = arith.remsi %0, %3 : vector<32x1xi32>
    %c0_i32_0 = arith.constant 0 : i32
    %5 = vector.broadcast %c0_i32_0 : i32 to vector<32x1xi32>
    %6 = arith.cmpi ne, %4, %5 : vector<32x1xi32>
    %c0_i32_1 = arith.constant 0 : i32
    %7 = vector.broadcast %c0_i32_1 : i32 to vector<32x1xi32>
    %8 = arith.cmpi slt, %4, %7 : vector<32x1xi32>
    %c0_i32_2 = arith.constant 0 : i32
    %9 = arith.cmpi slt, %2, %c0_i32_2 : i32
    %10 = vector.broadcast %9 : i1 to vector<32x1xi1>
    %11 = vector.broadcast %10 : vector<32x1xi1> to vector<32x1xi1>
    %12 = arith.xori %8, %11 : vector<32x1xi1>
    %13 = arith.andi %12, %6 : vector<32x1xi1>
    %14 = vector.broadcast %2 : i32 to vector<32x1xi32>
    %15 = arith.addi %4, %14 : vector<32x1xi32>
    %16 = arith.select %13, %15, %4 : vector<32x1xi1>, vector<32x1xi32>
    %c0_i32_3 = arith.constant 0 : i32
    %17 = vector.broadcast %c0_i32_3 : i32 to vector<32x1xi32>
    %18 = arith.cmpi eq, %16, %17 : vector<32x1xi32>
    %c7_i32 = arith.constant 7 : i32
    %19 = vector.broadcast %c7_i32 : i32 to vector<32x1xi32>
    %20 = arith.cmpi eq, %16, %19 : vector<32x1xi32>
    %c0 = arith.constant 0 : index
    %c0_4 = arith.constant 0 : index
    %c0_5 = arith.constant 0 : index
    %c0_6 = arith.constant 0 : index
    %21 = vector.load %arg1[%c0, %c0_4, %c0_5, %c0_6] : memref<1x4x32x1xf32, #tpu.memory_space<vmem>>, vector<1x1x32x1xf32>
    %22 = vector.shape_cast %21 : vector<1x1x32x1xf32> to vector<32x1xf32>
    %c0_7 = arith.constant 0 : index
    %c1 = arith.constant 1 : index
    %c0_8 = arith.constant 0 : index
    %c0_9 = arith.constant 0 : index
    %23 = vector.load %arg1[%c0_7, %c1, %c0_8, %c0_9] : memref<1x4x32x1xf32, #tpu.memory_space<vmem>>, vector<1x1x32x1xf32>
    %24 = vector.shape_cast %23 : vector<1x1x32x1xf32> to vector<32x1xf32>
    %c0_10 = arith.constant 0 : index
    %c2 = arith.constant 2 : index
    %c0_11 = arith.constant 0 : index
    %c0_12 = arith.constant 0 : index
    %25 = vector.load %arg1[%c0_10, %c2, %c0_11, %c0_12] : memref<1x4x32x1xf32, #tpu.memory_space<vmem>>, vector<1x1x32x1xf32>
    %26 = vector.shape_cast %25 : vector<1x1x32x1xf32> to vector<32x1xf32>
    %c0_13 = arith.constant 0 : index
    %c3 = arith.constant 3 : index
    %c0_14 = arith.constant 0 : index
    %c0_15 = arith.constant 0 : index
    %27 = vector.load %arg1[%c0_13, %c3, %c0_14, %c0_15] : memref<1x4x32x1xf32, #tpu.memory_space<vmem>>, vector<1x1x32x1xf32>
    %28 = vector.shape_cast %27 : vector<1x1x32x1xf32> to vector<32x1xf32>
    %c0_16 = arith.constant 0 : index
    %c0_17 = arith.constant 0 : index
    %29 = vector.load %arg2[%c0_16, %c0_17] : memref<9x2xf32, #tpu.memory_space<vmem>>, vector<9x2xf32>
    %c0_18 = arith.constant 0 : index
    %c0_19 = arith.constant 0 : index
    %30 = vector.load %arg3[%c0_18, %c0_19] : memref<1x2xf32, #tpu.memory_space<vmem>>, vector<1x2xf32>
    %c0_20 = arith.constant 0 : index
    %c0_21 = arith.constant 0 : index
    %31 = vector.load %arg4[%c0_20, %c0_21] : memref<18x2xf32, #tpu.memory_space<vmem>>, vector<18x2xf32>
    %c0_22 = arith.constant 0 : index
    %c0_23 = arith.constant 0 : index
    %32 = vector.load %arg5[%c0_22, %c0_23] : memref<1x2xf32, #tpu.memory_space<vmem>>, vector<1x2xf32>
    %c0_24 = arith.constant 0 : index
    %c0_25 = arith.constant 0 : index
    %33 = vector.load %arg6[%c0_24, %c0_25] : memref<18x4xf32, #tpu.memory_space<vmem>>, vector<18x4xf32>
    %c0_26 = arith.constant 0 : index
    %c0_27 = arith.constant 0 : index
    %34 = vector.load %arg7[%c0_26, %c0_27] : memref<1x4xf32, #tpu.memory_space<vmem>>, vector<1x4xf32>
    %cst = arith.constant 0.000000e+00 : f32
    %35 = vector.broadcast %cst : f32 to vector<9x1xf32>
    %36 = tpu.concatenate %35, %22, %35 in 0 : vector<9x1xf32>, vector<32x1xf32>, vector<9x1xf32> -> vector<50x1xf32>
    %37 = tpu.concatenate %35, %24, %35 in 0 : vector<9x1xf32>, vector<32x1xf32>, vector<9x1xf32> -> vector<50x1xf32>
    %38 = tpu.concatenate %35, %26, %35 in 0 : vector<9x1xf32>, vector<32x1xf32>, vector<9x1xf32> -> vector<50x1xf32>
    %39 = tpu.concatenate %35, %28, %35 in 0 : vector<9x1xf32>, vector<32x1xf32>, vector<9x1xf32> -> vector<50x1xf32>
    %40 = vector.extract_strided_slice %39 {offsets = [0, 0], sizes = [32, 1], strides = [1, 1]} : vector<50x1xf32> to vector<32x1xf32>
    %cst_28 = arith.constant 0.000000e+00 : f32
    %41 = vector.broadcast %cst_28 : f32 to vector<32x1xf32>
    %42 = arith.select %18, %41, %40 : vector<32x1xi1>, vector<32x1xf32>
    %43 = vector.extract_strided_slice %36 {offsets = [8, 0], sizes = [32, 1], strides = [1, 1]} : vector<50x1xf32> to vector<32x1xf32>
    %cst_29 = arith.constant 0.000000e+00 : f32
    %44 = vector.broadcast %cst_29 : f32 to vector<32x1xf32>
    %45 = arith.select %18, %44, %43 : vector<32x1xi1>, vector<32x1xf32>
    %46 = vector.extract_strided_slice %37 {offsets = [8, 0], sizes = [32, 1], strides = [1, 1]} : vector<50x1xf32> to vector<32x1xf32>
    %cst_30 = arith.constant 0.000000e+00 : f32
    %47 = vector.broadcast %cst_30 : f32 to vector<32x1xf32>
    %48 = arith.select %18, %47, %46 : vector<32x1xi1>, vector<32x1xf32>
    %49 = vector.extract_strided_slice %39 {offsets = [1, 0], sizes = [32, 1], strides = [1, 1]} : vector<50x1xf32> to vector<32x1xf32>
    %50 = vector.extract_strided_slice %36 {offsets = [9, 0], sizes = [32, 1], strides = [1, 1]} : vector<50x1xf32> to vector<32x1xf32>
    %51 = vector.extract_strided_slice %37 {offsets = [9, 0], sizes = [32, 1], strides = [1, 1]} : vector<50x1xf32> to vector<32x1xf32>
    %52 = vector.extract_strided_slice %39 {offsets = [2, 0], sizes = [32, 1], strides = [1, 1]} : vector<50x1xf32> to vector<32x1xf32>
    %cst_31 = arith.constant 0.000000e+00 : f32
    %53 = vector.broadcast %cst_31 : f32 to vector<32x1xf32>
    %54 = arith.select %20, %53, %52 : vector<32x1xi1>, vector<32x1xf32>
    %55 = vector.extract_strided_slice %36 {offsets = [10, 0], sizes = [32, 1], strides = [1, 1]} : vector<50x1xf32> to vector<32x1xf32>
    %cst_32 = arith.constant 0.000000e+00 : f32
    %56 = vector.broadcast %cst_32 : f32 to vector<32x1xf32>
    %57 = arith.select %20, %56, %55 : vector<32x1xi1>, vector<32x1xf32>
    %58 = vector.extract_strided_slice %37 {offsets = [10, 0], sizes = [32, 1], strides = [1, 1]} : vector<50x1xf32> to vector<32x1xf32>
    %cst_33 = arith.constant 0.000000e+00 : f32
    %59 = vector.broadcast %cst_33 : f32 to vector<32x1xf32>
    %60 = arith.select %20, %59, %58 : vector<32x1xi1>, vector<32x1xf32>
    %61 = tpu.concatenate %42, %45, %48, %49, %50, %51, %54, %57, %60 in 1 : vector<32x1xf32>, vector<32x1xf32>, vector<32x1xf32>, vector<32x1xf32>, vector<32x1xf32>, vector<32x1xf32>, vector<32x1xf32>, vector<32x1xf32>, vector<32x1xf32> -> vector<32x9xf32>
    %cst_34 = arith.constant dense<0.000000e+00> : vector<32x2xf32>
    %62 = tpu.matmul %61, %29, %cst_34 {dimension_numbers = #tpu.dot_dimension_numbers<[1], [0], [0], [1], [0, 0, 1, 1], [], []>} : vector<32x9xf32>, vector<9x2xf32>, vector<32x2xf32> -> vector<32x2xf32>
    %63 = vector.broadcast %30 : vector<1x2xf32> to vector<32x2xf32>
    %64 = arith.addf %62, %63 : vector<32x2xf32>
    %cst_35 = arith.constant 0.000000e+00 : f32
    %65 = vector.broadcast %cst_35 : f32 to vector<32x2xf32>
    %66 = arith.maximumf %64, %65 : vector<32x2xf32>
    %67 = vector.extract_strided_slice %36 {offsets = [8, 0], sizes = [32, 1], strides = [1, 1]} : vector<50x1xf32> to vector<32x1xf32>
    %cst_36 = arith.constant 0.000000e+00 : f32
    %68 = vector.broadcast %cst_36 : f32 to vector<32x1xf32>
    %69 = arith.select %18, %68, %67 : vector<32x1xi1>, vector<32x1xf32>
    %70 = vector.extract_strided_slice %37 {offsets = [8, 0], sizes = [32, 1], strides = [1, 1]} : vector<50x1xf32> to vector<32x1xf32>
    %cst_37 = arith.constant 0.000000e+00 : f32
    %71 = vector.broadcast %cst_37 : f32 to vector<32x1xf32>
    %72 = arith.select %18, %71, %70 : vector<32x1xi1>, vector<32x1xf32>
    %73 = vector.extract_strided_slice %38 {offsets = [8, 0], sizes = [32, 1], strides = [1, 1]} : vector<50x1xf32> to vector<32x1xf32>
    %cst_38 = arith.constant 0.000000e+00 : f32
    %74 = vector.broadcast %cst_38 : f32 to vector<32x1xf32>
    %75 = arith.select %18, %74, %73 : vector<32x1xi1>, vector<32x1xf32>
    %76 = vector.extract_strided_slice %36 {offsets = [9, 0], sizes = [32, 1], strides = [1, 1]} : vector<50x1xf32> to vector<32x1xf32>
    %77 = vector.extract_strided_slice %37 {offsets = [9, 0], sizes = [32, 1], strides = [1, 1]} : vector<50x1xf32> to vector<32x1xf32>
    %78 = vector.extract_strided_slice %38 {offsets = [9, 0], sizes = [32, 1], strides = [1, 1]} : vector<50x1xf32> to vector<32x1xf32>
    %79 = vector.extract_strided_slice %36 {offsets = [10, 0], sizes = [32, 1], strides = [1, 1]} : vector<50x1xf32> to vector<32x1xf32>
    %cst_39 = arith.constant 0.000000e+00 : f32
    %80 = vector.broadcast %cst_39 : f32 to vector<32x1xf32>
    %81 = arith.select %20, %80, %79 : vector<32x1xi1>, vector<32x1xf32>
    %82 = vector.extract_strided_slice %37 {offsets = [10, 0], sizes = [32, 1], strides = [1, 1]} : vector<50x1xf32> to vector<32x1xf32>
    %cst_40 = arith.constant 0.000000e+00 : f32
    %83 = vector.broadcast %cst_40 : f32 to vector<32x1xf32>
    %84 = arith.select %20, %83, %82 : vector<32x1xi1>, vector<32x1xf32>
    %85 = vector.extract_strided_slice %38 {offsets = [10, 0], sizes = [32, 1], strides = [1, 1]} : vector<50x1xf32> to vector<32x1xf32>
    %cst_41 = arith.constant 0.000000e+00 : f32
    %86 = vector.broadcast %cst_41 : f32 to vector<32x1xf32>
    %87 = arith.select %20, %86, %85 : vector<32x1xi1>, vector<32x1xf32>
    %88 = tpu.concatenate %69, %72, %75, %76, %77, %78, %81, %84, %87 in 1 : vector<32x1xf32>, vector<32x1xf32>, vector<32x1xf32>, vector<32x1xf32>, vector<32x1xf32>, vector<32x1xf32>, vector<32x1xf32>, vector<32x1xf32>, vector<32x1xf32> -> vector<32x9xf32>
    %cst_42 = arith.constant dense<0.000000e+00> : vector<32x2xf32>
    %89 = tpu.matmul %88, %29, %cst_42 {dimension_numbers = #tpu.dot_dimension_numbers<[1], [0], [0], [1], [0, 0, 1, 1], [], []>} : vector<32x9xf32>, vector<9x2xf32>, vector<32x2xf32> -> vector<32x2xf32>
    %90 = vector.broadcast %30 : vector<1x2xf32> to vector<32x2xf32>
    %91 = arith.addf %89, %90 : vector<32x2xf32>
    %cst_43 = arith.constant 0.000000e+00 : f32
    %92 = vector.broadcast %cst_43 : f32 to vector<32x2xf32>
    %93 = arith.maximumf %91, %92 : vector<32x2xf32>
    %94 = vector.extract_strided_slice %37 {offsets = [8, 0], sizes = [32, 1], strides = [1, 1]} : vector<50x1xf32> to vector<32x1xf32>
    %cst_44 = arith.constant 0.000000e+00 : f32
    %95 = vector.broadcast %cst_44 : f32 to vector<32x1xf32>
    %96 = arith.select %18, %95, %94 : vector<32x1xi1>, vector<32x1xf32>
    %97 = vector.extract_strided_slice %38 {offsets = [8, 0], sizes = [32, 1], strides = [1, 1]} : vector<50x1xf32> to vector<32x1xf32>
    %cst_45 = arith.constant 0.000000e+00 : f32
    %98 = vector.broadcast %cst_45 : f32 to vector<32x1xf32>
    %99 = arith.select %18, %98, %97 : vector<32x1xi1>, vector<32x1xf32>
    %100 = vector.extract_strided_slice %39 {offsets = [8, 0], sizes = [32, 1], strides = [1, 1]} : vector<50x1xf32> to vector<32x1xf32>
    %cst_46 = arith.constant 0.000000e+00 : f32
    %101 = vector.broadcast %cst_46 : f32 to vector<32x1xf32>
    %102 = arith.select %18, %101, %100 : vector<32x1xi1>, vector<32x1xf32>
    %103 = vector.extract_strided_slice %37 {offsets = [9, 0], sizes = [32, 1], strides = [1, 1]} : vector<50x1xf32> to vector<32x1xf32>
    %104 = vector.extract_strided_slice %38 {offsets = [9, 0], sizes = [32, 1], strides = [1, 1]} : vector<50x1xf32> to vector<32x1xf32>
    %105 = vector.extract_strided_slice %39 {offsets = [9, 0], sizes = [32, 1], strides = [1, 1]} : vector<50x1xf32> to vector<32x1xf32>
    %106 = vector.extract_strided_slice %37 {offsets = [10, 0], sizes = [32, 1], strides = [1, 1]} : vector<50x1xf32> to vector<32x1xf32>
    %cst_47 = arith.constant 0.000000e+00 : f32
    %107 = vector.broadcast %cst_47 : f32 to vector<32x1xf32>
    %108 = arith.select %20, %107, %106 : vector<32x1xi1>, vector<32x1xf32>
    %109 = vector.extract_strided_slice %38 {offsets = [10, 0], sizes = [32, 1], strides = [1, 1]} : vector<50x1xf32> to vector<32x1xf32>
    %cst_48 = arith.constant 0.000000e+00 : f32
    %110 = vector.broadcast %cst_48 : f32 to vector<32x1xf32>
    %111 = arith.select %20, %110, %109 : vector<32x1xi1>, vector<32x1xf32>
    %112 = vector.extract_strided_slice %39 {offsets = [10, 0], sizes = [32, 1], strides = [1, 1]} : vector<50x1xf32> to vector<32x1xf32>
    %cst_49 = arith.constant 0.000000e+00 : f32
    %113 = vector.broadcast %cst_49 : f32 to vector<32x1xf32>
    %114 = arith.select %20, %113, %112 : vector<32x1xi1>, vector<32x1xf32>
    %115 = tpu.concatenate %96, %99, %102, %103, %104, %105, %108, %111, %114 in 1 : vector<32x1xf32>, vector<32x1xf32>, vector<32x1xf32>, vector<32x1xf32>, vector<32x1xf32>, vector<32x1xf32>, vector<32x1xf32>, vector<32x1xf32>, vector<32x1xf32> -> vector<32x9xf32>
    %cst_50 = arith.constant dense<0.000000e+00> : vector<32x2xf32>
    %116 = tpu.matmul %115, %29, %cst_50 {dimension_numbers = #tpu.dot_dimension_numbers<[1], [0], [0], [1], [0, 0, 1, 1], [], []>} : vector<32x9xf32>, vector<9x2xf32>, vector<32x2xf32> -> vector<32x2xf32>
    %117 = vector.broadcast %30 : vector<1x2xf32> to vector<32x2xf32>
    %118 = arith.addf %116, %117 : vector<32x2xf32>
    %cst_51 = arith.constant 0.000000e+00 : f32
    %119 = vector.broadcast %cst_51 : f32 to vector<32x2xf32>
    %120 = arith.maximumf %118, %119 : vector<32x2xf32>
    %121 = vector.extract_strided_slice %38 {offsets = [8, 0], sizes = [32, 1], strides = [1, 1]} : vector<50x1xf32> to vector<32x1xf32>
    %cst_52 = arith.constant 0.000000e+00 : f32
    %122 = vector.broadcast %cst_52 : f32 to vector<32x1xf32>
    %123 = arith.select %18, %122, %121 : vector<32x1xi1>, vector<32x1xf32>
    %124 = vector.extract_strided_slice %39 {offsets = [8, 0], sizes = [32, 1], strides = [1, 1]} : vector<50x1xf32> to vector<32x1xf32>
    %cst_53 = arith.constant 0.000000e+00 : f32
    %125 = vector.broadcast %cst_53 : f32 to vector<32x1xf32>
    %126 = arith.select %18, %125, %124 : vector<32x1xi1>, vector<32x1xf32>
    %127 = vector.extract_strided_slice %36 {offsets = [16, 0], sizes = [32, 1], strides = [1, 1]} : vector<50x1xf32> to vector<32x1xf32>
    %cst_54 = arith.constant 0.000000e+00 : f32
    %128 = vector.broadcast %cst_54 : f32 to vector<32x1xf32>
    %129 = arith.select %18, %128, %127 : vector<32x1xi1>, vector<32x1xf32>
    %130 = vector.extract_strided_slice %38 {offsets = [9, 0], sizes = [32, 1], strides = [1, 1]} : vector<50x1xf32> to vector<32x1xf32>
    %131 = vector.extract_strided_slice %39 {offsets = [9, 0], sizes = [32, 1], strides = [1, 1]} : vector<50x1xf32> to vector<32x1xf32>
    %132 = vector.extract_strided_slice %36 {offsets = [17, 0], sizes = [32, 1], strides = [1, 1]} : vector<50x1xf32> to vector<32x1xf32>
    %133 = vector.extract_strided_slice %38 {offsets = [10, 0], sizes = [32, 1], strides = [1, 1]} : vector<50x1xf32> to vector<32x1xf32>
    %cst_55 = arith.constant 0.000000e+00 : f32
    %134 = vector.broadcast %cst_55 : f32 to vector<32x1xf32>
    %135 = arith.select %20, %134, %133 : vector<32x1xi1>, vector<32x1xf32>
    %136 = vector.extract_strided_slice %39 {offsets = [10, 0], sizes = [32, 1], strides = [1, 1]} : vector<50x1xf32> to vector<32x1xf32>
    %cst_56 = arith.constant 0.000000e+00 : f32
    %137 = vector.broadcast %cst_56 : f32 to vector<32x1xf32>
    %138 = arith.select %20, %137, %136 : vector<32x1xi1>, vector<32x1xf32>
    %139 = vector.extract_strided_slice %36 {offsets = [18, 0], sizes = [32, 1], strides = [1, 1]} : vector<50x1xf32> to vector<32x1xf32>
    %cst_57 = arith.constant 0.000000e+00 : f32
    %140 = vector.broadcast %cst_57 : f32 to vector<32x1xf32>
    %141 = arith.select %20, %140, %139 : vector<32x1xi1>, vector<32x1xf32>
    %142 = tpu.concatenate %123, %126, %129, %130, %131, %132, %135, %138, %141 in 1 : vector<32x1xf32>, vector<32x1xf32>, vector<32x1xf32>, vector<32x1xf32>, vector<32x1xf32>, vector<32x1xf32>, vector<32x1xf32>, vector<32x1xf32>, vector<32x1xf32> -> vector<32x9xf32>
    %cst_58 = arith.constant dense<0.000000e+00> : vector<32x2xf32>
    %143 = tpu.matmul %142, %29, %cst_58 {dimension_numbers = #tpu.dot_dimension_numbers<[1], [0], [0], [1], [0, 0, 1, 1], [], []>} : vector<32x9xf32>, vector<9x2xf32>, vector<32x2xf32> -> vector<32x2xf32>
    %144 = vector.broadcast %30 : vector<1x2xf32> to vector<32x2xf32>
    %145 = arith.addf %143, %144 : vector<32x2xf32>
    %cst_59 = arith.constant 0.000000e+00 : f32
    %146 = vector.broadcast %cst_59 : f32 to vector<32x2xf32>
    %147 = arith.maximumf %145, %146 : vector<32x2xf32>
    %cst_60 = arith.constant 0.000000e+00 : f32
    %148 = vector.broadcast %cst_60 : f32 to vector<9x2xf32>
    %149 = tpu.concatenate %148, %66, %148 in 0 : vector<9x2xf32>, vector<32x2xf32>, vector<9x2xf32> -> vector<50x2xf32>
    %150 = tpu.concatenate %148, %93, %148 in 0 : vector<9x2xf32>, vector<32x2xf32>, vector<9x2xf32> -> vector<50x2xf32>
    %151 = tpu.concatenate %148, %120, %148 in 0 : vector<9x2xf32>, vector<32x2xf32>, vector<9x2xf32> -> vector<50x2xf32>
    %152 = tpu.concatenate %148, %147, %148 in 0 : vector<9x2xf32>, vector<32x2xf32>, vector<9x2xf32> -> vector<50x2xf32>
    %153 = vector.extract_strided_slice %152 {offsets = [0, 0], sizes = [32, 2], strides = [1, 1]} : vector<50x2xf32> to vector<32x2xf32>
    %cst_61 = arith.constant 0.000000e+00 : f32
    %154 = vector.shape_cast %18 : vector<32x1xi1> to vector<32x1xi1>
    %155 = vector.broadcast %154 : vector<32x1xi1> to vector<32x2xi1>
    %156 = vector.broadcast %cst_61 : f32 to vector<32x2xf32>
    %157 = arith.select %155, %156, %153 : vector<32x2xi1>, vector<32x2xf32>
    %158 = vector.extract_strided_slice %149 {offsets = [8, 0], sizes = [32, 2], strides = [1, 1]} : vector<50x2xf32> to vector<32x2xf32>
    %cst_62 = arith.constant 0.000000e+00 : f32
    %159 = vector.shape_cast %18 : vector<32x1xi1> to vector<32x1xi1>
    %160 = vector.broadcast %159 : vector<32x1xi1> to vector<32x2xi1>
    %161 = vector.broadcast %cst_62 : f32 to vector<32x2xf32>
    %162 = arith.select %160, %161, %158 : vector<32x2xi1>, vector<32x2xf32>
    %163 = vector.extract_strided_slice %150 {offsets = [8, 0], sizes = [32, 2], strides = [1, 1]} : vector<50x2xf32> to vector<32x2xf32>
    %cst_63 = arith.constant 0.000000e+00 : f32
    %164 = vector.shape_cast %18 : vector<32x1xi1> to vector<32x1xi1>
    %165 = vector.broadcast %164 : vector<32x1xi1> to vector<32x2xi1>
    %166 = vector.broadcast %cst_63 : f32 to vector<32x2xf32>
    %167 = arith.select %165, %166, %163 : vector<32x2xi1>, vector<32x2xf32>
    %168 = vector.extract_strided_slice %152 {offsets = [1, 0], sizes = [32, 2], strides = [1, 1]} : vector<50x2xf32> to vector<32x2xf32>
    %169 = vector.extract_strided_slice %149 {offsets = [9, 0], sizes = [32, 2], strides = [1, 1]} : vector<50x2xf32> to vector<32x2xf32>
    %170 = vector.extract_strided_slice %150 {offsets = [9, 0], sizes = [32, 2], strides = [1, 1]} : vector<50x2xf32> to vector<32x2xf32>
    %171 = vector.extract_strided_slice %152 {offsets = [2, 0], sizes = [32, 2], strides = [1, 1]} : vector<50x2xf32> to vector<32x2xf32>
    %cst_64 = arith.constant 0.000000e+00 : f32
    %172 = vector.shape_cast %20 : vector<32x1xi1> to vector<32x1xi1>
    %173 = vector.broadcast %172 : vector<32x1xi1> to vector<32x2xi1>
    %174 = vector.broadcast %cst_64 : f32 to vector<32x2xf32>
    %175 = arith.select %173, %174, %171 : vector<32x2xi1>, vector<32x2xf32>
    %176 = vector.extract_strided_slice %149 {offsets = [10, 0], sizes = [32, 2], strides = [1, 1]} : vector<50x2xf32> to vector<32x2xf32>
    %cst_65 = arith.constant 0.000000e+00 : f32
    %177 = vector.shape_cast %20 : vector<32x1xi1> to vector<32x1xi1>
    %178 = vector.broadcast %177 : vector<32x1xi1> to vector<32x2xi1>
    %179 = vector.broadcast %cst_65 : f32 to vector<32x2xf32>
    %180 = arith.select %178, %179, %176 : vector<32x2xi1>, vector<32x2xf32>
    %181 = vector.extract_strided_slice %150 {offsets = [10, 0], sizes = [32, 2], strides = [1, 1]} : vector<50x2xf32> to vector<32x2xf32>
    %cst_66 = arith.constant 0.000000e+00 : f32
    %182 = vector.shape_cast %20 : vector<32x1xi1> to vector<32x1xi1>
    %183 = vector.broadcast %182 : vector<32x1xi1> to vector<32x2xi1>
    %184 = vector.broadcast %cst_66 : f32 to vector<32x2xf32>
    %185 = arith.select %183, %184, %181 : vector<32x2xi1>, vector<32x2xf32>
    %186 = tpu.concatenate %157, %162, %167, %168, %169, %170, %175, %180, %185 in 1 : vector<32x2xf32>, vector<32x2xf32>, vector<32x2xf32>, vector<32x2xf32>, vector<32x2xf32>, vector<32x2xf32>, vector<32x2xf32>, vector<32x2xf32>, vector<32x2xf32> -> vector<32x18xf32>
    %cst_67 = arith.constant dense<0.000000e+00> : vector<32x2xf32>
    %187 = tpu.matmul %186, %31, %cst_67 {dimension_numbers = #tpu.dot_dimension_numbers<[1], [0], [0], [1], [0, 0, 1, 1], [], []>} : vector<32x18xf32>, vector<18x2xf32>, vector<32x2xf32> -> vector<32x2xf32>
    %188 = vector.broadcast %32 : vector<1x2xf32> to vector<32x2xf32>
    %189 = arith.addf %187, %188 : vector<32x2xf32>
    %cst_68 = arith.constant 0.000000e+00 : f32
    %190 = vector.broadcast %cst_68 : f32 to vector<32x2xf32>
    %191 = arith.maximumf %189, %190 : vector<32x2xf32>
    %192 = vector.extract_strided_slice %149 {offsets = [8, 0], sizes = [32, 2], strides = [1, 1]} : vector<50x2xf32> to vector<32x2xf32>
    %cst_69 = arith.constant 0.000000e+00 : f32
    %193 = vector.shape_cast %18 : vector<32x1xi1> to vector<32x1xi1>
    %194 = vector.broadcast %193 : vector<32x1xi1> to vector<32x2xi1>
    %195 = vector.broadcast %cst_69 : f32 to vector<32x2xf32>
    %196 = arith.select %194, %195, %192 : vector<32x2xi1>, vector<32x2xf32>
    %197 = vector.extract_strided_slice %150 {offsets = [8, 0], sizes = [32, 2], strides = [1, 1]} : vector<50x2xf32> to vector<32x2xf32>
    %cst_70 = arith.constant 0.000000e+00 : f32
    %198 = vector.shape_cast %18 : vector<32x1xi1> to vector<32x1xi1>
    %199 = vector.broadcast %198 : vector<32x1xi1> to vector<32x2xi1>
    %200 = vector.broadcast %cst_70 : f32 to vector<32x2xf32>
    %201 = arith.select %199, %200, %197 : vector<32x2xi1>, vector<32x2xf32>
    %202 = vector.extract_strided_slice %151 {offsets = [8, 0], sizes = [32, 2], strides = [1, 1]} : vector<50x2xf32> to vector<32x2xf32>
    %cst_71 = arith.constant 0.000000e+00 : f32
    %203 = vector.shape_cast %18 : vector<32x1xi1> to vector<32x1xi1>
    %204 = vector.broadcast %203 : vector<32x1xi1> to vector<32x2xi1>
    %205 = vector.broadcast %cst_71 : f32 to vector<32x2xf32>
    %206 = arith.select %204, %205, %202 : vector<32x2xi1>, vector<32x2xf32>
    %207 = vector.extract_strided_slice %149 {offsets = [9, 0], sizes = [32, 2], strides = [1, 1]} : vector<50x2xf32> to vector<32x2xf32>
    %208 = vector.extract_strided_slice %150 {offsets = [9, 0], sizes = [32, 2], strides = [1, 1]} : vector<50x2xf32> to vector<32x2xf32>
    %209 = vector.extract_strided_slice %151 {offsets = [9, 0], sizes = [32, 2], strides = [1, 1]} : vector<50x2xf32> to vector<32x2xf32>
    %210 = vector.extract_strided_slice %149 {offsets = [10, 0], sizes = [32, 2], strides = [1, 1]} : vector<50x2xf32> to vector<32x2xf32>
    %cst_72 = arith.constant 0.000000e+00 : f32
    %211 = vector.shape_cast %20 : vector<32x1xi1> to vector<32x1xi1>
    %212 = vector.broadcast %211 : vector<32x1xi1> to vector<32x2xi1>
    %213 = vector.broadcast %cst_72 : f32 to vector<32x2xf32>
    %214 = arith.select %212, %213, %210 : vector<32x2xi1>, vector<32x2xf32>
    %215 = vector.extract_strided_slice %150 {offsets = [10, 0], sizes = [32, 2], strides = [1, 1]} : vector<50x2xf32> to vector<32x2xf32>
    %cst_73 = arith.constant 0.000000e+00 : f32
    %216 = vector.shape_cast %20 : vector<32x1xi1> to vector<32x1xi1>
    %217 = vector.broadcast %216 : vector<32x1xi1> to vector<32x2xi1>
    %218 = vector.broadcast %cst_73 : f32 to vector<32x2xf32>
    %219 = arith.select %217, %218, %215 : vector<32x2xi1>, vector<32x2xf32>
    %220 = vector.extract_strided_slice %151 {offsets = [10, 0], sizes = [32, 2], strides = [1, 1]} : vector<50x2xf32> to vector<32x2xf32>
    %cst_74 = arith.constant 0.000000e+00 : f32
    %221 = vector.shape_cast %20 : vector<32x1xi1> to vector<32x1xi1>
    %222 = vector.broadcast %221 : vector<32x1xi1> to vector<32x2xi1>
    %223 = vector.broadcast %cst_74 : f32 to vector<32x2xf32>
    %224 = arith.select %222, %223, %220 : vector<32x2xi1>, vector<32x2xf32>
    %225 = tpu.concatenate %196, %201, %206, %207, %208, %209, %214, %219, %224 in 1 : vector<32x2xf32>, vector<32x2xf32>, vector<32x2xf32>, vector<32x2xf32>, vector<32x2xf32>, vector<32x2xf32>, vector<32x2xf32>, vector<32x2xf32>, vector<32x2xf32> -> vector<32x18xf32>
    %cst_75 = arith.constant dense<0.000000e+00> : vector<32x2xf32>
    %226 = tpu.matmul %225, %31, %cst_75 {dimension_numbers = #tpu.dot_dimension_numbers<[1], [0], [0], [1], [0, 0, 1, 1], [], []>} : vector<32x18xf32>, vector<18x2xf32>, vector<32x2xf32> -> vector<32x2xf32>
    %227 = vector.broadcast %32 : vector<1x2xf32> to vector<32x2xf32>
    %228 = arith.addf %226, %227 : vector<32x2xf32>
    %cst_76 = arith.constant 0.000000e+00 : f32
    %229 = vector.broadcast %cst_76 : f32 to vector<32x2xf32>
    %230 = arith.maximumf %228, %229 : vector<32x2xf32>
    %231 = vector.extract_strided_slice %150 {offsets = [8, 0], sizes = [32, 2], strides = [1, 1]} : vector<50x2xf32> to vector<32x2xf32>
    %cst_77 = arith.constant 0.000000e+00 : f32
    %232 = vector.shape_cast %18 : vector<32x1xi1> to vector<32x1xi1>
    %233 = vector.broadcast %232 : vector<32x1xi1> to vector<32x2xi1>
    %234 = vector.broadcast %cst_77 : f32 to vector<32x2xf32>
    %235 = arith.select %233, %234, %231 : vector<32x2xi1>, vector<32x2xf32>
    %236 = vector.extract_strided_slice %151 {offsets = [8, 0], sizes = [32, 2], strides = [1, 1]} : vector<50x2xf32> to vector<32x2xf32>
    %cst_78 = arith.constant 0.000000e+00 : f32
    %237 = vector.shape_cast %18 : vector<32x1xi1> to vector<32x1xi1>
    %238 = vector.broadcast %237 : vector<32x1xi1> to vector<32x2xi1>
    %239 = vector.broadcast %cst_78 : f32 to vector<32x2xf32>
    %240 = arith.select %238, %239, %236 : vector<32x2xi1>, vector<32x2xf32>
    %241 = vector.extract_strided_slice %152 {offsets = [8, 0], sizes = [32, 2], strides = [1, 1]} : vector<50x2xf32> to vector<32x2xf32>
    %cst_79 = arith.constant 0.000000e+00 : f32
    %242 = vector.shape_cast %18 : vector<32x1xi1> to vector<32x1xi1>
    %243 = vector.broadcast %242 : vector<32x1xi1> to vector<32x2xi1>
    %244 = vector.broadcast %cst_79 : f32 to vector<32x2xf32>
    %245 = arith.select %243, %244, %241 : vector<32x2xi1>, vector<32x2xf32>
    %246 = vector.extract_strided_slice %150 {offsets = [9, 0], sizes = [32, 2], strides = [1, 1]} : vector<50x2xf32> to vector<32x2xf32>
    %247 = vector.extract_strided_slice %151 {offsets = [9, 0], sizes = [32, 2], strides = [1, 1]} : vector<50x2xf32> to vector<32x2xf32>
    %248 = vector.extract_strided_slice %152 {offsets = [9, 0], sizes = [32, 2], strides = [1, 1]} : vector<50x2xf32> to vector<32x2xf32>
    %249 = vector.extract_strided_slice %150 {offsets = [10, 0], sizes = [32, 2], strides = [1, 1]} : vector<50x2xf32> to vector<32x2xf32>
    %cst_80 = arith.constant 0.000000e+00 : f32
    %250 = vector.shape_cast %20 : vector<32x1xi1> to vector<32x1xi1>
    %251 = vector.broadcast %250 : vector<32x1xi1> to vector<32x2xi1>
    %252 = vector.broadcast %cst_80 : f32 to vector<32x2xf32>
    %253 = arith.select %251, %252, %249 : vector<32x2xi1>, vector<32x2xf32>
    %254 = vector.extract_strided_slice %151 {offsets = [10, 0], sizes = [32, 2], strides = [1, 1]} : vector<50x2xf32> to vector<32x2xf32>
    %cst_81 = arith.constant 0.000000e+00 : f32
    %255 = vector.shape_cast %20 : vector<32x1xi1> to vector<32x1xi1>
    %256 = vector.broadcast %255 : vector<32x1xi1> to vector<32x2xi1>
    %257 = vector.broadcast %cst_81 : f32 to vector<32x2xf32>
    %258 = arith.select %256, %257, %254 : vector<32x2xi1>, vector<32x2xf32>
    %259 = vector.extract_strided_slice %152 {offsets = [10, 0], sizes = [32, 2], strides = [1, 1]} : vector<50x2xf32> to vector<32x2xf32>
    %cst_82 = arith.constant 0.000000e+00 : f32
    %260 = vector.shape_cast %20 : vector<32x1xi1> to vector<32x1xi1>
    %261 = vector.broadcast %260 : vector<32x1xi1> to vector<32x2xi1>
    %262 = vector.broadcast %cst_82 : f32 to vector<32x2xf32>
    %263 = arith.select %261, %262, %259 : vector<32x2xi1>, vector<32x2xf32>
    %264 = tpu.concatenate %235, %240, %245, %246, %247, %248, %253, %258, %263 in 1 : vector<32x2xf32>, vector<32x2xf32>, vector<32x2xf32>, vector<32x2xf32>, vector<32x2xf32>, vector<32x2xf32>, vector<32x2xf32>, vector<32x2xf32>, vector<32x2xf32> -> vector<32x18xf32>
    %cst_83 = arith.constant dense<0.000000e+00> : vector<32x2xf32>
    %265 = tpu.matmul %264, %31, %cst_83 {dimension_numbers = #tpu.dot_dimension_numbers<[1], [0], [0], [1], [0, 0, 1, 1], [], []>} : vector<32x18xf32>, vector<18x2xf32>, vector<32x2xf32> -> vector<32x2xf32>
    %266 = vector.broadcast %32 : vector<1x2xf32> to vector<32x2xf32>
    %267 = arith.addf %265, %266 : vector<32x2xf32>
    %cst_84 = arith.constant 0.000000e+00 : f32
    %268 = vector.broadcast %cst_84 : f32 to vector<32x2xf32>
    %269 = arith.maximumf %267, %268 : vector<32x2xf32>
    %270 = vector.extract_strided_slice %151 {offsets = [8, 0], sizes = [32, 2], strides = [1, 1]} : vector<50x2xf32> to vector<32x2xf32>
    %cst_85 = arith.constant 0.000000e+00 : f32
    %271 = vector.shape_cast %18 : vector<32x1xi1> to vector<32x1xi1>
    %272 = vector.broadcast %271 : vector<32x1xi1> to vector<32x2xi1>
    %273 = vector.broadcast %cst_85 : f32 to vector<32x2xf32>
    %274 = arith.select %272, %273, %270 : vector<32x2xi1>, vector<32x2xf32>
    %275 = vector.extract_strided_slice %152 {offsets = [8, 0], sizes = [32, 2], strides = [1, 1]} : vector<50x2xf32> to vector<32x2xf32>
    %cst_86 = arith.constant 0.000000e+00 : f32
    %276 = vector.shape_cast %18 : vector<32x1xi1> to vector<32x1xi1>
    %277 = vector.broadcast %276 : vector<32x1xi1> to vector<32x2xi1>
    %278 = vector.broadcast %cst_86 : f32 to vector<32x2xf32>
    %279 = arith.select %277, %278, %275 : vector<32x2xi1>, vector<32x2xf32>
    %280 = vector.extract_strided_slice %149 {offsets = [16, 0], sizes = [32, 2], strides = [1, 1]} : vector<50x2xf32> to vector<32x2xf32>
    %cst_87 = arith.constant 0.000000e+00 : f32
    %281 = vector.shape_cast %18 : vector<32x1xi1> to vector<32x1xi1>
    %282 = vector.broadcast %281 : vector<32x1xi1> to vector<32x2xi1>
    %283 = vector.broadcast %cst_87 : f32 to vector<32x2xf32>
    %284 = arith.select %282, %283, %280 : vector<32x2xi1>, vector<32x2xf32>
    %285 = vector.extract_strided_slice %151 {offsets = [9, 0], sizes = [32, 2], strides = [1, 1]} : vector<50x2xf32> to vector<32x2xf32>
    %286 = vector.extract_strided_slice %152 {offsets = [9, 0], sizes = [32, 2], strides = [1, 1]} : vector<50x2xf32> to vector<32x2xf32>
    %287 = vector.extract_strided_slice %149 {offsets = [17, 0], sizes = [32, 2], strides = [1, 1]} : vector<50x2xf32> to vector<32x2xf32>
    %288 = vector.extract_strided_slice %151 {offsets = [10, 0], sizes = [32, 2], strides = [1, 1]} : vector<50x2xf32> to vector<32x2xf32>
    %cst_88 = arith.constant 0.000000e+00 : f32
    %289 = vector.shape_cast %20 : vector<32x1xi1> to vector<32x1xi1>
    %290 = vector.broadcast %289 : vector<32x1xi1> to vector<32x2xi1>
    %291 = vector.broadcast %cst_88 : f32 to vector<32x2xf32>
    %292 = arith.select %290, %291, %288 : vector<32x2xi1>, vector<32x2xf32>
    %293 = vector.extract_strided_slice %152 {offsets = [10, 0], sizes = [32, 2], strides = [1, 1]} : vector<50x2xf32> to vector<32x2xf32>
    %cst_89 = arith.constant 0.000000e+00 : f32
    %294 = vector.shape_cast %20 : vector<32x1xi1> to vector<32x1xi1>
    %295 = vector.broadcast %294 : vector<32x1xi1> to vector<32x2xi1>
    %296 = vector.broadcast %cst_89 : f32 to vector<32x2xf32>
    %297 = arith.select %295, %296, %293 : vector<32x2xi1>, vector<32x2xf32>
    %298 = vector.extract_strided_slice %149 {offsets = [18, 0], sizes = [32, 2], strides = [1, 1]} : vector<50x2xf32> to vector<32x2xf32>
    %cst_90 = arith.constant 0.000000e+00 : f32
    %299 = vector.shape_cast %20 : vector<32x1xi1> to vector<32x1xi1>
    %300 = vector.broadcast %299 : vector<32x1xi1> to vector<32x2xi1>
    %301 = vector.broadcast %cst_90 : f32 to vector<32x2xf32>
    %302 = arith.select %300, %301, %298 : vector<32x2xi1>, vector<32x2xf32>
    %303 = tpu.concatenate %274, %279, %284, %285, %286, %287, %292, %297, %302 in 1 : vector<32x2xf32>, vector<32x2xf32>, vector<32x2xf32>, vector<32x2xf32>, vector<32x2xf32>, vector<32x2xf32>, vector<32x2xf32>, vector<32x2xf32>, vector<32x2xf32> -> vector<32x18xf32>
    %cst_91 = arith.constant dense<0.000000e+00> : vector<32x2xf32>
    %304 = tpu.matmul %303, %31, %cst_91 {dimension_numbers = #tpu.dot_dimension_numbers<[1], [0], [0], [1], [0, 0, 1, 1], [], []>} : vector<32x18xf32>, vector<18x2xf32>, vector<32x2xf32> -> vector<32x2xf32>
    %305 = vector.broadcast %32 : vector<1x2xf32> to vector<32x2xf32>
    %306 = arith.addf %304, %305 : vector<32x2xf32>
    %cst_92 = arith.constant 0.000000e+00 : f32
    %307 = vector.broadcast %cst_92 : f32 to vector<32x2xf32>
    %308 = arith.maximumf %306, %307 : vector<32x2xf32>
    %309 = arith.maximumf %191, %230 : vector<32x2xf32>
    %310 = arith.maximumf %269, %308 : vector<32x2xf32>
    %cst_93 = arith.constant 0.000000e+00 : f32
    %311 = vector.broadcast %cst_93 : f32 to vector<9x2xf32>
    %312 = tpu.concatenate %311, %309, %311 in 0 : vector<9x2xf32>, vector<32x2xf32>, vector<9x2xf32> -> vector<50x2xf32>
    %313 = tpu.concatenate %311, %310, %311 in 0 : vector<9x2xf32>, vector<32x2xf32>, vector<9x2xf32> -> vector<50x2xf32>
    %314 = vector.extract_strided_slice %313 {offsets = [0, 0], sizes = [32, 2], strides = [1, 1]} : vector<50x2xf32> to vector<32x2xf32>
    %cst_94 = arith.constant 0.000000e+00 : f32
    %315 = vector.shape_cast %18 : vector<32x1xi1> to vector<32x1xi1>
    %316 = vector.broadcast %315 : vector<32x1xi1> to vector<32x2xi1>
    %317 = vector.broadcast %cst_94 : f32 to vector<32x2xf32>
    %318 = arith.select %316, %317, %314 : vector<32x2xi1>, vector<32x2xf32>
    %319 = vector.extract_strided_slice %312 {offsets = [8, 0], sizes = [32, 2], strides = [1, 1]} : vector<50x2xf32> to vector<32x2xf32>
    %cst_95 = arith.constant 0.000000e+00 : f32
    %320 = vector.shape_cast %18 : vector<32x1xi1> to vector<32x1xi1>
    %321 = vector.broadcast %320 : vector<32x1xi1> to vector<32x2xi1>
    %322 = vector.broadcast %cst_95 : f32 to vector<32x2xf32>
    %323 = arith.select %321, %322, %319 : vector<32x2xi1>, vector<32x2xf32>
    %324 = vector.extract_strided_slice %313 {offsets = [8, 0], sizes = [32, 2], strides = [1, 1]} : vector<50x2xf32> to vector<32x2xf32>
    %cst_96 = arith.constant 0.000000e+00 : f32
    %325 = vector.shape_cast %18 : vector<32x1xi1> to vector<32x1xi1>
    %326 = vector.broadcast %325 : vector<32x1xi1> to vector<32x2xi1>
    %327 = vector.broadcast %cst_96 : f32 to vector<32x2xf32>
    %328 = arith.select %326, %327, %324 : vector<32x2xi1>, vector<32x2xf32>
    %329 = vector.extract_strided_slice %313 {offsets = [1, 0], sizes = [32, 2], strides = [1, 1]} : vector<50x2xf32> to vector<32x2xf32>
    %330 = vector.extract_strided_slice %312 {offsets = [9, 0], sizes = [32, 2], strides = [1, 1]} : vector<50x2xf32> to vector<32x2xf32>
    %331 = vector.extract_strided_slice %313 {offsets = [9, 0], sizes = [32, 2], strides = [1, 1]} : vector<50x2xf32> to vector<32x2xf32>
    %332 = vector.extract_strided_slice %313 {offsets = [2, 0], sizes = [32, 2], strides = [1, 1]} : vector<50x2xf32> to vector<32x2xf32>
    %cst_97 = arith.constant 0.000000e+00 : f32
    %333 = vector.shape_cast %20 : vector<32x1xi1> to vector<32x1xi1>
    %334 = vector.broadcast %333 : vector<32x1xi1> to vector<32x2xi1>
    %335 = vector.broadcast %cst_97 : f32 to vector<32x2xf32>
    %336 = arith.select %334, %335, %332 : vector<32x2xi1>, vector<32x2xf32>
    %337 = vector.extract_strided_slice %312 {offsets = [10, 0], sizes = [32, 2], strides = [1, 1]} : vector<50x2xf32> to vector<32x2xf32>
    %cst_98 = arith.constant 0.000000e+00 : f32
    %338 = vector.shape_cast %20 : vector<32x1xi1> to vector<32x1xi1>
    %339 = vector.broadcast %338 : vector<32x1xi1> to vector<32x2xi1>
    %340 = vector.broadcast %cst_98 : f32 to vector<32x2xf32>
    %341 = arith.select %339, %340, %337 : vector<32x2xi1>, vector<32x2xf32>
    %342 = vector.extract_strided_slice %313 {offsets = [10, 0], sizes = [32, 2], strides = [1, 1]} : vector<50x2xf32> to vector<32x2xf32>
    %cst_99 = arith.constant 0.000000e+00 : f32
    %343 = vector.shape_cast %20 : vector<32x1xi1> to vector<32x1xi1>
    %344 = vector.broadcast %343 : vector<32x1xi1> to vector<32x2xi1>
    %345 = vector.broadcast %cst_99 : f32 to vector<32x2xf32>
    %346 = arith.select %344, %345, %342 : vector<32x2xi1>, vector<32x2xf32>
    %347 = tpu.concatenate %318, %323, %328, %329, %330, %331, %336, %341, %346 in 1 : vector<32x2xf32>, vector<32x2xf32>, vector<32x2xf32>, vector<32x2xf32>, vector<32x2xf32>, vector<32x2xf32>, vector<32x2xf32>, vector<32x2xf32>, vector<32x2xf32> -> vector<32x18xf32>
    %cst_100 = arith.constant dense<0.000000e+00> : vector<32x4xf32>
    %348 = tpu.matmul %347, %33, %cst_100 {dimension_numbers = #tpu.dot_dimension_numbers<[1], [0], [0], [1], [0, 0, 1, 1], [], []>} : vector<32x18xf32>, vector<18x4xf32>, vector<32x4xf32> -> vector<32x4xf32>
    %349 = vector.broadcast %34 : vector<1x4xf32> to vector<32x4xf32>
    %350 = arith.addf %348, %349 : vector<32x4xf32>
    %cst_101 = arith.constant 0.000000e+00 : f32
    %351 = vector.broadcast %cst_101 : f32 to vector<32x4xf32>
    %352 = arith.maximumf %350, %351 : vector<32x4xf32>
    %353 = vector.extract_strided_slice %312 {offsets = [8, 0], sizes = [32, 2], strides = [1, 1]} : vector<50x2xf32> to vector<32x2xf32>
    %cst_102 = arith.constant 0.000000e+00 : f32
    %354 = vector.shape_cast %18 : vector<32x1xi1> to vector<32x1xi1>
    %355 = vector.broadcast %354 : vector<32x1xi1> to vector<32x2xi1>
    %356 = vector.broadcast %cst_102 : f32 to vector<32x2xf32>
    %357 = arith.select %355, %356, %353 : vector<32x2xi1>, vector<32x2xf32>
    %358 = vector.extract_strided_slice %313 {offsets = [8, 0], sizes = [32, 2], strides = [1, 1]} : vector<50x2xf32> to vector<32x2xf32>
    %cst_103 = arith.constant 0.000000e+00 : f32
    %359 = vector.shape_cast %18 : vector<32x1xi1> to vector<32x1xi1>
    %360 = vector.broadcast %359 : vector<32x1xi1> to vector<32x2xi1>
    %361 = vector.broadcast %cst_103 : f32 to vector<32x2xf32>
    %362 = arith.select %360, %361, %358 : vector<32x2xi1>, vector<32x2xf32>
    %363 = vector.extract_strided_slice %312 {offsets = [16, 0], sizes = [32, 2], strides = [1, 1]} : vector<50x2xf32> to vector<32x2xf32>
    %cst_104 = arith.constant 0.000000e+00 : f32
    %364 = vector.shape_cast %18 : vector<32x1xi1> to vector<32x1xi1>
    %365 = vector.broadcast %364 : vector<32x1xi1> to vector<32x2xi1>
    %366 = vector.broadcast %cst_104 : f32 to vector<32x2xf32>
    %367 = arith.select %365, %366, %363 : vector<32x2xi1>, vector<32x2xf32>
    %368 = vector.extract_strided_slice %312 {offsets = [9, 0], sizes = [32, 2], strides = [1, 1]} : vector<50x2xf32> to vector<32x2xf32>
    %369 = vector.extract_strided_slice %313 {offsets = [9, 0], sizes = [32, 2], strides = [1, 1]} : vector<50x2xf32> to vector<32x2xf32>
    %370 = vector.extract_strided_slice %312 {offsets = [17, 0], sizes = [32, 2], strides = [1, 1]} : vector<50x2xf32> to vector<32x2xf32>
    %371 = vector.extract_strided_slice %312 {offsets = [10, 0], sizes = [32, 2], strides = [1, 1]} : vector<50x2xf32> to vector<32x2xf32>
    %cst_105 = arith.constant 0.000000e+00 : f32
    %372 = vector.shape_cast %20 : vector<32x1xi1> to vector<32x1xi1>
    %373 = vector.broadcast %372 : vector<32x1xi1> to vector<32x2xi1>
    %374 = vector.broadcast %cst_105 : f32 to vector<32x2xf32>
    %375 = arith.select %373, %374, %371 : vector<32x2xi1>, vector<32x2xf32>
    %376 = vector.extract_strided_slice %313 {offsets = [10, 0], sizes = [32, 2], strides = [1, 1]} : vector<50x2xf32> to vector<32x2xf32>
    %cst_106 = arith.constant 0.000000e+00 : f32
    %377 = vector.shape_cast %20 : vector<32x1xi1> to vector<32x1xi1>
    %378 = vector.broadcast %377 : vector<32x1xi1> to vector<32x2xi1>
    %379 = vector.broadcast %cst_106 : f32 to vector<32x2xf32>
    %380 = arith.select %378, %379, %376 : vector<32x2xi1>, vector<32x2xf32>
    %381 = vector.extract_strided_slice %312 {offsets = [18, 0], sizes = [32, 2], strides = [1, 1]} : vector<50x2xf32> to vector<32x2xf32>
    %cst_107 = arith.constant 0.000000e+00 : f32
    %382 = vector.shape_cast %20 : vector<32x1xi1> to vector<32x1xi1>
    %383 = vector.broadcast %382 : vector<32x1xi1> to vector<32x2xi1>
    %384 = vector.broadcast %cst_107 : f32 to vector<32x2xf32>
    %385 = arith.select %383, %384, %381 : vector<32x2xi1>, vector<32x2xf32>
    %386 = tpu.concatenate %357, %362, %367, %368, %369, %370, %375, %380, %385 in 1 : vector<32x2xf32>, vector<32x2xf32>, vector<32x2xf32>, vector<32x2xf32>, vector<32x2xf32>, vector<32x2xf32>, vector<32x2xf32>, vector<32x2xf32>, vector<32x2xf32> -> vector<32x18xf32>
    %cst_108 = arith.constant dense<0.000000e+00> : vector<32x4xf32>
    %387 = tpu.matmul %386, %33, %cst_108 {dimension_numbers = #tpu.dot_dimension_numbers<[1], [0], [0], [1], [0, 0, 1, 1], [], []>} : vector<32x18xf32>, vector<18x4xf32>, vector<32x4xf32> -> vector<32x4xf32>
    %388 = vector.broadcast %34 : vector<1x4xf32> to vector<32x4xf32>
    %389 = arith.addf %387, %388 : vector<32x4xf32>
    %cst_109 = arith.constant 0.000000e+00 : f32
    %390 = vector.broadcast %cst_109 : f32 to vector<32x4xf32>
    %391 = arith.maximumf %389, %390 : vector<32x4xf32>
    %392 = arith.maximumf %352, %391 : vector<32x4xf32>
    %cst_110 = arith.constant 0.000000e+00 : f32
    %393 = vector.broadcast %cst_110 : f32 to vector<8x32xf32>
    %394 = vector.extract_strided_slice %392 {offsets = [0, 0], sizes = [8, 4], strides = [1, 1]} : vector<32x4xf32> to vector<8x4xf32>
    %c0_111 = arith.constant 0 : index
    %c0_112 = arith.constant 0 : index
    %c0_113 = arith.constant 0 : index
    %395 = vector.load %arg8[%c0_111, %c0_112, %c0_113] : memref<4x4x32xf32, #tpu.memory_space<vmem>>, vector<1x4x32xf32>
    %396 = vector.shape_cast %395 : vector<1x4x32xf32> to vector<4x32xf32>
    %cst_114 = arith.constant dense<0.000000e+00> : vector<8x32xf32>
    %397 = tpu.matmul %394, %396, %cst_114 {dimension_numbers = #tpu.dot_dimension_numbers<[1], [0], [0], [1], [0, 0, 1, 1], [], []>} : vector<8x4xf32>, vector<4x32xf32>, vector<8x32xf32> -> vector<8x32xf32>
    %398 = arith.addf %393, %397 : vector<8x32xf32>
    %399 = vector.extract_strided_slice %392 {offsets = [8, 0], sizes = [8, 4], strides = [1, 1]} : vector<32x4xf32> to vector<8x4xf32>
    %c1_115 = arith.constant 1 : index
    %c0_116 = arith.constant 0 : index
    %c0_117 = arith.constant 0 : index
    %400 = vector.load %arg8[%c1_115, %c0_116, %c0_117] : memref<4x4x32xf32, #tpu.memory_space<vmem>>, vector<1x4x32xf32>
    %401 = vector.shape_cast %400 : vector<1x4x32xf32> to vector<4x32xf32>
    %cst_118 = arith.constant dense<0.000000e+00> : vector<8x32xf32>
    %402 = tpu.matmul %399, %401, %cst_118 {dimension_numbers = #tpu.dot_dimension_numbers<[1], [0], [0], [1], [0, 0, 1, 1], [], []>} : vector<8x4xf32>, vector<4x32xf32>, vector<8x32xf32> -> vector<8x32xf32>
    %403 = arith.addf %398, %402 : vector<8x32xf32>
    %404 = vector.extract_strided_slice %392 {offsets = [16, 0], sizes = [8, 4], strides = [1, 1]} : vector<32x4xf32> to vector<8x4xf32>
    %c2_119 = arith.constant 2 : index
    %c0_120 = arith.constant 0 : index
    %c0_121 = arith.constant 0 : index
    %405 = vector.load %arg8[%c2_119, %c0_120, %c0_121] : memref<4x4x32xf32, #tpu.memory_space<vmem>>, vector<1x4x32xf32>
    %406 = vector.shape_cast %405 : vector<1x4x32xf32> to vector<4x32xf32>
    %cst_122 = arith.constant dense<0.000000e+00> : vector<8x32xf32>
    %407 = tpu.matmul %404, %406, %cst_122 {dimension_numbers = #tpu.dot_dimension_numbers<[1], [0], [0], [1], [0, 0, 1, 1], [], []>} : vector<8x4xf32>, vector<4x32xf32>, vector<8x32xf32> -> vector<8x32xf32>
    %408 = arith.addf %403, %407 : vector<8x32xf32>
    %409 = vector.extract_strided_slice %392 {offsets = [24, 0], sizes = [8, 4], strides = [1, 1]} : vector<32x4xf32> to vector<8x4xf32>
    %c3_123 = arith.constant 3 : index
    %c0_124 = arith.constant 0 : index
    %c0_125 = arith.constant 0 : index
    %410 = vector.load %arg8[%c3_123, %c0_124, %c0_125] : memref<4x4x32xf32, #tpu.memory_space<vmem>>, vector<1x4x32xf32>
    %411 = vector.shape_cast %410 : vector<1x4x32xf32> to vector<4x32xf32>
    %cst_126 = arith.constant dense<0.000000e+00> : vector<8x32xf32>
    %412 = tpu.matmul %409, %411, %cst_126 {dimension_numbers = #tpu.dot_dimension_numbers<[1], [0], [0], [1], [0, 0, 1, 1], [], []>} : vector<8x4xf32>, vector<4x32xf32>, vector<8x32xf32> -> vector<8x32xf32>
    %413 = arith.addf %408, %412 : vector<8x32xf32>
    %c0_127 = arith.constant 0 : index
    %c0_128 = arith.constant 0 : index
    %414 = vector.load %arg9[%c0_127, %c0_128] : memref<1x32xf32, #tpu.memory_space<vmem>>, vector<1x32xf32>
    %415 = vector.broadcast %414 : vector<1x32xf32> to vector<8x32xf32>
    %416 = arith.addf %413, %415 : vector<8x32xf32>
    %c0_129 = arith.constant 0 : index
    %c0_130 = arith.constant 0 : index
    %c0_131 = arith.constant 0 : index
    %417 = vector.load %arg10[%c0_129, %c0_130, %c0_131] : memref<1x8x32xf32, #tpu.memory_space<vmem>>, vector<1x8x32xf32>
    %418 = vector.shape_cast %417 : vector<1x8x32xf32> to vector<8x32xf32>
    %419 = vector.shape_cast %416 : vector<8x32xf32> to vector<1x8x32xf32>
    tpu.vector_store %arg10[%c0_129, %c0_130, %c0_131], %419 {strides = array<i32>} : memref<1x8x32xf32, #tpu.memory_space<vmem>>, vector<1x8x32xf32>,
    return
  }
  func.func @transform_0(%arg0: i32) -> (i32, i32, i32, i32) {
    %c0_i32 = arith.constant 0 : i32
    %c0_i32_0 = arith.constant 0 : i32
    %c0_i32_1 = arith.constant 0 : i32
    %c0_i32_2 = arith.constant 0 : i32
    return %arg0, %c0_i32, %c0_i32_0, %c0_i32_1 : i32, i32, i32, i32
  }
  func.func @transform_1(%arg0: i32) -> (i32, i32) {
    %c0_i32 = arith.constant 0 : i32
    %c0_i32_0 = arith.constant 0 : i32
    %c0_i32_1 = arith.constant 0 : i32
    return %c0_i32, %c0_i32_0 : i32, i32
  }
  func.func @transform_2(%arg0: i32) -> (i32, i32) {
    %c0_i32 = arith.constant 0 : i32
    %c0_i32_0 = arith.constant 0 : i32
    %c0_i32_1 = arith.constant 0 : i32
    return %c0_i32, %c0_i32_0 : i32, i32
  }
  func.func @transform_3(%arg0: i32) -> (i32, i32) {
    %c0_i32 = arith.constant 0 : i32
    %c0_i32_0 = arith.constant 0 : i32
    %c0_i32_1 = arith.constant 0 : i32
    return %c0_i32, %c0_i32_0 : i32, i32
  }
  func.func @transform_4(%arg0: i32) -> (i32, i32) {
    %c0_i32 = arith.constant 0 : i32
    %c0_i32_0 = arith.constant 0 : i32
    %c0_i32_1 = arith.constant 0 : i32
    return %c0_i32, %c0_i32_0 : i32, i32
  }
  func.func @transform_5(%arg0: i32) -> (i32, i32) {
    %c0_i32 = arith.constant 0 : i32
    %c0_i32_0 = arith.constant 0 : i32
    %c0_i32_1 = arith.constant 0 : i32
    return %c0_i32, %c0_i32_0 : i32, i32
  }
  func.func @transform_6(%arg0: i32) -> (i32, i32) {
    %c0_i32 = arith.constant 0 : i32
    %c0_i32_0 = arith.constant 0 : i32
    %c0_i32_1 = arith.constant 0 : i32
    return %c0_i32, %c0_i32_0 : i32, i32
  }
  func.func @transform_7(%arg0: i32) -> (i32, i32, i32) {
    %c0_i32 = arith.constant 0 : i32
    %c0_i32_0 = arith.constant 0 : i32
    %c0_i32_1 = arith.constant 0 : i32
    %c0_i32_2 = arith.constant 0 : i32
    return %c0_i32, %c0_i32_0, %c0_i32_1 : i32, i32, i32
  }
  func.func @transform_8(%arg0: i32) -> (i32, i32) {
    %c0_i32 = arith.constant 0 : i32
    %c0_i32_0 = arith.constant 0 : i32
    %c0_i32_1 = arith.constant 0 : i32
    return %c0_i32, %c0_i32_0 : i32, i32
  }
  func.func @transform_9(%arg0: i32) -> (i32, i32, i32) {
    %c0_i32 = arith.constant 0 : i32
    %c0_i32_0 = arith.constant 0 : i32
    %c0_i32_1 = arith.constant 0 : i32
    return %arg0, %c0_i32, %c0_i32_0 : i32, i32, i32
  }
}

</mosaic_0001>

<bundles_post_ra>
// kernel: conv_stack_forward.1
= control target key start
LH: loop header
LB: loop body
LE: loop exit
PB: predicated region body
PF: predicated region fallthrough
CT: control target
= control target key end

     0   :  { %14 = vsyncpa [#allocation3], 0  ;;  %s7038_s0 = inlined_call_operand.vmem [shape: f32[2,4,32,1], index: 0, kind: input, shape index: {}]   ;;  %s7039_s1 = inlined_call_operand.vmem [shape: f32[9,2], index: 1, kind: input, shape index: {}]   ;;  %s7040_s2 = inlined_call_operand.vmem [shape: f32[1,2], index: 2, kind: input, shape index: {}]   ;;  %s7041_s3 = inlined_call_operand.vmem [shape: f32[18,2], index: 3, kind: input, shape index: {}]   ;;  %s7042_s4 = inlined_call_operand.vmem [shape: f32[1,2], index: 4, kind: input, shape index: {}]   ;;  %s7043_s5 = inlined_call_operand.vmem [shape: f32[18,4], index: 5, kind: input, shape index: {}]   ;;  %s7044_s6 = inlined_call_operand.vmem [shape: f32[1,4], index: 6, kind: input, shape index: {}]   ;;  %s7045_s7 = inlined_call_operand.vmem [shape: f32[4,4,32], index: 7, kind: input, shape index: {}]   ;;  %s7046_s8 = inlined_call_operand.vmem [shape: f32[1,32], index: 8, kind: input, shape index: {}]   ;;  %s7047_s9 = inlined_call_operand.hbm [shape: f32[2,8,32], index: 9, kind: output, shape index: {}]  }
   0x1   :  { %16 = vsyncpa [#allocation3 + $0x1], 0  ;;  %s4391_s30 = smov 0   ;;  %s4393_s10 = smov 0  }
   0x2   :  { %s4395_s11 = smov 0   ;;  %s4397_s12 = smov 0  }
   0x3 LB: > { %s4412_s13 = sadd.s32 4294967295, %s4323_s12   ;;  %s3864_s14 = sadd.s32 4294967294, %s4323_s12   ;;  %s4323_s12 = sphi %s4397_s12, %s7639_s12   ;;  %s4319_s11 = sphi %s4395_s11, %s7638_s11   ;;  %s4315_s10 = sphi %s4393_s10, %s7637_s10   ;;  %s4311_s30 = sphi %s4391_s30, %s7636_s30  }
   0x4   : > { %s4416_s15 = sadd.s32 1, %s4323_s12   ;;  %s223_s16 = sadd.s32 1, %s4319_s11 }
   0x5   : > { %s220_s17 = ssub.s32 %s4323_s12, %s4416_s15  ;;  %p233_p0 = scmp.ne.s32.totalorder %s4319_s11, %s4315_s10 }
   0x6   : > { %p221_p1 = scmp.eq.s32.totalorder %s220_s17, 0  ;;  %p234_p2 = scmp.eq.s32.totalorder %s4412_s13, 1 }
   0x7   : > { %p239_p3 = scmp.ne.s32.totalorder %s4315_s10, %s4311_s30  ;;  %p240_p4 = scmp.eq.s32.totalorder %s3864_s14, 1 }
   0x8   : > { %s4427_s18 = scalar_select %p221_p1, %s4319_s11, %s223_s16  }
   0x9   : > { %p4429_p5 = por %p234_p2, %p233_p0  ;;  %p4433_p6 = por %p240_p4, %p239_p3 }
   0xa   : > { %p3867_p7 = scmp.ge.s32.totalorder %s4323_s12, 1  ;;  %p290_p8 = scmp.lt.s32.totalorder %s4323_s12, 3 }
   0xc   : > { %p291_p9 = pnand %p3867_p7, %p290_p8 }
   0xe   : > { %294 = sbr.rel (%p291_p9) target bundleno = 1721 (0x6b9), region = 56 }
  0x15   : > { %p326_p10 = scmp.lt.s32.totalorder %s4412_s13, 1  ;;  %v331_v0 = vlaneseq  ;;  %vm7088_vm0 = vcmask 1040384   ;;  %v7143_v7 = vmov 0  ;;  %v7147_v19 = vmov 0  ;;  %s4325_s26 = smov 2  }
  0x16   : > { %s4326_s27 = smov 1   ;;  %v7048_v32 = vmov 0.0   ;;  %vm7086_vm3 = vcmask 1046528   ;;  %s4328_s28 = smov 3   ;;  %vm7085_vm5 = vcmask 1045504   ;;  %vm4334_vm9 = vmmov 1  }
  0x17   : > { %s327_s21 = scalar_select %p326_p10, %s4412_s13, 1  ;;  %v4441_v1 = vshrl.u32 %v331_v0, 7  ;;  %v4532_v33 = vrot.slane %v7048_v32, 1  ;;  %vm4841_vm10 = vmpackc.low %vm7088_vm0, %vm4334_vm9  ;;  %vm7092_vm13 = vcmask 7168   ;;  %vm7089_vm14 = vcmask 15360  }
  0x18   : > { %s4329_s29 = smov 4   ;;  %s4330_s14 = smov 5   ;;  %vm7095_vm15 = vcmask 23552   ;;  %vm7090_vm9 = vcmask 31744  }
  0x19   : > { %s3952_s22 = sshll.u32 %s327_s21, 7  ;;  %v4444_v2 = vadd.s32 8, %v4441_v1  ;;  %v340_v3 = vand.u32 7, %v4441_v1  ;;  %7152 = vst [vmem:[#allocation10_spill] sm:$0xff] %v4532_v33  ;;  %v4554_v42 = vadd.s32 16, %v4441_v1  ;;  %v4585_v52 = vadd.s32 24, %v4441_v1 }
  0x1a   : > { %s4450_s25 = scalar_lea.vmem %s7038_s0, %s3952_s22  ;;  %s4331_s16 = smov 6  }
  0x1b   : > { %v3871_v4 = vld [vmem:[%s4450_s25 + $0x20] sm:$0xff]  ;;  %v347_v6 = vand.u32 7, %v4444_v2  ;;  %vm4457_vm1 = vcmp.eq.s32.totalorder %v340_v3, 0  ;;  %v393_v10 = vld [vmem:[%s4450_s25 + $0x8] sm:$0xff]  ;;  %v394_v37 = vld [vmem:[%s4450_s25 + $0x10] sm:$0xff]  ;;  %v7058_v47 = vand.u32 7, %v4554_v42 }
  0x1c   : > { %v392_v5 = vld [vmem:[%s4450_s25] sm:$0xff]  ;;  %v7144_v7 = vsel %vm4457_vm1, 4294967295, %v7143_v7  ;;  %v445_v8 = vrot.slane %v3871_v4, 7  ;;  %v4464_v12 = vld [vmem:[%s4450_s25 + $0x28] sm:$0xff]  ;;  %v428_v20 = vrot.slane %v393_v10, 7  ;;  %v430_v44 = vrot.slane %v394_v37, 7 }
  0x1d   : > { %7145 = vst [vmem:[#allocation5_spill] sm:$0xff] %v7144_v7  ;;  %v427_v9 = vrot.slane %v392_v5, 7  ;;  %v3875_v11 = vld [vmem:[%s4450_s25 + $0x40] sm:$0xff]  ;;  %v4484_v18 = vld [vmem:[%s4450_s25 + $0x68] sm:$0xff]  ;;  %vm4488_vm2 = vcmp.eq.s32.totalorder %v347_v6, 0  ;;  %v446_v22 = vrot.slane %v4464_v12, 7 }
  0x1e   : > { %v4467_v13 = vsel %vm7088_vm0, 0.0, %v445_v8  ;;  %v3879_v15 = vld [vmem:[%s4450_s25 + $0x60] sm:$0xff]  ;;  %v7148_v19 = vsel %vm4488_vm2, 4294967295, %v7147_v19  ;;  %v463_v21 = vrot.slane %v3875_v11, 7  ;;  %v482_v27 = vrot.slane %v4484_v18, 7  ;;  %v4541_v36 = vld [vmem:[%s4450_s25 + $0x48] sm:$0xff] }
  0x1f   : > { %v4470_v14 = vsel %vm7088_vm0, 0.0, %v427_v9  ;;  %v4476_v16 = vsel %vm4457_vm1, 0.0, %v4467_v13  ;;  %7149 = vst [vmem:[#allocation7_spill] sm:$0xff] %v7148_v19  ;;  %v481_v23 = vrot.slane %v3879_v15, 7  ;;  %v4498_v24 = vsel %vm7088_vm0, %v427_v9, %v428_v20  ;;  %v4596_v56 = vld [vmem:[%s4450_s25 + $0x18] sm:$0xff]  ;;  %v3873_v57 = vld [vmem:[%s4450_s25 + $0x30] sm:$0xff] }
  0x20   : > { %7146 = vst [vmem:[#allocation6_spill] sm:$0xff] %v4476_v16  ;;  %v4481_v17 = vsel %vm4457_vm1, 0.0, %v4470_v14  ;;  %584 = vrot.lane.b32.xlu1 %v4476_v16, %s4325_s26  ;;  %v4501_v25 = vsel %vm7088_vm0, 0.0, %v463_v21  ;;  %v4506_v26 = vsel %vm7088_vm0, %v445_v8, %v446_v22  ;;  %v4512_v28 = vsel %vm4488_vm2, 0.0, %v4498_v24  ;;  %v3878_v5 = vld [vmem:[%s4450_s25 + $0x58] sm:$0xff]  ;;  %v3877_v15 = vld [vmem:[%s4450_s25 + $0x50] sm:$0xff] }
  0x21   : > { %568 = vrot.lane.b32.xlu0 %v4481_v17, %s4326_s27  ;;  %v4519_v29 = vsel %vm7088_vm0, 0.0, %v481_v23  ;;  %v4524_v30 = vsel %vm4457_vm1, 0.0, %v4501_v25  ;;  %v4529_v31 = vsel %vm4488_vm2, 0.0, %v4506_v26  ;;  %v4538_v35 = vsel %vm7088_vm0, %v481_v23, %v482_v27  ;;  %v3881_v37 = vld [vmem:[%s4450_s25 + $0x70] sm:$0xff]  ;;  %s4332_s17 = smov 7   ;;  %s4337_s21 = smov 14  }
  0x22   : > { %7150 = vst [vmem:[#allocation8_spill] sm:$0xff] %v4524_v30  ;;  %7151 = vst [vmem:[#allocation9_spill] sm:$0xff] %v4529_v31  ;;  %v598_v34 = vrot.slane %v4519_v29, 1  ;;  %v618_v38 = vrot.slane %v4470_v14, 1  ;;  %v619_v40 = vrot.slane %v4498_v24, 1  ;;  %v600_v41 = vrot.slane %v4538_v35, 1 }
  0x23   : > { %7153 = vst [vmem:[#allocation11_spill] sm:$0xff] %v4538_v35  ;;  %v464_v43 = vrot.slane %v4541_v36, 7  ;;  %v4573_v49 = vsel %vm7088_vm0, %v428_v20, %v430_v44  ;;  %vm4589_vm4 = vcmp.eq.s32.totalorder %v7058_v47, 0  ;;  %v865_v54 = vrot.slane %v4501_v25, 2  ;;  %s4338_s22 = smov 16  }
  0x24   : > { %882 = vrot.lane.b32.xlu1 %v4476_v16, %s4326_s27  ;;  %v599_v39 = vsel %vm7086_vm3, %v4532_v33, %v598_v34  ;;  %v620_v45 = vsel %vm7086_vm3, %v618_v38, %v619_v40  ;;  %v4564_v46 = vsel %vm7086_vm3, %v598_v34, %v600_v41  ;;  %v621_v51 = vrot.slane %v4573_v49, 1 }
  0x25   : > { %570 = vrot.lane.b32.xlu0 %v4512_v28, %s4326_s27  ;;  %v4570_v48 = vsel %vm7088_vm0, %v463_v21, %v464_v43  ;;  %v4610_v59 = vsel %vm4589_vm4, 0.0, %v4573_v49  ;;  %v639_v60 = vrot.slane %v4467_v13, 1  ;;  %v640_v61 = vrot.slane %v4506_v26, 1 }
  0x26   : > { %v4581_v50 = vsel %vm4488_vm2, 0.0, %v4570_v48  ;;  %v7052_v55 = vrot.slane %v4570_v48, 2  ;;  %v4605_v58 = vsel %vm7086_vm3, %v619_v40, %v621_v51  ;;  %7157 = vst [vmem:[#allocation13_spill] sm:$0xff] %v4610_v59  ;;  %v7051_v62 = vand.u32 7, %v4585_v52 }
  0x27   : > { %7154 = vst [vmem:[#allocation12_spill] sm:$0xff] %v4581_v50  ;;  %v432_v63 = vrot.slane %v4596_v56, 7  ;;  %v448_v0 = vrot.slane %v3873_v57, 7  ;;  %v4627_v8 = vsel %vm7086_vm3, %v639_v60, %v640_v61  ;;  %v468_v20 = vrot.slane %v3878_v5, 7 }
  0x28   : > { %898 = vrot.lane.b32.xlu1 %v4524_v30, %s4325_s26  ;;  %v4619_v4 = vsel %vm7085_vm5, %v865_v54, %v7052_v55  ;;  %vm4631_vm6 = vcmp.eq.s32.totalorder %v7051_v62, 0  ;;  %v466_v12 = vrot.slane %v3877_v15, 7  ;;  %v510_v34 = vrot.slane %v4519_v29, 2  ;;  %v4697_v15 = vld [vmem:[%s4450_s25 + $0x38] sm:$0xff] }
  0x29   : > { %586 = vrot.lane.b32.xlu0 %v4529_v31, %s4325_s26  ;;  %v4638_v10 = vsel %vm7088_vm0, %v430_v44, %v432_v63  ;;  %v4643_v11 = vsel %vm7088_vm0, %v446_v22, %v448_v0  ;;  %v4657_v22 = vrot.slane %v7048_v32, 2  ;;  %vm4685_vm7 = vcmp.eq.s32.totalorder %v340_v3, 7 }
  0x2a   : > { %v4653_v21 = vsel %vm4631_vm6, 0.0, %v4638_v10  ;;  %v642_v23 = vrot.slane %v4643_v11, 1  ;;  %v4662_v38 = vsel %vm7088_vm0, %v466_v12, %v468_v20  ;;  %v4681_v54 = vsel %vm4589_vm4, 0.0, %v4643_v11 }
  0x2b   : > { %7160 = vst [vmem:[#allocation14_spill] sm:$0xff] %v4653_v21  ;;  %7161 = vst [vmem:[#allocation15_spill] sm:$0xff] %v4657_v22  ;;  %v7050_v40 = vrot.slane %v4662_v38, 2  ;;  %v511_v60 = vsel %vm7085_vm5, %v4657_v22, %v510_v34  ;;  %v484_v5 = vrot.slane %v3881_v37, 7  ;;  %v934_v3 = vrot.slane %v4501_v25, 1 }
  0x2c   : > { %606 = vrot.lane.b32.xlu1 %v599_v39, %s4328_s28  ;;  %v4665_v39 = vsel %vm7088_vm0, %v468_v20, 0.0  ;;  %7162 = vst [vmem:[#allocation16_spill] sm:$0xff] %v4681_v54  ;;  %v522_v1 = vsel %vm4685_vm7, 0.0, %v511_v60  ;;  %v935_v20 = vrot.slane %v4570_v48, 1  ;;  %v528_v32 = vrot.slane %v4470_v14, 2 }
  0x2d   : > { %884 = vrot.lane.b32.xlu0 %v4529_v31, %s4326_s27  ;;  %v872_v44 = vrot.slane %v4665_v39, 2  ;;  %v4710_v37 = vsel %vm7088_vm0, %v482_v27, %v484_v5  ;;  %v529_v27 = vrot.slane %v4498_v24, 2  ;;  %vm4744_vm8 = vcmp.eq.s32.totalorder %v347_v6, 7 }
  0x2e   : > { %7165 = vst [vmem:[#allocation17_spill] sm:$0xff] %v4710_v37  ;;  %v4717_v60 = vsel %vm7086_vm3, %v934_v3, %v935_v20  ;;  %v602_v25 = vrot.slane %v4710_v37, 1  ;;  %v7180_v31 = vrot.slane %v4570_v48, 2  ;;  %v7181_v48 = vand.u32 7, %v4585_v52 }
  0x2f   : > { %v530_v3 = vsel %vm7085_vm5, %v528_v32, %v529_v27  ;;  %v4769_v32 = vsel %vm7088_vm0, %v464_v43, %v466_v12  ;;  %v623_v12 = vrot.slane %v4638_v10, 1  ;;  %v1380_v7 = vsel %vm4488_vm2, 0.0, %v4573_v49 }
  0x30   : > { %627 = vrot.lane.b32.xlu1 %v620_v45, %s4329_s29  ;;  %v541_v2 = vsel %vm4685_vm7, 0.0, %v530_v3  ;;  %v4777_v3 = vsel %vm4589_vm4, 0.0, %v4769_v32  ;;  %v7055_v55 = vrot.slane %v4769_v32, 1  ;;  %vm4979_vm12 = vcmp.eq.s32.totalorder %v7181_v48, 7 }
  0x31   : > { %608 = vrot.lane.b32.xlu0 %v4564_v46, %s4328_s28  ;;  %7169 = vst [vmem:[#allocation19_spill] sm:$0xff] %v4777_v3 }
  0x32   : > { %v4792_v43 = vsel %vm7086_vm3, %v935_v20, %v7055_v55  ;;  %v4805_v20 = vsel %vm7086_vm3, %v621_v51, %v623_v12 }
  0x34   : > { %910 = vrot.lane.b32.xlu1 %v620_v45, %s4328_s28  ;;  %v4676_v45 = vsel %vm7086_vm3, %v640_v61, %v642_v23  ;;  %v4694_v61 = vsel %vm7085_vm5, %v7050_v40, %v872_v44  ;;  %v7059_v44 = vrot.slane %v4697_v15, 7  ;;  %v7053_v40 = vrot.slane %v4538_v35, 2 }
  0x35   : > { %900 = vrot.lane.b32.xlu0 %v4581_v50, %s4325_s26 }
  0x36   : > { %v4724_v18 = vsel %vm7088_vm0, %v448_v0, %v7059_v44  ;;  %v4752_v62 = vsel %vm7085_vm5, %v510_v34, %v7053_v40  ;;  %v547_v40 = vrot.slane %v4467_v13, 2 }
  0x37   : > { %v4740_v14 = vsel %vm4631_vm6, 0.0, %v4724_v18  ;;  %v523_v6 = vsel %vm4744_vm8, 0.0, %v4752_v62  ;;  %v644_v56 = vrot.slane %v4724_v18, 1 }
  0x38   : > { %629 = vrot.lane.b32.xlu1 %v4605_v58, %s4329_s29  ;;  %7166 = vst [vmem:[#allocation18_spill] sm:$0xff] %v4740_v14 }
  0x39   : > { %572 = vrot.lane.b32.xlu0 %v4610_v59, %s4326_s27 }
  0x3c   : > { %912 = vrot.lane.b32.xlu1 %v4605_v58, %s4328_s28 }
  0x3d   : > { %648 = vrot.lane.b32.xlu0 %v4627_v8, %s4330_s14 }
  0x40   : > { %574 = vrot.lane.b32.xlu1 %v4653_v21, %s4326_s27  ;;  %v552_v21 = vrot.slane %v4724_v18, 2  ;;  %v7189_v18 = vrot.slane %v4643_v11, 2 }
  0x41   : > { %922 = vrot.lane.b32.xlu0 %v4627_v8, %s4329_s29 }
  0x44   : > { %650 = vrot.lane.b32.xlu1 %v4676_v45, %s4330_s14 }
  0x45   : > { %588 = vrot.lane.b32.xlu0 %v4681_v54, %s4325_s26 }
  0x48   : > { %886 = vrot.lane.b32.xlu1 %v4681_v54, %s4326_s27  ;;  %v7066_v54 = vrot.slane %v4769_v32, 2 }
  0x49   : > { %664 = vrot.lane.b32.xlu0 %v522_v1, %s4331_s16  ;;  %v4735_v1 = vsel %vm7086_vm3, %v600_v41, %v602_v25  ;;  %v4755_v41 = vld [vmem:[%s4450_s25 + $0x78] sm:$0xff]  ;;  %s4333_s25 = smov 8  }
  0x4a   : > { %v7054_v34 = vrot.slane %v4755_v41, 7 }
  0x4c   : > { %943 = vrot.lane.b32.xlu1 %v4717_v60, %s4330_s14  ;;  %v4783_v36 = vsel %vm7088_vm0, %v484_v5, %v7054_v34  ;;  %v548_v5 = vrot.slane %v4506_v26, 2  ;;  %v7057_v34 = vrot.slane %v4573_v49, 2 }
  0x4d   : > { %924 = vrot.lane.b32.xlu0 %v4676_v45, %s4329_s29 }
  0x4e   : > { %v549_v13 = vsel %vm7085_vm5, %v547_v40, %v548_v5  ;;  %v4816_v26 = vsel %vm7085_vm5, %v529_v27, %v7057_v34  ;;  %v411_v40 = vld [vmem:[%s7039_s1] sm:$0xff]  ;;  %v412_v27 = vld [vmem:[%s7039_s1 + $0x8] sm:$0x1]  ;;  %v4886_v34 = vsel %vm7086_vm3, %v642_v23, %v644_v56  ;;  %v514_v23 = vrot.slane %v4710_v37, 2 }
  0x4f   : > { %v4824_v51 = vsel %vm4685_vm7, 0.0, %v549_v13 }
  0x50   : > { %610 = vrot.lane.b32.xlu1 %v4735_v1, %s4328_s28 }
  0x51   : > { %590 = vrot.lane.b32.xlu0 %v4740_v14, %s4325_s26 }
  0x54   : > { %680 = vrot.lane.b32.xlu1 %v541_v2, %s4332_s17 }
  0x55   : > { %666 = vrot.lane.b32.xlu0 %v523_v6, %s4331_s16  ;;  %v7056_v6 = vrot.slane %v4783_v36, 1 }
  0x57   : > { %v4810_v55 = vsel %vm7086_vm3, %v602_v25, %v7056_v6  ;;  %v542_v25 = vsel %vm4744_vm8, 0.0, %v4816_v26  ;;  %v4848_v6 = vsel %vm4631_vm6, 0.0, %v4662_v38 }
  0x58   : > { %902 = vrot.lane.b32.xlu1 %v4777_v3, %s4325_s26  ;;  %7172 = vst [vmem:[#allocation20_spill] sm:$0xff] %v4848_v6 }
  0x59   : > { %888 = vrot.lane.b32.xlu0 %v4740_v14, %s4326_s27 }
  0x5c   : > { %955 = vrot.lane.b32.xlu1 %v541_v2, %s4331_s16  ;;  %v4835_v2 = vpack.c.bf16 %v412_v27, %v411_v40  ;;  %v4859_v40 = vsel %vm7088_vm0, %v432_v63, 0.0  ;;  %v7061_v27 = vrot.slane %v4643_v11, 2 }
  0x5d   : > { %945 = vrot.lane.b32.xlu0 %v4792_v43, %s4330_s14  ;;  %v7060_v63 = vrot.slane %v4859_v40, 1 }
  0x5e   : > { %4161 = vmatprep.subr.msk.bf16.mxu0 %vm4841_vm10, %v4835_v2  ;;  %4167 = vmatprep.subr.msk.bf16.mxu1 %vm4841_vm10, %v4835_v2  ;;  %v551_v44 = vsel %vm7085_vm5, %v548_v5, %v7061_v27  ;;  %v7175_v27 = vand.u32 7, %v4554_v42 }
  0x5f   : > { %4164 = vmatpush3.bf16.msk.msra.mxu0 %vm4841_vm10, %v4835_v2  ;;  %4170 = vmatpush3.bf16.msk.msra.mxu1 %vm4841_vm10, %v4835_v2  ;;  %v4891_v47 = vsel %vm7086_vm3, %v623_v12, %v7060_v63  ;;  %v7174_v12 = vrot.slane %v4697_v15, 7  ;;  %v7176_v15 = vmov 0 }
  0x60   : > { %631 = vrot.lane.b32.xlu1 %v4805_v20, %s4329_s29  ;;  %4173 = vmatprep.subr.msk.bf16.mxu0 %vm4841_vm10, %v4835_v2  ;;  %7173 = vst [vmem:[#allocation21_spill] sm:$0xff] %v4891_v47  ;;  %vm4926_vm11 = vcmp.eq.s32.totalorder %v7175_v27, 7  ;;  %v939_v27 = vrot.slane %v4662_v38, 1 }
  0x61   : > { %612 = vrot.lane.b32.xlu0 %v4810_v55, %s4328_s28  ;;  %4179 = vmatprep.subr.msk.bf16.mxu1 %vm4841_vm10, %v4835_v2  ;;  %v4912_v5 = vsel %vm7088_vm0, %v7174_v12, 0.0  ;;  %v7177_v15 = vsel %vm4926_vm11, 4294967295, %v7176_v15  ;;  %v7178_v12 = vrot.slane %v4538_v35, 2  ;;  %vm7096_vm0 = vcmask 56320  }
  0x62   : > { %v646_v63 = vrot.slane %v4912_v5, 1 }
  0x63   : > { %v4933_v14 = vsel %vm7085_vm5, %v7178_v12, %v514_v23  ;;  %v7179_v12 = vrot.slane %v4769_v32, 1 }
  0x64   : > { %696 = vrot.lane.b32.xlu1 %v4824_v51, %s4333_s25  ;;  %v4943_v42 = vsel %vm7086_vm3, %v644_v56, %v646_v63  ;;  %v869_v56 = vsel %vm7085_vm5, %v7180_v31, %v7066_v54  ;;  %v1128_v31 = vsel %vm4457_vm1, 0.0, %v4519_v29  ;;  %v7182_v54 = vmov 0 }
  0x65   : > { %682 = vrot.lane.b32.xlu0 %v542_v25, %s4332_s17  ;;  %v4966_v63 = vsel %vm4744_vm8, 0.0, %v869_v56  ;;  %v7183_v54 = vsel %vm4979_vm12, 4294967295, %v7182_v54  ;;  %v7185_v56 = vrot.slane %v4573_v49, 2  ;;  %v7192_v49 = vrot.slane %v4662_v38, 2 }
  0x66   : > { %7184 = vst [vmem:[#allocation22_spill] sm:$0xff] %v7183_v54 }
  0x68   : > { %914 = vrot.lane.b32.xlu1 %v4805_v20, %s4328_s28 }
  0x69   : > { %904 = vrot.lane.b32.xlu0 %v4848_v6, %s4325_s26 }
  0x6c   : > { %967 = vrot.lane.b32.xlu1 %v4824_v51, %s4332_s17 }
  0x6d   : > { %957 = vrot.lane.b32.xlu0 %v542_v25, %s4331_s16  ;;  %v4902_v25 = vsel %vm4744_vm8, 0.0, %v551_v44  ;;  %v4921_v44 = vsel %vm4685_vm7, 0.0, %v4619_v4  ;;  %v524_v4 = vsel %vm4926_vm11, 0.0, %v4933_v14 }
  0x70   : > { %652 = vrot.lane.b32.xlu1 %v4886_v34, %s4330_s14 }
  0x71   : > { %633 = vrot.lane.b32.xlu0 %v4891_v47, %s4329_s29 }
  0x74   : > { %916 = vrot.lane.b32.xlu1 %v4891_v47, %s4328_s28 }
  0x75   : > { %698 = vrot.lane.b32.xlu0 %v4902_v25, %s4333_s25 }
  0x78   : > { %969 = vrot.lane.b32.xlu1 %v4902_v25, %s4332_s17 }
  0x79   : > { %926 = vrot.lane.b32.xlu0 %v4886_v34, %s4329_s29 }
  0x7c   : > { %1140 = vrot.lane.b32.xlu1 %v4524_v30, %s4326_s27  ;;  %v4953_v30 = vsel %vm7086_vm3, %v7179_v12, %v939_v27 }
  0x7d   : > { %983 = vrot.lane.b32.xlu0 %v4921_v44, %s4333_s25 }
  0x80   : > { %668 = vrot.lane.b32.xlu1 %v524_v4, %s4331_s16  ;;  %v533_v4 = vrot.slane %v4638_v10, 2 }
  0x81   : > { %654 = vrot.lane.b32.xlu0 %v4943_v42, %s4330_s14 }
  0x82   : > { %v4986_v12 = vsel %vm7085_vm5, %v7185_v56, %v533_v4  ;;  %v941_v56 = vrot.slane %v4665_v39, 1  ;;  %v1129_v39 = vsel %vm4488_vm2, 0.0, %v4538_v35 }
  0x83   : > { %7186 = vst [vmem:[#allocation23_spill] sm:$0xff] %v4986_v12  ;;  %v543_v52 = vsel %vm4926_vm11, 0.0, %v4986_v12  ;;  %v7193_v12 = vrot.slane %v4769_v32, 2 }
  0x84   : > { %947 = vrot.lane.b32.xlu1 %v4953_v30, %s4330_s14 }
  0x85   : > { %928 = vrot.lane.b32.xlu0 %v4943_v42, %s4329_s29 }
  0x88   : > { %1142 = vrot.lane.b32.xlu1 %v4581_v50, %s4326_s27  ;;  %v7187_v50 = vrot.slane %v4783_v36, 2 }
  0x89   : > { %985 = vrot.lane.b32.xlu0 %v4966_v63, %s4333_s25 }
  0x8a   : > { %v4991_v16 = vsel %vm7085_vm5, %v514_v23, %v7187_v50  ;;  %v5005_v50 = vsel %vm7086_vm3, %v939_v27, %v941_v56  ;;  %v7076_v27 = vrot.slane %v4859_v40, 2  ;;  %vm7093_vm3 = vcmask 48128  }
  0x8b   : > { %7188 = vst [vmem:[#allocation24_spill] sm:$0xff] %v4991_v16  ;;  %v525_v48 = vsel %vm4979_vm12, 0.0, %v4991_v16  ;;  %v553_v16 = vsel %vm7085_vm5, %v7189_v18, %v552_v21 }
  0x8c   : > { %1389 = vrot.lane.b32.xlu1 %v1128_v31, %s4326_s27  ;;  %v5039_v33 = vsel %vm7085_vm5, %v533_v4, %v7076_v27  ;;  %v554_v27 = vrot.slane %v4912_v5, 2 }
  0x8d   : > { %1156 = vrot.lane.b32.xlu0 %v1128_v31, %s4325_s26  ;;  %7190 = vst [vmem:[#allocation25_spill] sm:$0xff] %v5039_v33 }
  0x90   : > { %684 = vrot.lane.b32.xlu1 %v543_v52, %s4332_s17 }
  0x91   : > { %670 = vrot.lane.b32.xlu0 %v525_v48, %s4331_s16 }
  0x92   : > { %v5007_v23 = vpop.permute.xlu1 %584 }
  0x93   : > { %v5009_v31 = vpop.permute.xlu0 %568 }
  0x94   : > { %959 = vrot.lane.b32.xlu1 %v543_v52, %s4331_s16  ;;  %v1379_v52 = vsel %vm4457_vm1, 0.0, %v4498_v24  ;;  %v5045_v24 = vsel %vm4926_vm11, 0.0, %v553_v16 }
  0x95   : > { %949 = vrot.lane.b32.xlu0 %v5005_v50, %s4330_s14 }
  0x96   : > { %v5018_v59 = vpop.permute.xlu1 %882 }
  0x97   : > { %v5020_v48 = vpop.permute.xlu0 %570 }
  0x98   : > { %1168 = vrot.lane.b32.xlu1 %v4627_v8, %s4328_s28  ;;  %v544_v8 = vsel %vm4979_vm12, 0.0, %v5039_v33 }
  0x99   : > { %1158 = vrot.lane.b32.xlu0 %v1129_v39, %s4325_s26 }
  0x9a   : > { %v5029_v56 = vpop.permute.xlu1 %898 }
  0x9b   : > { %v5031_v22 = vpop.permute.xlu0 %586 }
  0x9c   : > { %1405 = vrot.lane.b32.xlu1 %v1379_v52, %s4325_s26 }
  0x9d   : > { %1391 = vrot.lane.b32.xlu0 %v1129_v39, %s4326_s27 }
  0x9e   : > { %v5050_v11 = vpop.permute.xlu1 %606 }
  0x9f   : > { %v5052_v18 = vpop.permute.xlu0 %884 }
  0xa0   : > { %700 = vrot.lane.b32.xlu1 %v5045_v24, %s4333_s25 }
  0xa1   : > { %686 = vrot.lane.b32.xlu0 %v544_v8, %s4332_s17 }
  0xa2   : > { %v5057_v4 = vpop.permute.xlu1 %627 }
  0xa3   : > { %v5059_v39 = vpop.permute.xlu0 %608 }
  0xa4   : > { %971 = vrot.lane.b32.xlu1 %v5045_v24, %s4332_s17 }
  0xa5   : > { %961 = vrot.lane.b32.xlu0 %v544_v8, %s4331_s16  ;;  %v555_v8 = vsel %vm7085_vm5, %v552_v21, %v554_v27  ;;  %v5128_v27 = vsel %vm4979_vm12, 0.0, %v4694_v61 }
  0xa6   : > { %v5064_v16 = vpop.permute.xlu1 %910  ;;  %v5086_v5 = vsel %vm4979_vm12, 0.0, %v555_v8 }
  0xa7   : > { %v5066_v52 = vpop.permute.xlu0 %900 }
  0xa8   : > { %1180 = vrot.lane.b32.xlu1 %v4717_v60, %s4329_s29 }
  0xa9   : > { %1170 = vrot.lane.b32.xlu0 %v4676_v45, %s4328_s28 }
  0xaa   : > { %v5076_v33 = vpop.permute.xlu1 %629 }
  0xab   : > { %v5078_v35 = vpop.permute.xlu0 %572 }
  0xac   : > { %7191 = vst [vmem:[#allocation26_spill] sm:$0xff] %v5078_v35  ;;  %1417 = vrot.lane.b32.xlu1 %v4717_v60, %s4328_s28  ;;  %v871_v35 = vsel %vm7085_vm5, %v7193_v12, %v7192_v49  ;;  %vm7094_vm5 = vcmask 39936  }
  0xad   : > { %1407 = vrot.lane.b32.xlu0 %v1380_v7, %s4325_s26  ;;  %v5101_v7 = vsel %vm4926_vm11, 0.0, %v871_v35 }
  0xae   : > { %v5088_v45 = vpop.permute.xlu1 %912 }
  0xaf   : > { %v649_v47 = vpop.permute.xlu0 %648 }
  0xb0   : > { %973 = vrot.lane.b32.xlu1 %v5086_v5, %s4332_s17 }
  0xb1   : > { %702 = vrot.lane.b32.xlu0 %v5086_v5, %s4333_s25 }
  0xb2   : > { %v5103_v21 = vpop.permute.xlu1 %574 }
  0xb3   : > { %7194 = vst [vmem:[#allocation27_spill] sm:$0xff] %v5103_v21  ;;  %v5105_v60 = vpop.permute.xlu0 %922 }
  0xb4   : > { %1144 = vrot.lane.b32.xlu1 %v4777_v3, %s4326_s27 }
  0xb5   : > { %987 = vrot.lane.b32.xlu0 %v5101_v7, %s4333_s25 }
  0xb6   : > { %v5111_v38 = vpop.permute.xlu1 %650 }
  0xb7   : > { %v5113_v32 = vpop.permute.xlu0 %588 }
  0xb8   : > { %1194 = vrot.lane.b32.xlu1 %v4564_v46, %s4330_s14 }
  0xb9   : > { %1182 = vrot.lane.b32.xlu0 %v4792_v43, %s4329_s29 }
  0xba   : > { %v5119_v35 = vpop.permute.xlu1 %886 }
  0xbb   : > { %7195 = vst [vmem:[#allocation28_spill] sm:$0xff] %v5119_v35  ;;  %v665_v12 = vpop.permute.xlu0 %664 }
  0xbc   : > { %1429 = vrot.lane.b32.xlu1 %v4564_v46, %s4329_s29  ;;  %v1130_v46 = vsel %vm4589_vm4, 0.0, %v4710_v37 }
  0xbd   : > { %1419 = vrot.lane.b32.xlu0 %v4792_v43, %s4328_s28 }
  0xbe   : > { %v5130_v8 = vpop.permute.xlu1 %943 }
  0xbf   : > { %v5132_v49 = vpop.permute.xlu0 %924 }
  0xc0   : > { %1146 = vrot.lane.b32.xlu1 %v4848_v6, %s4326_s27 }
  0xc1   : > { %989 = vrot.lane.b32.xlu0 %v5128_v27, %s4333_s25 }
  0xc2   : > { %v5141_v43 = vpop.permute.xlu1 %610 }
  0xc3   : > { %v5143_v3 = vpop.permute.xlu0 %590 }
  0xc4   : > { %7196 = vst [vmem:[#allocation29_spill] sm:$0xff] %v5143_v3  ;;  %1196 = vrot.lane.b32.xlu1 %v4735_v1, %s4330_s14  ;;  %v1131_v3 = vsel %vm4631_vm6, 0.0, %v4783_v36 }
  0xc5   : > { %1160 = vrot.lane.b32.xlu0 %v1130_v46, %s4325_s26 }
  0xc6   : > { %v681_v61 = vpop.permute.xlu1 %680 }
  0xc7   : > { %v667_v35 = vpop.permute.xlu0 %666 }
  0xc8   : > { %1393 = vrot.lane.b32.xlu1 %v1130_v46, %s4326_s27  ;;  %v709_v46 = vsel %vm7092_vm13, 0.0, %v5009_v31 }
  0xc9   : > { %1206 = vrot.lane.b32.xlu0 %v4824_v51, %s4331_s16 }
  0xca   : > { %v5151_v6 = vpop.permute.xlu1 %902 }
  0xcb   : > { %7197 = vst [vmem:[#allocation30_spill] sm:$0xff] %v5151_v6  ;;  %v5153_v21 = vpop.permute.xlu0 %888 }
  0xcc   : > { %7198 = vst [vmem:[#allocation31_spill] sm:$0xff] %v5153_v21  ;;  %1442 = vrot.lane.b32.xlu1 %v4605_v58, %s4330_s14  ;;  %v714_v58 = vsel %vm7089_vm14, %v709_v46, %v5007_v23  ;;  %vm7097_vm14 = vcmask 64512  }
  0xcd   : > { %1431 = vrot.lane.b32.xlu0 %v4735_v1, %s4329_s29  ;;  %v719_v1 = vsel %vm7095_vm15, %v714_v58, %v5050_v11  ;;  %v1381_v11 = vsel %vm4589_vm4, 0.0, %v4638_v10  ;;  %v495_v10 = vsel %vm4488_vm2, 0.0, %v4519_v29 }
  0xce   : > { %v5164_v51 = vpop.permute.xlu1 %955  ;;  %v724_v37 = vsel %vm7090_vm9, %v719_v1, %v5057_v4  ;;  %vm7091_vm9 = vcmask 72704  }
  0xcf   : > { %v5166_v6 = vpop.permute.xlu0 %945 }
  0xd0   : > { %1172 = vrot.lane.b32.xlu1 %v4886_v34, %s4328_s28  ;;  %v729_v34 = vsel %vm7094_vm5, %v724_v37, %v649_v47 }
  0xd1   : > { %1162 = vrot.lane.b32.xlu0 %v1131_v3, %s4325_s26  ;;  %v734_v23 = vsel %vm7093_vm3, %v729_v34, %v665_v12 }
  0xd2   : > { %v5175_v31 = vpop.permute.xlu1 %631  ;;  %v739_v46 = vsel %vm7096_vm0, %v734_v23, %v681_v61 }
  0xd3   : > { %v5177_v21 = vpop.permute.xlu0 %612 }
  0xd4   : > { %1218 = vrot.lane.b32.xlu1 %v4921_v44, %s4332_s17 }
  0xd5   : > { %1208 = vrot.lane.b32.xlu0 %v4902_v25, %s4331_s16 }
  0xd6   : > { %v697_v58 = vpop.permute.xlu1 %696 }
  0xd7   : > { %v683_v4 = vpop.permute.xlu0 %682  ;;  %v744_v47 = vsel %vm7097_vm14, %v739_v46, %v697_v58 }
  0xd8   : > { %1409 = vrot.lane.b32.xlu1 %v1381_v11, %s4325_s26  ;;  %4031 = vmatprep.mubr.msk.f32.mxu0 %vm7091_vm9, %v744_v47  ;;  %vm7199_vm9 = vcmask 15360  }
  0xd9   : > { %1395 = vrot.lane.b32.xlu0 %v1131_v3, %s4326_s27  ;;  %v710_v3 = vsel %vm7092_vm13, %v495_v10, %v5020_v48  ;;  %vm7200_vm13 = vcmask 31744  }
  0xda   : > { %v5195_v37 = vpop.permute.xlu1 %914 }
  0xdb   : > { %v5197_v25 = vpop.permute.xlu0 %904 }
  0xdc   : > { %1454 = vrot.lane.b32.xlu1 %v4921_v44, %s4331_s16  ;;  %v715_v44 = vsel %vm7199_vm9, %v710_v3, %v5031_v22  ;;  %v1382_v22 = vsel %vm4631_vm6, 0.0, %v4859_v40 }
  0xdd   : > { %1444 = vrot.lane.b32.xlu0 %v4805_v20, %s4330_s14  ;;  %v1136_v20 = vsel %vm4685_vm7, 0.0, %v4752_v62  ;;  %v720_v29 = vsel %vm7095_vm15, %v715_v44, %v5059_v39 }
  0xde   : > { %v968_v12 = vpop.permute.xlu1 %967  ;;  %v725_v48 = vsel %vm7200_vm13, %v720_v29, %v5076_v33  ;;  %vm7201_vm13 = vcmask 7168  }
  0xdf   : > { %v958_v61 = vpop.permute.xlu0 %957 }
  0xe0   : > { %1184 = vrot.lane.b32.xlu1 %v4953_v30, %s4329_s29 }
  0xe1   : > { %1174 = vrot.lane.b32.xlu0 %v4943_v42, %s4328_s28  ;;  %v730_v42 = vsel %vm7094_vm5, %v725_v48, %v5111_v38  ;;  %v995_v38 = vsel %vm7201_vm13, %v4481_v17, %v5018_v59  ;;  %vm7203_vm13 = vcmask 31744  }
  0xe2   : > { %v5219_v1 = vpop.permute.xlu1 %652  ;;  %v735_v62 = vsel %vm7093_vm3, %v730_v42, %v667_v35  ;;  %v999_v35 = vsel %vm7199_vm9, %v995_v38, %v5029_v56  ;;  %vm7202_vm3 = vcmask 72704   ;;  %vm7205_vm9 = vcmask 72704  }
  0xe3   : > { %v5221_v34 = vpop.permute.xlu0 %633  ;;  %v740_v39 = vsel %vm7096_vm0, %v735_v62, %v683_v4  ;;  %v1003_v46 = vsel %vm7095_vm15, %v999_v35, %v5064_v16 }
  0xe4   : > { %1234 = vrot.lane.b32.xlu1 %v1136_v20, %s4333_s25  ;;  %v1007_v17 = vsel %vm7203_vm13, %v1003_v46, %v5105_v60  ;;  %vm7207_vm13 = vcmask 1040384   ;;  %v7219_v46 = vrot.slane %v4859_v40, 1 }
  0xe5   : > { %1220 = vrot.lane.b32.xlu0 %v4966_v63, %s4332_s17 }
  0xe6   : > { %v5235_v23 = vpop.permute.xlu1 %916 }
  0xe7   : > { %v699_v11 = vpop.permute.xlu0 %698 }
  0xe8   : > { %v745_v33 = vsel %vm7097_vm14, %v740_v39, %v699_v11  ;;  %1421 = vrot.lane.b32.xlu1 %v4953_v30, %s4328_s28  ;;  %v1011_v30 = vsel %vm7094_vm5, %v1007_v17, %v5130_v8 }
  0xe9   : > { %1411 = vrot.lane.b32.xlu0 %v1382_v22, %s4325_s26  ;;  %4032 = vmatmul.mubr.msk.f32.vlgmr.msra.gmra.mrb[0].mxu0 %vm7202_vm3, %v745_v33  ;;  %vm7204_vm3 = vcmask 48128   ;;  %v7216_v33 = vld [vmem:[#allocation21_spill] sm:$0xff] }
  0xea   : > { %v970_v58 = vpop.permute.xlu1 %969  ;;  %4176 = vmatpush3.bf16.msk.msra.mxu0 %vm4841_vm10, %v4835_v2  ;;  %v1015_v59 = vsel %vm7204_vm3, %v1011_v30, %v5164_v51  ;;  %v7206_v51 = vrot.slane %v4755_v41, 7  ;;  %vm7208_vm3 = vcmask 7168  }
  0xeb   : > { %v5249_v4 = vpop.permute.xlu0 %926  ;;  %v1019_v56 = vsel %vm7096_vm0, %v1015_v59, %v968_v12  ;;  %v996_v3 = vsel %vm7208_vm3, %v4512_v28, %v5052_v18  ;;  %vm7211_vm3 = vcmask 48128   ;;  %v7212_v18 = vrot.slane %v4783_v36, 1  ;;  %v7221_v59 = vld [vmem:[#allocation26_spill] sm:$0xff] }
  0xec   : > { %1466 = vrot.lane.b32.xlu1 %v1136_v20, %s4332_s17  ;;  %v494_v12 = vsel %vm7207_vm13, %v7206_v51, 0.0  ;;  %vm7210_vm13 = vcmask 31744  }
  0xed   : > { %1456 = vrot.lane.b32.xlu0 %v4966_v63, %s4331_s16  ;;  %v1137_v63 = vsel %vm4744_vm8, 0.0, %v4933_v14  ;;  %v1192_v14 = vrot.slane %v494_v12, 1 }
  0xee   : > { %v5264_v16 = vpop.permute.xlu1 %1140 }
  0xef   : > { %v984_v47 = vpop.permute.xlu0 %983 }
  0xf0   : > { %v1023_v10 = vsel %vm7097_vm14, %v1019_v56, %v984_v47  ;;  %1198 = vrot.lane.b32.xlu1 %v4810_v55, %s4330_s14  ;;  %v7224_v47 = vld [vmem:[#allocation24_spill] sm:$0xff] }
  0xf1   : > { %1186 = vrot.lane.b32.xlu0 %v5005_v50, %s4329_s29  ;;  %4041 = vmatprep.mubr.msk.f32.mxu1 %vm7205_vm9, %v1023_v10  ;;  %vm7209_vm9 = vcmask 15360   ;;  %v1138_v10 = vsel %vm4926_vm11, 0.0, %v7224_v47 }
  0xf2   : > { %v669_v60 = vpop.permute.xlu1 %668  ;;  %v1000_v44 = vsel %vm7209_vm9, %v996_v3, %v5066_v52  ;;  %vm7213_vm9 = vcmask 1046528  }
  0xf3   : > { %v5275_v8 = vpop.permute.xlu0 %654  ;;  %v1004_v20 = vsel %vm7095_vm15, %v1000_v44, %v5088_v45  ;;  %v1193_v52 = vsel %vm7213_vm9, %v7212_v18, %v1192_v14  ;;  %v1385_v45 = vsel %vm4685_vm7, 0.0, %v4816_v26  ;;  %v7215_v26 = vld [vmem:[#allocation23_spill] sm:$0xff]  ;;  %v1133_v44 = vrot.slane %v494_v12, 2 }
  0xf4   : > { %1423 = vrot.lane.b32.xlu1 %v5005_v50, %s4328_s28  ;;  %v1008_v48 = vsel %vm7210_vm13, %v1004_v20, %v5132_v49  ;;  %vm7214_vm13 = vcmask 72704   ;;  %v1386_v22 = vsel %vm4744_vm8, 0.0, %v7215_v26  ;;  %v7230_v18 = vld [vmem:[#allocation15_spill] sm:$0xff] }
  0xf5   : > { %1236 = vrot.lane.b32.xlu0 %v1137_v63, %s4333_s25  ;;  %v1012_v28 = vsel %vm7094_vm5, %v1008_v48, %v5166_v6 }
  0xf6   : > { %v5290_v29 = vpop.permute.xlu1 %947  ;;  %v1016_v50 = vsel %vm7211_vm3, %v1012_v28, %v958_v61  ;;  %vm7222_vm3 = vcmask 7168   ;;  %v7227_v28 = vrot.slane %v4783_v36, 2 }
  0xf7   : > { %v5292_v41 = vpop.permute.xlu0 %928  ;;  %v1020_v49 = vsel %vm7096_vm0, %v1016_v50, %v970_v58 }
  0xf8   : > { %1468 = vrot.lane.b32.xlu1 %v1137_v63, %s4332_s17 }
  0xf9   : > { %1433 = vrot.lane.b32.xlu0 %v4810_v55, %s4329_s29 }
  0xfa   : > { %v5309_v42 = vpop.permute.xlu1 %1142 }
  0xfb   : > { %v986_v6 = vpop.permute.xlu0 %985 }
  0xfc   : > { %v1024_v62 = vsel %vm7097_vm14, %v1020_v49, %v986_v6  ;;  %1200 = vrot.lane.b32.xlu1 %v1193_v52, %s4330_s14  ;;  %v7234_v6 = vld [vmem:[#allocation25_spill] sm:$0xff] }
  0xfd   : > { %1482 = vrot.lane.b32.xlu0 %v1385_v45, %s4333_s25  ;;  %4042 = vmatmul.mubr.msk.f32.vlgmr.msra.gmra.mrb[0].mxu1 %vm7214_vm13, %v1024_v62  ;;  %vm7225_vm13 = vcmask 31744   ;;  %v7233_v45 = vld [vmem:[#allocation17_spill] sm:$0xff]  ;;  %v1387_v62 = vsel %vm4926_vm11, 0.0, %v7234_v6  ;;  %vm7317_vm11 = vcmask 48128  }
  0xfe   : > { %v5315_v55 = vpop.permute.xlu1 %1389  ;;  %4182 = vmatpush3.bf16.msk.msra.mxu1 %vm4841_vm10, %v4835_v2  ;;  %v7217_v2 = vld [vmem:[#allocation11_spill] sm:$0xff]  ;;  %vm7220_vm10 = vmmov %vm7213_vm9  ;;  %vm7223_vm9 = vcmask 15360  }
  0xff   : > { %v5317_v61 = vpop.permute.xlu0 %1156  ;;  %v496_v13 = vsel %vm4589_vm4, 0.0, %v7217_v2 }
 0x100   : > { %1435 = vrot.lane.b32.xlu1 %v1193_v52, %s4329_s29  ;;  %v711_v56 = vsel %vm7222_vm3, %v496_v13, %v7221_v59  ;;  %vm7228_vm3 = vcmask 1045504   ;;  %v7231_v52 = vrot.slane %v4859_v40, 2 }
 0x101   : > { %1210 = vrot.lane.b32.xlu0 %v5045_v24, %s4331_s16  ;;  %v7218_v24 = vld [vmem:[#allocation10_spill] sm:$0xff]  ;;  %v1134_v12 = vsel %vm7228_vm3, %v7227_v28, %v1133_v44 }
 0x102   : > { %v685_v39 = vpop.permute.xlu1 %684  ;;  %v1441_v58 = vsel %vm7220_vm10, %v7219_v46, %v7218_v24  ;;  %vm7226_vm10 = vcmask 48128  }
 0x103   : > { %v671_v11 = vpop.permute.xlu0 %670 }
 0x104   : > { %1484 = vrot.lane.b32.xlu1 %v1386_v22, %s4333_s25  ;;  %v7235_v22 = vld [vmem:[#allocation27_spill] sm:$0xff] }
 0x105   : > { %1446 = vrot.lane.b32.xlu0 %v7216_v33, %s4330_s14  ;;  %v7237_v33 = vld [vmem:[#allocation29_spill] sm:$0xff] }
 0x106   : > { %v960_v38 = vpop.permute.xlu1 %959 }
 0x107   : > { %v5331_v35 = vpop.permute.xlu0 %949 }
 0x108   : > { %1222 = vrot.lane.b32.xlu1 %v5101_v7, %s4332_s17 }
 0x109   : > { %1212 = vrot.lane.b32.xlu0 %v5086_v5, %s4331_s16  ;;  %v716_v5 = vsel %vm7223_vm9, %v711_v56, %v5113_v32  ;;  %vm7229_vm9 = vcmask 72704   ;;  %v7240_v56 = vld [vmem:[#allocation28_spill] sm:$0xff] }
 0x10a   : > { %v5344_v17 = vpop.permute.xlu1 %1168  ;;  %v721_v63 = vsel %vm7095_vm15, %v716_v5, %v5141_v43  ;;  %v7241_v5 = vld [vmem:[#allocation13_spill] sm:$0xff] }
 0x10b   : > { %v5346_v30 = vpop.permute.xlu0 %1158 }
 0x10c   : > { %1458 = vrot.lane.b32.xlu1 %v5101_v7, %s4331_s16  ;;  %v726_v7 = vsel %vm7225_vm13, %v721_v63, %v5175_v31  ;;  %vm7232_vm13 = vmmov %vm7228_vm3  ;;  %vm7238_vm3 = vcmask 15360   ;;  %v7243_v63 = vld [vmem:[#allocation30_spill] sm:$0xff] }
 0x10d   : > { %1448 = vrot.lane.b32.xlu0 %v1441_v58, %s4330_s14  ;;  %v731_v14 = vsel %vm7094_vm5, %v726_v7, %v5219_v1  ;;  %v1139_v1 = vsel %vm4979_vm12, 0.0, %v1134_v12  ;;  %v1383_v36 = vsel %vm7232_vm13, %v7231_v52, %v7230_v18  ;;  %v7250_v52 = vld [vmem:[#allocation14_spill] sm:$0xff]  ;;  %s4335_s14 = smov 10  }
 0x10e   : > { %v5360_v51 = vpop.permute.xlu1 %1405  ;;  %v736_v32 = vsel %vm7226_vm10, %v731_v14, %v669_v60  ;;  %v1388_v49 = vsel %vm4979_vm12, 0.0, %v1383_v36  ;;  %vm7236_vm10 = vcmask 7168   ;;  %vm7313_vm12 = vcmask 64512  }
 0x10f   : > { %v5362_v3 = vpop.permute.xlu0 %1391  ;;  %v741_v43 = vsel %vm7096_vm0, %v736_v32, %v685_v39  ;;  %vm7242_vm13 = vmmov %vm7236_vm10 }
 0x110   : > { %1238 = vrot.lane.b32.xlu1 %v1138_v10, %s4333_s25  ;;  %v997_v47 = vsel %vm7242_vm13, %v7241_v5, %v7240_v56  ;;  %vm7246_vm13 = vcmask 72704  }
 0x111   : > { %1224 = vrot.lane.b32.xlu0 %v5128_v27, %s4332_s17 }
 0x112   : > { %v701_v20 = vpop.permute.xlu1 %700 }
 0x113   : > { %v687_v48 = vpop.permute.xlu0 %686  ;;  %v746_v31 = vsel %vm7097_vm14, %v741_v43, %v701_v20 }
 0x114   : > { %1470 = vrot.lane.b32.xlu1 %v1138_v10, %s4332_s17  ;;  %4034 = vmatprep.mubr.msk.f32.mxu0 %vm7229_vm9, %v746_v31  ;;  %vm7239_vm9 = vcmask 31744  }
 0x115   : > { %1460 = vrot.lane.b32.xlu0 %v5128_v27, %s4331_s16  ;;  %v497_v27 = vsel %vm4631_vm6, 0.0, %v7233_v45 }
 0x116   : > { %v972_v60 = vpop.permute.xlu1 %971  ;;  %v712_v39 = vsel %vm7236_vm10, %v497_v27, %v7235_v22  ;;  %vm7244_vm10 = vmmov %vm7238_vm3 }
 0x117   : > { %v962_v50 = vpop.permute.xlu0 %961  ;;  %v717_v2 = vsel %vm7238_vm3, %v712_v39, %v7237_v33  ;;  %v1001_v44 = vsel %vm7244_vm10, %v997_v47, %v7243_v63  ;;  %vm7245_vm3 = vcmask 48128  }
 0x118   : > { %1472 = vrot.lane.b32.xlu1 %v1139_v1, %s4332_s17  ;;  %v722_v13 = vsel %vm7095_vm15, %v717_v2, %v5177_v21  ;;  %v1005_v21 = vsel %vm7095_vm15, %v1001_v44, %v5195_v37  ;;  %vm7247_vm10 = vmmov %vm7245_vm3  ;;  %s4336_s17 = smov 12  }
 0x119   : > { %1240 = vrot.lane.b32.xlu0 %v1139_v1, %s4333_s25  ;;  %v727_v59 = vsel %vm7239_vm9, %v722_v13, %v5221_v34  ;;  %v1009_v34 = vsel %vm7239_vm9, %v1005_v21, %v5249_v4  ;;  %v7249_v1 = vld [vmem:[#allocation31_spill] sm:$0xff]  ;;  %vm7251_vm9 = vcmask 7168  }
 0x11a   : > { %v5397_v26 = vpop.permute.xlu1 %1180  ;;  %v732_v10 = vsel %vm7094_vm5, %v727_v59, %v5275_v8  ;;  %v1013_v8 = vsel %vm7094_vm5, %v1009_v34, %v5290_v29  ;;  %v998_v36 = vsel %vm7251_vm9, %v7250_v52, %v7249_v1  ;;  %vm7252_vm5 = vcmask 15360  }
 0x11b   : > { %v5399_v40 = vpop.permute.xlu0 %1170  ;;  %v737_v7 = vsel %vm7245_vm3, %v732_v10, %v671_v11  ;;  %v1017_v28 = vsel %vm7247_vm10, %v1013_v8, %v960_v38  ;;  %vm7248_vm3 = vmmov %vm7246_vm13  ;;  %v1002_v29 = vsel %vm7252_vm5, %v998_v36, %v5197_v25  ;;  %vm7254_vm10 = vcmask 39936  }
 0x11c   : > { %1488 = vrot.lane.b32.xlu1 %v1388_v49, %s4333_s25  ;;  %v742_v14 = vsel %vm7096_vm0, %v737_v7, %v687_v48  ;;  %v1021_v11 = vsel %vm7096_vm0, %v1017_v28, %v972_v60  ;;  %v1006_v38 = vsel %vm7095_vm15, %v1002_v29, %v5235_v23  ;;  %vm7256_vm5 = vcmask 72704   ;;  %v7257_v7 = vld [vmem:[#allocation6_spill] sm:$0xff] }
 0x11d   : > { %1486 = vrot.lane.b32.xlu0 %v1387_v62, %s4333_s25  ;;  %v1246_v21 = vsel %vm7251_vm9, %v7257_v7, %v5264_v16  ;;  %vm7262_vm9 = vcmask 72704  }
 0x11e   : > { %v5409_v46 = vpop.permute.xlu1 %1417 }
 0x11f   : > { %v5411_v58 = vpop.permute.xlu0 %1407 }
 0x122   : > { %v974_v32 = vpop.permute.xlu1 %973 }
 0x123   : > { %v703_v43 = vpop.permute.xlu0 %702 }
 0x124   : > { %v747_v20 = vsel %vm7097_vm14, %v742_v14, %v703_v43 }
 0x125   : > { %4035 = vmatmul.mubr.msk.f32.gmra.mrb[2].mxu0 %vm7246_vm13, %v747_v20  ;;  %vm7253_vm13 = vcmask 31744  }
 0x126   : > { %v5434_v12 = vpop.permute.xlu1 %1144  ;;  %v1010_v27 = vsel %vm7253_vm13, %v1006_v38, %v5292_v41  ;;  %vm7258_vm13 = vcmask 15360  }
 0x127   : > { %v988_v37 = vpop.permute.xlu0 %987  ;;  %v1014_v49 = vsel %vm7254_vm10, %v1010_v27, %v5331_v35  ;;  %v1250_v14 = vsel %vm7258_vm13, %v1246_v21, %v5317_v61  ;;  %vm7259_vm10 = vcmask 31744   ;;  %vm7264_vm13 = vcmask 7168  }
 0x128   : > { %v1025_v48 = vsel %vm7097_vm14, %v1021_v11, %v988_v37 }
 0x129   : > { %4044 = vmatprep.mubr.msk.f32.mxu1 %vm7248_vm3, %v1025_v48  ;;  %vm7255_vm3 = vcmask 48128  }
 0x12a   : > { %v1195_v31 = vpop.permute.xlu1 %1194  ;;  %v1018_v6 = vsel %vm7255_vm3, %v1014_v49, %v962_v50  ;;  %vm7260_vm3 = vcmask 39936  }
 0x12b   : > { %v1183_v4 = vpop.permute.xlu0 %1182  ;;  %v1022_v62 = vsel %vm7096_vm0, %v1018_v6, %v974_v32  ;;  %v1254_v32 = vsel %vm7095_vm15, %v1250_v14, %v5344_v17 }
 0x12c   : > { %v1258_v20 = vsel %vm7259_vm10, %v1254_v32, %v5397_v26  ;;  %v7263_v26 = vld [vmem:[#allocation9_spill] sm:$0xff]  ;;  %vm7265_vm10 = vcmask 15360  }
 0x12d   : > { %v1262_v8 = vsel %vm7260_vm3, %v1258_v20, %v1195_v31  ;;  %v1247_v31 = vsel %vm7264_vm13, %v7263_v26, %v5309_v42  ;;  %vm7266_vm3 = vcmask 31744  }
 0x12e   : > { %v1430_v60 = vpop.permute.xlu1 %1429  ;;  %v1251_v36 = vsel %vm7265_vm10, %v1247_v31, %v5346_v30  ;;  %vm7270_vm10 = vcmask 72704  }
 0x12f   : > { %v5445_v45 = vpop.permute.xlu0 %1419  ;;  %v1255_v29 = vsel %vm7095_vm15, %v1251_v36, %v5399_v40  ;;  %vm7271_vm15 = vcmask 15360  }
 0x130   : > { %v1259_v49 = vsel %vm7266_vm3, %v1255_v29, %v1183_v4  ;;  %vm7272_vm3 = vcmask 23552  }
 0x132   : > { %v5453_v22 = vpop.permute.xlu1 %1146 }
 0x133   : > { %v990_v39 = vpop.permute.xlu0 %989 }
 0x134   : > { %v1026_v25 = vsel %vm7097_vm14, %v1022_v62, %v990_v39 }
 0x135   : > { %4045 = vmatmul.mubr.msk.f32.gmra.mrb[2].mxu1 %vm7256_vm5, %v1026_v25  ;;  %vm7261_vm5 = vcmask 48128  }
 0x136   : > { %v1197_v23 = vpop.permute.xlu1 %1196 }
 0x137   : > { %v5457_v33 = vpop.permute.xlu0 %1160 }
 0x13a   : > { %v5459_v2 = vpop.permute.xlu1 %1393 }
 0x13b   : > { %v1207_v41 = vpop.permute.xlu0 %1206 }
 0x13c   : > { %v1266_v28 = vsel %vm7261_vm5, %v1262_v8, %v1207_v41  ;;  %vm7267_vm5 = vcmask 39936  }
 0x13d   : > { %v1263_v6 = vsel %vm7267_vm5, %v1259_v49, %v1197_v23  ;;  %vm7273_vm5 = vcmask 31744  }
 0x13e   : > { %v1443_v13 = vpop.permute.xlu1 %1442 }
 0x13f   : > { %v1432_v59 = vpop.permute.xlu0 %1431 }
 0x142   : > { %v5461_v35 = vpop.permute.xlu1 %1172 }
 0x143   : > { %v5463_v50 = vpop.permute.xlu0 %1162 }
 0x146   : > { %v1219_v56 = vpop.permute.xlu1 %1218 }
 0x147   : > { %v1209_v5 = vpop.permute.xlu0 %1208  ;;  %v1270_v11 = vsel %vm7096_vm0, %v1266_v28, %v1219_v56  ;;  %v7269_v56 = vld [vmem:[#allocation8_spill] sm:$0xff] }
 0x148   : > { %v1494_v30 = vsel %vm7264_vm13, %v7269_v56, %v5315_v55  ;;  %vm7277_vm13 = vcmask 64512   ;;  %v7278_v28 = vld [vmem:[#allocation12_spill] sm:$0xff]  ;;  %v7296_v56 = vld [vmem:[#allocation18_spill] sm:$0xff] }
 0x149   : > { %v1498_v40 = vsel %vm7271_vm15, %v1494_v30, %v5360_v51  ;;  %vm7279_vm15 = vcmask 7168  }
 0x14a   : > { %v5465_v47 = vpop.permute.xlu1 %1409  ;;  %v1502_v4 = vsel %vm7272_vm3, %v1498_v40, %v5409_v46  ;;  %v1495_v51 = vsel %vm7279_vm15, %v7278_v28, %v5362_v3  ;;  %vm7280_vm3 = vcmask 15360   ;;  %vm7286_vm15 = vcmask 64512  }
 0x14b   : > { %v5467_v10 = vpop.permute.xlu0 %1395  ;;  %v1506_v7 = vsel %vm7273_vm5, %v1502_v4, %v1430_v60  ;;  %v1499_v46 = vsel %vm7280_vm3, %v1495_v51, %v5411_v58  ;;  %vm7281_vm5 = vcmask 23552   ;;  %vm7288_vm3 = vcmask 7168   ;;  %v7301_v4 = vld [vmem:[#allocation19_spill] sm:$0xff] }
 0x14c   : > { %v1503_v60 = vsel %vm7281_vm5, %v1499_v46, %v5445_v45  ;;  %v7287_v45 = vld [vmem:[#allocation16_spill] sm:$0xff]  ;;  %vm7289_vm5 = vcmask 15360  }
 0x14d   : > { %v1248_v36 = vsel %vm7288_vm3, %v7287_v45, %v5434_v12 }
 0x14e   : > { %v1455_v63 = vpop.permute.xlu1 %1454 }
 0x14f   : > { %v1445_v44 = vpop.permute.xlu0 %1444 }
 0x152   : > { %v1185_v43 = vpop.permute.xlu1 %1184 }
 0x153   : > { %v5476_v34 = vpop.permute.xlu0 %1174 }
 0x156   : > { %v1235_v37 = vpop.permute.xlu1 %1234 }
 0x157   : > { %v1221_v16 = vpop.permute.xlu0 %1220  ;;  %v1274_v48 = vsel %vm7097_vm14, %v1270_v11, %v1235_v37 }
 0x158   : > { %4051 = vmatprep.mubr.msk.f32.mxu0 %vm7262_vm9, %v1274_v48  ;;  %vm7268_vm9 = vcmask 48128  }
 0x159   : > { %v1267_v62 = vsel %vm7268_vm9, %v1263_v6, %v1209_v5  ;;  %vm7274_vm9 = vcmask 39936  }
 0x15a   : > { %v5485_v61 = vpop.permute.xlu1 %1421  ;;  %v1271_v39 = vsel %vm7096_vm0, %v1267_v62, %v1221_v16  ;;  %v1510_v21 = vsel %vm7274_vm9, %v1506_v7, %v1443_v13  ;;  %vm7275_vm0 = vcmask 48128   ;;  %v7303_v7 = vld [vmem:[#allocation20_spill] sm:$0xff] }
 0x15b   : > { %v5487_v17 = vpop.permute.xlu0 %1411  ;;  %v1514_v14 = vsel %vm7275_vm0, %v1510_v21, %v1455_v63  ;;  %vm7282_vm0 = vcmask 31744  }
 0x15c   : > { %v1507_v11 = vsel %vm7282_vm0, %v1503_v60, %v1432_v59  ;;  %v1252_v59 = vsel %vm7289_vm5, %v1248_v36, %v5457_v33  ;;  %vm7290_vm0 = vcmask 23552   ;;  %v1249_v33 = vsel %vm7288_vm3, %v7296_v56, %v5453_v22 }
 0x15d   : > { %vm7297_vm5 = vcmask 72704  }
 0x15e   : > { %v1467_v1 = vpop.permute.xlu1 %1466 }
 0x15f   : > { %v1457_v52 = vpop.permute.xlu0 %1456 }
 0x162   : > { %v1199_v38 = vpop.permute.xlu1 %1198 }
 0x163   : > { %v1187_v27 = vpop.permute.xlu0 %1186 }
 0x166   : > { %v1424_v25 = vpop.permute.xlu1 %1423 }
 0x167   : > { %v1237_v41 = vpop.permute.xlu0 %1236 }
 0x168   : > { %v1275_v42 = vsel %vm7097_vm14, %v1271_v39, %v1237_v41  ;;  %vm7276_vm14 = vcmask 56320  }
 0x169   : > { %4052 = vmatmul.mubr.msk.f32.vlgmr.msra.gmra.mrb[4].mxu0 %vm7270_vm10, %v1275_v42  ;;  %v1518_v32 = vsel %vm7276_vm14, %v1514_v14, %v1467_v1  ;;  %vm7283_vm14 = vmmov %vm7274_vm9  ;;  %vm7284_vm9 = vcmask 48128  }
 0x16a   : > { %v1469_v23 = vpop.permute.xlu1 %1468  ;;  %v1511_v37 = vsel %vm7283_vm14, %v1507_v11, %v1445_v44  ;;  %v1256_v44 = vsel %vm7290_vm0, %v1252_v59, %v5461_v35  ;;  %vm7291_vm14 = vcmask 31744   ;;  %vm7298_vm0 = vcmask 15360   ;;  %v5582_v11 = vld [vmem:[%s7040_s2] ss:$0 sm:$0xff] }
 0x16b   : > { %v1434_v5 = vpop.permute.xlu0 %1433  ;;  %v1515_v16 = vsel %vm7284_vm9, %v1511_v37, %v1457_v52  ;;  %v1260_v49 = vsel %vm7291_vm14, %v1256_v44, %v1185_v43  ;;  %vm7292_vm9 = vcmask 39936   ;;  %v1253_v35 = vsel %vm7298_vm0, %v1249_v33, %v5463_v50 }
 0x16c   : > { %v1264_v6 = vsel %vm7292_vm9, %v1260_v49, %v1199_v38  ;;  %vm7299_vm14 = vcmask 23552   ;;  %vm7300_vm9 = vcmask 31744  }
 0x16d   : > { %v1257_v43 = vsel %vm7299_vm14, %v1253_v35, %v5476_v34 }
 0x16e   : > { %v1201_v20 = vpop.permute.xlu1 %1200  ;;  %v1261_v40 = vsel %vm7300_vm9, %v1257_v43, %v1187_v27  ;;  %vm7309_vm9 = vmmov %vm7299_vm14 }
 0x16f   : > { %v1483_v55 = vpop.permute.xlu0 %1482 }
 0x170   : > { %v1522_v8 = vsel %vm7277_vm13, %v1518_v32, %v1483_v55  ;;  %vm7285_vm13 = vcmask 56320  }
 0x171   : > { %4061 = vmatprep.mubr.msk.f32.mxu1 %vm7270_vm10, %v1522_v8  ;;  %v1519_v48 = vsel %vm7285_vm13, %v1515_v16, %v1469_v23  ;;  %vm7293_vm13 = vcmask 48128  }
 0x172   : > { %v1436_v13 = vpop.permute.xlu1 %1435 }
 0x173   : > { %v1211_v63 = vpop.permute.xlu0 %1210 }
 0x174   : > { %v1268_v62 = vsel %vm7293_vm13, %v1264_v6, %v1211_v63  ;;  %vm7302_vm13 = vmmov %vm7288_vm3 }
 0x175   : > { %v1496_v23 = vsel %vm7302_vm13, %v7301_v4, %v5459_v2  ;;  %vm7310_vm13 = vcmask 56320  }
 0x176   : > { %v1485_v1 = vpop.permute.xlu1 %1484 }
 0x177   : > { %v1447_v3 = vpop.permute.xlu0 %1446  ;;  %v1523_v26 = vsel %vm7286_vm15, %v1519_v48, %v1485_v1  ;;  %vm7294_vm15 = vcmask 56320  }
 0x178   : > { %4062 = vmatmul.mubr.msk.f32.vlgmr.msra.gmra.mrb[4].mxu1 %vm7270_vm10, %v1523_v26  ;;  %vm7295_vm10 = vcmask 64512  }
 0x17a   : > { %v1223_v58 = vpop.permute.xlu1 %1222 }
 0x17b   : > { %v1213_v31 = vpop.permute.xlu0 %1212  ;;  %v1272_v39 = vsel %vm7294_vm15, %v1268_v62, %v1223_v58  ;;  %vm7304_vm15 = vmmov %vm7288_vm3 }
 0x17c   : > { %v1497_v22 = vsel %vm7304_vm15, %v7303_v7, %v5467_v10  ;;  %vm7306_vm3 = vmmov %vm7298_vm0  ;;  %vm7311_vm15 = vcmask 31744  }
 0x17d   : > { %v1500_v50 = vsel %vm7306_vm3, %v1496_v23, %v5465_v47  ;;  %vm7314_vm3 = vcmask 39936  }
 0x17e   : > { %v1459_v52 = vpop.permute.xlu1 %1458  ;;  %v1504_v27 = vsel %vm7299_vm14, %v1500_v50, %v5485_v61  ;;  %vm7318_vm14 = vmmov %vm7317_vm11 }
 0x17f   : > { %v1449_v29 = vpop.permute.xlu0 %1448  ;;  %v1508_v10 = vsel %vm7311_vm15, %v1504_v27, %v1434_v5 }
 0x180   : > { %v1512_v28 = vsel %vm7314_vm3, %v1508_v10, %v1447_v3 }
 0x181   : > { %v1516_v61 = vsel %vm7317_vm11, %v1512_v28, %v1459_v52  ;;  %vm7325_vm11 = vcmask 1040384  }
 0x182   : > { %v1239_v41 = vpop.permute.xlu1 %1238 }
 0x183   : > { %v1225_v42 = vpop.permute.xlu0 %1224  ;;  %v1276_v12 = vsel %vm7295_vm10, %v1272_v39, %v1239_v41  ;;  %vm7305_vm10 = vcmask 39936  }
 0x184   : > { %4054 = vmatprep.mubr.msk.f32.mxu0 %vm7297_vm5, %v1276_v12  ;;  %v1265_v21 = vsel %vm7305_vm10, %v1261_v40, %v1201_v20  ;;  %vm7307_vm5 = vmmov %vm7298_vm0  ;;  %vm7308_vm0 = vcmask 48128  }
 0x185   : > { %v1501_v34 = vsel %vm7307_vm5, %v1497_v22, %v5487_v17  ;;  %v1269_v14 = vsel %vm7308_vm0, %v1265_v21, %v1213_v31  ;;  %vm7312_vm10 = vmmov %vm7311_vm15  ;;  %vm7316_vm0 = vcmask 72704  }
 0x186   : > { %v1471_v38 = vpop.permute.xlu1 %1470  ;;  %v1505_v32 = vsel %vm7309_vm9, %v1501_v34, %v1424_v25  ;;  %v1273_v2 = vsel %vm7310_vm13, %v1269_v14, %v1225_v42  ;;  %vm7315_vm5 = vmmov %vm7314_vm3 }
 0x187   : > { %v1461_v30 = vpop.permute.xlu0 %1460  ;;  %v1509_v20 = vsel %vm7312_vm10, %v1505_v32, %v1436_v13  ;;  %vm7319_vm9 = vmmov %vm7310_vm13 }
 0x188   : > { %v1513_v17 = vsel %vm7315_vm5, %v1509_v20, %v1449_v29  ;;  %v1520_v51 = vsel %vm7319_vm9, %v1516_v61, %v1471_v38  ;;  %vm7320_vm13 = vmmov %vm7319_vm9 }
 0x189   : > { %v1517_v25 = vsel %vm7318_vm14, %v1513_v17, %v1461_v30  ;;  %vm7321_vm15 = vmmov %vm7313_vm12  ;;  %vm7329_vm14 = vcmask 1045504  }
 0x18a   : > { %v1473_v55 = vpop.permute.xlu1 %1472  ;;  %vm7322_vm10 = vmmov %vm7313_vm12 }
 0x18b   : > { %v1241_v8 = vpop.permute.xlu0 %1240  ;;  %v1521_v46 = vsel %vm7320_vm13, %v1517_v25, %v1473_v55  ;;  %vm7324_vm3 = vmmov %vm7316_vm0 }
 0x18c   : > { %v1277_v47 = vsel %vm7313_vm12, %v1273_v2, %v1241_v8  ;;  %vm7323_vm12 = vmmov %vm7316_vm0 }
 0x18d   : > { %4055 = vmatmul.mubr.msk.f32.gmra.mrb[6].mxu0 %vm7316_vm0, %v1277_v47  ;;  %vm7326_vm5 = vmmov %vm7325_vm11  ;;  %vm7328_vm0 = vcmask 1046528  }
 0x18e   : > { %v1489_v60 = vpop.permute.xlu1 %1488  ;;  %vm7330_vm9 = vmmov %vm7326_vm5 }
 0x18f   : > { %v1487_v5 = vpop.permute.xlu0 %1486  ;;  %v1525_v13 = vsel %vm7321_vm15, %v1521_v46, %v1489_v60  ;;  %vm7331_vm13 = vmmov %vm7326_vm5 }
 0x190   : > { %v1524_v63 = vsel %vm7322_vm10, %v1520_v51, %v1487_v5  ;;  %vm7334_vm15 = vmmov %vm7328_vm0 }
 0x191   : > { %4064 = vmatprep.mubr.msk.f32.mxu1 %vm7323_vm12, %v1524_v63  ;;  %vm7335_vm10 = vmmov %vm7329_vm14 }
 0x192   : > { %4065 = vmatmul.mubr.msk.f32.gmra.mrb[6].mxu1 %vm7324_vm3, %v1525_v13  ;;  %vm7336_vm12 = vmmov %vm7326_vm5 }
 0x193   : > { %vm7337_vm3 = vmmov %vm7326_vm5 }
 0x1bc   : > { %v4033_v37 = vpop.f32.mrb[0].mxu0 }
 0x1bd   : > { %v842_v16 = vadd.f32 %v4033_v37, %v5582_v11  ;;  %v836_v48 = vpop.f32.mrb[1].mxu0 }
 0x1be   : > { %v837_v1 = vadd.f32 %v5582_v11, %v836_v48 }
 0x1bf   : > { %v856_v3 = vmax.f32 %v842_v16, 0.0 }
 0x1c0   : > { %v855_v26 = vmax.f32 %v837_v1, 0.0 }
 0x1c1   : > { %v1632_v58 = vrot.slane %v856_v3, 7 }
 0x1c2   : > { %v1631_v31 = vrot.slane %v855_v26, 7 }
 0x1c4   : > { %v5587_v45 = vsel %vm7325_vm11, %v1631_v31, %v1632_v58  ;;  %v1643_v36 = vsel %vm7326_vm5, 0.0, %v1631_v31  ;;  %vm7338_vm11 = vmmov %vm7337_vm3 }
 0x1c5   : > { %v1745_v59 = vrot.slane %v1643_v36, 2  ;;  %v1833_v44 = vrot.slane %v1643_v36, 1  ;;  %v5592_v29 = vsel %vm4457_vm1, 0.0, %v1643_v36  ;;  %v1834_v49 = vrot.slane %v5587_v45, 1  ;;  %vm7340_vm5 = vmmov %vm7328_vm0 }
 0x1c6   : > { %1785 = vrot.lane.b32.xlu0 %v5592_v29, %s4325_s26  ;;  %v1746_v6 = vrot.slane %v5587_v45, 2  ;;  %v5605_v41 = vsel %vm4488_vm2, 0.0, %v5587_v45 }
 0x1c7   : > { %v1835_v62 = vsel %vm7328_vm0, %v1833_v44, %v1834_v49 }
 0x1c8   : > { %v1747_v39 = vsel %vm7329_vm14, %v1745_v59, %v1746_v6  ;;  %vm7341_vm14 = vmmov %vm7328_vm0 }
 0x1c9   : > { %v1758_v32 = vsel %vm4685_vm7, 0.0, %v1747_v39 }
 0x1ca   : > { %1787 = vrot.lane.b32.xlu0 %v5605_v41, %s4325_s26 }
 0x1d0   : > { %v4043_v42 = vpop.f32.mrb[0].mxu1 }
 0x1d1   : > { %v1111_v12 = vadd.f32 %v4043_v42, %v5582_v11  ;;  %v1105_v56 = vpop.f32.mrb[1].mxu1 }
 0x1d2   : > { %v1106_v33 = vadd.f32 %v5582_v11, %v1105_v56 }
 0x1d3   : > { %v1125_v35 = vmax.f32 %v1111_v12, 0.0 }
 0x1d4   : > { %v1124_v43 = vmax.f32 %v1106_v33, 0.0 }
 0x1d5   : > { %v5611_v38 = vrot.slane %v1125_v35, 7 }
 0x1d6   : > { %v1649_v30 = vrot.slane %v1124_v43, 7 }
 0x1d8   : > { %v1661_v40 = vsel %vm7330_vm9, 0.0, %v1649_v30  ;;  %v5616_v4 = vsel %vm7331_vm13, %v1649_v30, %v5611_v38  ;;  %vm7343_vm9 = vmmov %vm7335_vm10 }
 0x1d9   : > { %v1764_v23 = vrot.slane %v1661_v40, 2  ;;  %v1854_v7 = vrot.slane %v1661_v40, 1  ;;  %v5620_v22 = vsel %vm4457_vm1, 0.0, %v1661_v40  ;;  %v5625_v21 = vsel %vm4488_vm2, 0.0, %v5616_v4  ;;  %vm7345_vm13 = vmmov %vm7343_vm9 }
 0x1da   : > { %7332 = vst [vmem:[#allocation23_spill] sm:$0xff] %v5620_v22  ;;  %7333 = vst [vmem:[#allocation21_spill] sm:$0xff] %v5625_v21  ;;  %2094 = vrot.lane.b32.xlu1 %v5620_v22, %s4325_s26  ;;  %v1765_v50 = vrot.slane %v5616_v4, 2  ;;  %2096 = vrot.lane.b32.xlu0 %v5625_v21, %s4325_s26  ;;  %v1855_v34 = vrot.slane %v5616_v4, 1 }
 0x1dc   : > { %v5636_v14 = vsel %vm7334_vm15, %v1854_v7, %v1855_v34  ;;  %v1766_v27 = vsel %vm7335_vm10, %v1764_v23, %v1765_v50  ;;  %vm7347_vm15 = vmmov %vm7343_vm9 }
 0x1dd   : > { %v5657_v2 = vsel %vm4685_vm7, 0.0, %v1766_v27  ;;  %vm7350_vm10 = vmmov %vm7337_vm3 }
 0x1de   : > { %1801 = vrot.lane.b32.xlu1 %v5620_v22, %s4329_s29  ;;  %1803 = vrot.lane.b32.xlu0 %v5625_v21, %s4329_s29 }
 0x1e2   : > { %2122 = vrot.lane.b32.xlu1 %v1835_v62, %s4331_s16  ;;  %1863 = vrot.lane.b32.xlu0 %v5636_v14, %s4335_s14 }
 0x1e6   : > { %1842 = vrot.lane.b32.xlu1 %v1835_v62, %s4333_s25 }
 0x1ea   : > { %2134 = vrot.lane.b32.xlu1 %v5636_v14, %s4333_s25 }
 0x1ee   : > { %2167 = vrot.lane.b32.xlu1 %v1758_v32, %s4336_s17 }
 0x1f2   : > { %1895 = vrot.lane.b32.xlu1 %v1758_v32, %s4337_s21 }
 0x1f6   : > { %2179 = vrot.lane.b32.xlu1 %v5657_v2, %s4337_s21 }
 0x1f8   : > { %v4036_v55 = vpop.f32.mrb[2].mxu0 }
 0x1f9   : > { %v852_v8 = vadd.f32 %v4036_v55, %v5582_v11  ;;  %v846_v10 = vpop.f32.mrb[3].mxu0 }
 0x1fa   : > { %v847_v20 = vadd.f32 %v5582_v11, %v846_v10  ;;  %1911 = vrot.lane.b32.xlu1 %v5657_v2, %s4338_s22 }
 0x1fb   : > { %v858_v47 = vmax.f32 %v852_v8, 0.0 }
 0x1fc   : > { %v857_v28 = vmax.f32 %v847_v20, 0.0 }
 0x1fd   : > { %v1636_v17 = vrot.slane %v858_v47, 7 }
 0x1fe   : > { %v1634_v61 = vrot.slane %v857_v28, 7 }
 0x1ff   : > { %v5666_v25 = vsel %vm7336_vm12, %v1636_v17, 0.0  ;;  %vm7351_vm12 = vmmov %vm7337_vm3 }
 0x200   : > { %v7102_v51 = vrot.slane %v5666_v25, 2  ;;  %v7103_v46 = vrot.slane %v5666_v25, 1  ;;  %v5671_v60 = vsel %vm7337_vm3, %v1632_v58, %v1634_v61  ;;  %v5674_v5 = vsel %vm7338_vm11, %v1634_v61, %v1636_v17  ;;  %vm7354_vm11 = vmmov %vm7343_vm9 }
 0x201   : > { %v5679_v13 = vsel %vm4589_vm4, 0.0, %v5671_v60  ;;  %v1836_v63 = vrot.slane %v5671_v60, 1  ;;  %v1838_v37 = vrot.slane %v5674_v5, 1  ;;  %v1748_v16 = vrot.slane %v5671_v60, 2 }
 0x202   : > { %7339 = vst [vmem:[#allocation11_spill] sm:$0xff] %v5679_v13  ;;  %1789 = vrot.lane.b32.xlu0 %v5679_v13, %s4325_s26  ;;  %v1750_v48 = vrot.slane %v5674_v5, 2  ;;  %v5714_v59 = vsel %vm4631_vm6, 0.0, %v5674_v5 }
 0x203   : > { %v5688_v1 = vsel %vm7340_vm5, %v1834_v49, %v1836_v63  ;;  %v5691_v3 = vsel %vm7328_vm0, %v1836_v63, %v1838_v37  ;;  %v5696_v26 = vsel %vm7341_vm14, %v1838_v37, %v7103_v46  ;;  %v5701_v58 = vsel %vm7343_vm9, %v1746_v6, %v1748_v16  ;;  %7349 = vst [vmem:[#allocation27_spill] sm:$0xff] %v5714_v59  ;;  %vm7355_vm5 = vmmov %vm7343_vm9 }
 0x204   : > { %7342 = vst [vmem:[#allocation26_spill] sm:$0xff] %v5696_v26  ;;  %7344 = vst [vmem:[#allocation24_spill] sm:$0xff] %v5701_v58  ;;  %v5704_v31 = vsel %vm7345_vm13, %v1748_v16, %v1750_v48  ;;  %v5709_v36 = vsel %vm7347_vm15, %v1750_v48, %v7102_v51  ;;  %v1759_v4 = vsel %vm4744_vm8, 0.0, %v5701_v58  ;;  %vm7359_vm15 = vnez %v7177_v15 }
 0x205   : > { %7346 = vst [vmem:[#allocation17_spill] sm:$0xff] %v5704_v31  ;;  %7348 = vst [vmem:[#allocation25_spill] sm:$0xff] %v5709_v36 }
 0x206   : > { %1791 = vrot.lane.b32.xlu0 %v5714_v59, %s4325_s26  ;;  %vm7356_vm0 = vmmov %vm7355_vm5 }
 0x207   : > { %vm7357_vm9 = vmmov %vm7341_vm14 }
 0x208   : > { %v4046_v44 = vpop.f32.mrb[2].mxu1  ;;  %vm7358_vm13 = vmmov %vm7357_vm9 }
 0x209   : > { %v1121_v49 = vadd.f32 %v4046_v44, %v5582_v11  ;;  %v1115_v6 = vpop.f32.mrb[3].mxu1 }
 0x20a   : > { %v1116_v62 = vadd.f32 %v5582_v11, %v1115_v6 }
 0x20b   : > { %v1127_v39 = vmax.f32 %v1121_v49, 0.0 }
 0x20c   : > { %v1126_v42 = vmax.f32 %v1116_v62, 0.0 }
 0x20d   : > { %v1654_v12 = vrot.slane %v1127_v39, 7 }
 0x20e   : > { %v1652_v56 = vrot.slane %v1126_v42, 7 }
 0x20f   : > { %v1662_v33 = vsel %vm7350_vm10, %v1654_v12, 0.0  ;;  %vm7360_vm10 = vmmov %vm7337_vm3 }
 0x210   : > { %v1771_v35 = vrot.slane %v1662_v33, 2  ;;  %v1861_v43 = vrot.slane %v1662_v33, 1  ;;  %v1655_v30 = vsel %vm7351_vm12, %v1652_v56, %v1654_v12  ;;  %v1653_v40 = vsel %vm7337_vm3, %v5611_v38, %v1652_v56  ;;  %vm7361_vm12 = vmmov %vm7337_vm3 }
 0x211   : > { %v5726_v23 = vsel %vm4631_vm6, 0.0, %v1655_v30  ;;  %v1769_v7 = vrot.slane %v1655_v30, 2  ;;  %v5730_v27 = vsel %vm4589_vm4, 0.0, %v1653_v40  ;;  %v1767_v32 = vrot.slane %v1653_v40, 2  ;;  %vm7364_vm3 = vmmov %vm7357_vm9 }
 0x212   : > { %7352 = vst [vmem:[#allocation29_spill] sm:$0xff] %v5726_v23  ;;  %7353 = vst [vmem:[#allocation28_spill] sm:$0xff] %v5730_v27  ;;  %2100 = vrot.lane.b32.xlu0 %v5726_v23, %s4325_s26  ;;  %2098 = vrot.lane.b32.xlu1 %v5730_v27, %s4325_s26  ;;  %v1857_v55 = vrot.slane %v1653_v40, 1  ;;  %v1859_v8 = vrot.slane %v1655_v30, 1 }
 0x213   : > { %v1768_v38 = vsel %vm7354_vm11, %v1765_v50, %v1767_v32  ;;  %v5740_v10 = vsel %vm7355_vm5, %v1767_v32, %v1769_v7  ;;  %v5743_v20 = vsel %vm7356_vm0, %v1769_v7, %v1771_v35  ;;  %v5790_v50 = vsel %vm7359_vm15, 0.0, %v5704_v31  ;;  %vm7365_vm11 = vmmov %vm7356_vm0 }
 0x214   : > { %v5748_v47 = vsel %vm7341_vm14, %v1855_v34, %v1857_v55  ;;  %v5751_v28 = vsel %vm7357_vm9, %v1857_v55, %v1859_v8  ;;  %v5754_v17 = vsel %vm7358_vm13, %v1859_v8, %v1861_v43  ;;  %v5798_v34 = vsel %vm4744_vm8, 0.0, %v1768_v38  ;;  %vm7366_vm5 = vmmov %vm7360_vm10 }
 0x215   : > { %vm7367_vm0 = vmmov %vm7366_vm5  ;;  %vm7134_vm13 = vcmask 1041408  }
 0x216   : > { %1807 = vrot.lane.b32.xlu0 %v5726_v23, %s4329_s29  ;;  %1805 = vrot.lane.b32.xlu1 %v5730_v27, %s4329_s29  ;;  %vm7368_vm14 = vmmov %vm7364_vm3 }
 0x217   : > { %vm7369_vm9 = vmmov %vm7365_vm11 }
 0x21a   : > { %2124 = vrot.lane.b32.xlu0 %v5688_v1, %s4331_s16  ;;  %1844 = vrot.lane.b32.xlu1 %v5688_v1, %s4333_s25 }
 0x21e   : > { %2136 = vrot.lane.b32.xlu0 %v5748_v47, %s4333_s25  ;;  %2126 = vrot.lane.b32.xlu1 %v5691_v3, %s4331_s16 }
 0x222   : > { %1865 = vrot.lane.b32.xlu0 %v5748_v47, %s4335_s14  ;;  %1846 = vrot.lane.b32.xlu1 %v5691_v3, %s4333_s25 }
 0x226   : > { %2128 = vrot.lane.b32.xlu0 %v5696_v26, %s4331_s16  ;;  %2138 = vrot.lane.b32.xlu1 %v5751_v28, %s4333_s25 }
 0x22a   : > { %1848 = vrot.lane.b32.xlu0 %v5696_v26, %s4333_s25  ;;  %1867 = vrot.lane.b32.xlu1 %v5751_v28, %s4335_s14 }
 0x22e   : > { %1869 = vrot.lane.b32.xlu0 %v5754_v17, %s4335_s14  ;;  %2140 = vrot.lane.b32.xlu1 %v5754_v17, %s4333_s25 }
 0x232   : > { %2169 = vrot.lane.b32.xlu0 %v1759_v4, %s4336_s17  ;;  %2171 = vrot.lane.b32.xlu1 %v5790_v50, %s4336_s17 }
 0x236   : > { %1897 = vrot.lane.b32.xlu0 %v1759_v4, %s4337_s21 }
 0x23a   : > { %2181 = vrot.lane.b32.xlu0 %v5798_v34, %s4337_s21 }
 0x23c   : > { %v4053_v61 = vpop.f32.mrb[4].mxu0 }
 0x23d   : > { %v1362_v63 = vadd.f32 %v4053_v61, %v5582_v11  ;;  %v1356_v37 = vpop.f32.mrb[5].mxu0 }
 0x23e   : > { %v1357_v16 = vadd.f32 %v5582_v11, %v1356_v37  ;;  %1913 = vrot.lane.b32.xlu0 %v5798_v34, %s4338_s22 }
 0x23f   : > { %v1376_v48 = vmax.f32 %v1362_v63, 0.0 }
 0x240   : > { %v1375_v44 = vmax.f32 %v1357_v16, 0.0 }
 0x241   : > { %v5806_v49 = vrot.slane %v1376_v48, 7 }
 0x242   : > { %v1667_v6 = vrot.slane %v1375_v44, 7 }
 0x244   : > { %v1679_v62 = vsel %vm7360_vm10, 0.0, %v1667_v6  ;;  %v5811_v39 = vsel %vm7361_vm12, %v1667_v6, %v5806_v49  ;;  %vm7372_vm10 = vmmov %vm7364_vm3 }
 0x245   : > { %v2077_v42 = vrot.slane %v1679_v62, 2  ;;  %v2146_v12 = vrot.slane %v1679_v62, 1  ;;  %v5815_v56 = vsel %vm4457_vm1, 0.0, %v1679_v62  ;;  %v5820_v33 = vsel %vm4488_vm2, 0.0, %v5811_v39  ;;  %vm7373_vm12 = vmmov %vm7369_vm9 }
 0x246   : > { %7362 = vst [vmem:[#allocation13_spill] sm:$0xff] %v5815_v56  ;;  %7363 = vst [vmem:[#allocation30_spill] sm:$0xff] %v5820_v33  ;;  %2110 = vrot.lane.b32.xlu1 %v5815_v56, %s4329_s29  ;;  %v7106_v35 = vrot.slane %v5811_v39, 2  ;;  %2112 = vrot.lane.b32.xlu0 %v5820_v33, %s4329_s29  ;;  %v7107_v43 = vrot.slane %v5811_v39, 1 }
 0x248   : > { %v5831_v30 = vsel %vm7364_vm3, %v2146_v12, %v7107_v43  ;;  %v5836_v40 = vsel %vm7365_vm11, %v2077_v42, %v7106_v35  ;;  %v414_v12 = vld [vmem:[%s7041_s3] sm:$0xff]  ;;  %vm7374_vm3 = vmmov %vm7367_vm0 }
 0x249   : > { %vm7375_vm11 = vmmov %vm7367_vm0 }
 0x24a   : > { %2352 = vrot.lane.b32.xlu0 %v5815_v56, %s4325_s26 }
 0x24b   : > { %v4063_v7 = vpop.f32.mrb[4].mxu1 }
 0x24c   : > { %v1610_v32 = vadd.f32 %v4063_v7, %v5582_v11  ;;  %v1604_v55 = vpop.f32.mrb[5].mxu1  ;;  %v415_v7 = vld [vmem:[%s7041_s3 + $0x8] sm:$0xff] }
 0x24d   : > { %v1605_v38 = vadd.f32 %v5582_v11, %v1604_v55 }
 0x24e   : > { %2354 = vrot.lane.b32.xlu0 %v5820_v33, %s4325_s26  ;;  %v1624_v8 = vmax.f32 %v1610_v32, 0.0 }
 0x24f   : > { %v1623_v61 = vmax.f32 %v1605_v38, 0.0  ;;  %v5886_v38 = vld [vmem:[%s7041_s3 + $0x10] sm:$0x3] }
 0x250   : > { %v5844_v4 = vrot.slane %v1624_v8, 7  ;;  %v5877_v8 = vpack.c.bf16 %v415_v7, %v414_v12  ;;  %7371 = vst [vmem:[#allocation14_spill] sm:$0xff] %v5886_v38  ;;  %v5904_v12 = vpop.permute.xlu0 %1785 }
 0x251   : > { %v1685_v63 = vrot.slane %v1623_v61, 7  ;;  %v5890_v61 = vpop.permute.xlu1 %2094 }
 0x252   : > { %7370 = vst [vmem:[#allocation31_spill] sm:$0xff] %v5877_v8  ;;  %4184 = vmatprep.subr.bf16.mxu0 %v5877_v8  ;;  %4188 = vmatprep.subr.bf16.mxu1 %v5877_v8 }
 0x253   : > { %v5848_v37 = vsel %vm7366_vm5, %v1685_v63, %v5844_v4  ;;  %v5851_v16 = vsel %vm7367_vm0, 0.0, %v1685_v63  ;;  %4186 = vmatpush3.bf16.msra.mxu0 %v5877_v8  ;;  %4190 = vmatpush3.bf16.msra.mxu1 %v5877_v8  ;;  %vm7376_vm5 = vmmov %vm7367_vm0 }
 0x254   : > { %v1727_v48 = vrot.slane %v5851_v16, 2  ;;  %v1813_v44 = vrot.slane %v5851_v16, 1  ;;  %v2340_v6 = vsel %vm4457_vm1, 0.0, %v5851_v16  ;;  %v7105_v62 = vrot.slane %v5848_v37, 1  ;;  %4071 = vmatprep.subr.msk.mxu0 %vm7134_vm13, %v5886_v38  ;;  %4083 = vmatprep.subr.msk.mxu1 %vm7134_vm13, %v5886_v38  ;;  %v5920_v43 = vpop.permute.xlu0 %1787  ;;  %vm7379_vm0 = vmmov %vm7372_vm10 }
 0x255   : > { %2601 = vrot.lane.b32.xlu1 %v2340_v6, %s4325_s26  ;;  %v7104_v42 = vrot.slane %v5848_v37, 2 }
 0x256   : > { %v5870_v32 = vsel %vm7368_vm14, %v1813_v44, %v7105_v62  ;;  %vm7381_vm14 = vmmov %vm7369_vm9 }
 0x257   : > { %v5875_v55 = vsel %vm7369_vm9, %v1727_v48, %v7104_v42  ;;  %1823 = vrot.lane.b32.xlu0 %v5870_v32, %s4331_s16  ;;  %4072 = vmatpush3.msk.msra.mxu0 %vm7134_vm13, %v5886_v38  ;;  %v1728_v42 = vsel %vm7373_vm12, %v7230_v18, %v1727_v48  ;;  %vm7382_vm9 = vmmov %vm7374_vm3 }
 0x258   : > { %v1740_v63 = vsel %vm4744_vm8, 0.0, %v5875_v55  ;;  %4084 = vmatpush3.msk.msra.mxu1 %vm7134_vm13, %v5886_v38  ;;  %4192 = vmatprep.subr.bf16.mxu0 %v5877_v8  ;;  %v7392_v38 = vrot.slane %v5848_v37, 2 }
 0x259   : > { %2368 = vrot.lane.b32.xlu1 %v2340_v6, %s4329_s29  ;;  %v1814_v6 = vsel %vm7372_vm10, %v7218_v24, %v1813_v44  ;;  %4196 = vmatprep.subr.bf16.mxu1 %v5877_v8  ;;  %vm7383_vm10 = vmmov %vm7373_vm12 }
 0x25a   : > { %vm7384_vm12 = vmmov %vm7383_vm10 }
 0x25b   : > { %1881 = vrot.lane.b32.xlu0 %v1740_v63, %s4336_s17  ;;  %v5914_v63 = vpop.permute.xlu1 %1801 }
 0x25d   : > { %1821 = vrot.lane.b32.xlu1 %v1814_v6, %s4331_s16 }
 0x260   : > { %v4056_v7 = vpop.f32.mrb[6].mxu0 }
 0x261   : > { %v1372_v51 = vadd.f32 %v4056_v7, %v5582_v11  ;;  %v1366_v46 = vpop.f32.mrb[7].mxu0  ;;  %2155 = vrot.lane.b32.xlu1 %v5831_v30, %s4335_s14 }
 0x262   : > { %v1367_v44 = vadd.f32 %v5582_v11, %v1366_v46  ;;  %v1739_v46 = vsel %vm4685_vm7, 0.0, %v1728_v42 }
 0x263   : > { %v1378_v6 = vmax.f32 %v1372_v51, 0.0 }
 0x264   : > { %v1377_v7 = vmax.f32 %v1367_v44, 0.0 }
 0x265   : > { %v1672_v62 = vrot.slane %v1378_v6, 7  ;;  %v4066_v35 = vpop.f32.mrb[6].mxu1  ;;  %1879 = vrot.lane.b32.xlu1 %v1739_v46, %s4336_s17  ;;  %v5933_v6 = vsel %vm4685_vm7, 0.0, %v5836_v40  ;;  %v5938_v46 = vpop.permute.xlu0 %2096 }
 0x266   : > { %v1670_v23 = vrot.slane %v1377_v7, 7  ;;  %v1620_v27 = vadd.f32 %v4066_v35, %v5582_v11  ;;  %v1614_v33 = vpop.f32.mrb[7].mxu1  ;;  %v5935_v35 = vpop.permute.xlu1 %2122 }
 0x267   : > { %v1680_v51 = vsel %vm7374_vm3, %v1672_v62, 0.0  ;;  %v1615_v21 = vadd.f32 %v5582_v11, %v1614_v33 }
 0x268   : > { %v2084_v56 = vrot.slane %v1680_v51, 2  ;;  %v1671_v48 = vsel %vm7375_vm11, %v5806_v49, %v1670_v23  ;;  %v1626_v44 = vmax.f32 %v1620_v27, 0.0  ;;  %v1673_v22 = vsel %vm7376_vm5, %v1670_v23, %v1672_v62  ;;  %vm7386_vm11 = vmmov %vm7374_vm3 }
 0x269   : > { %v2080_v42 = vrot.slane %v1671_v48, 2  ;;  %v1625_v7 = vmax.f32 %v1615_v21, 0.0  ;;  %v2149_v59 = vrot.slane %v1671_v48, 1  ;;  %v2153_v11 = vrot.slane %v1680_v51, 1  ;;  %2195 = vrot.lane.b32.xlu1 %v5933_v6, %s4338_s22  ;;  %vm7388_vm5 = vmmov %vm7379_vm0 }
 0x26a   : > { %v1690_v33 = vrot.slane %v1626_v44, 7  ;;  %v5942_v49 = vsel %vm4631_vm6, 0.0, %v1673_v22  ;;  %v2082_v27 = vrot.slane %v1673_v22, 2  ;;  %v7378_v21 = vrot.slane %v5811_v39, 1 }
 0x26b   : > { %7377 = vst [vmem:[#allocation6_spill] sm:$0xff] %v5942_v49  ;;  %v1688_v18 = vrot.slane %v1625_v7, 7  ;;  %2116 = vrot.lane.b32.xlu0 %v5942_v49, %s4329_s29  ;;  %v2151_v40 = vrot.slane %v1673_v22, 1  ;;  %v7380_v62 = vrot.slane %v5811_v39, 2  ;;  %v5972_v22 = vsel %vm4589_vm4, 0.0, %v1671_v48 }
 0x26c   : > { %v5951_v23 = vsel %vm7379_vm0, %v7378_v21, %v2149_v59  ;;  %v1698_v44 = vsel %vm7382_vm9, %v1690_v33, 0.0  ;;  %v5958_v7 = vsel %vm7383_vm10, %v2080_v42, %v2082_v27  ;;  %v5961_v13 = vsel %vm7384_vm12, %v2082_v27, %v2084_v56  ;;  %7387 = vst [vmem:[#allocation8_spill] sm:$0xff] %v5972_v22  ;;  %v5980_v27 = vpop.permute.xlu1 %1842  ;;  %vm7391_vm9 = vmmov %vm7379_vm0 }
 0x26d   : > { %v2081_v51 = vsel %vm7381_vm14, %v7380_v62, %v2080_v42  ;;  %v2404_v24 = vrot.slane %v1698_v44, 1  ;;  %v5965_v26 = vsel %vm7374_vm3, %v5844_v4, %v1688_v18  ;;  %v5968_v21 = vsel %vm7386_vm11, %v1688_v18, %v1690_v33  ;;  %2114 = vrot.lane.b32.xlu1 %v5972_v22, %s4329_s29  ;;  %v5990_v33 = vpop.permute.xlu0 %1803  ;;  %vm7389_vm14 = vmmov %vm7379_vm0 }
 0x26e   : > { %7385 = vst [vmem:[#allocation9_spill] sm:$0xff] %v5965_v26  ;;  %v1733_v39 = vrot.slane %v5968_v21, 2  ;;  %v1817_v42 = vrot.slane %v5965_v26, 1  ;;  %v1819_v62 = vrot.slane %v5968_v21, 1  ;;  %v5978_v56 = vsel %vm7388_vm5, %v2149_v59, %v2151_v40  ;;  %vm7393_vm12 = vmmov %vm7383_vm10 }
 0x26f   : > { %v2345_v4 = vrot.slane %v1698_v44, 2  ;;  %2157 = vrot.lane.b32.xlu0 %v5951_v23, %s4335_s14  ;;  %v5987_v18 = vsel %vm7379_vm0, %v2151_v40, %v2153_v11  ;;  %v1731_v48 = vrot.slane %v5965_v26, 2  ;;  %v7390_v59 = vrot.slane %v5848_v37, 1  ;;  %vm7394_vm3 = vmmov %vm7379_vm0 }
 0x270   : > { %v5993_v31 = vsel %vm7389_vm14, %v1817_v42, %v1819_v62  ;;  %v6009_v40 = vsel %vm7394_vm3, %v1819_v62, %v2404_v24  ;;  %vm7395_vm11 = vmmov %vm7383_vm10  ;;  %vm7399_vm5 = vnez %v7183_v54  ;;  %vm7405_vm0 = vcmask 15360  }
 0x271   : > { %v5998_v44 = vsel %vm7391_vm9, %v7390_v59, %v1817_v42  ;;  %v6003_v8 = vsel %vm7383_vm10, %v7392_v38, %v1731_v48  ;;  %v6006_v11 = vsel %vm7393_vm12, %v1731_v48, %v1733_v39  ;;  %v6016_v42 = vsel %vm7395_vm11, %v1733_v39, %v2345_v4  ;;  %v6018_v59 = vpop.permute.xlu1 %2134  ;;  %v6020_v58 = vpop.permute.xlu0 %1863  ;;  %vm7408_vm10 = vmmov %vm7405_vm0 }
 0x272   : > { %1825 = vrot.lane.b32.xlu1 %v5998_v44, %s4331_s16  ;;  %7396 = vst [vmem:[#allocation12_spill] sm:$0xff] %v6016_v42  ;;  %v6024_v38 = vsel %vm4744_vm8, 0.0, %v2081_v51  ;;  %v1741_v39 = vsel %vm7359_vm15, 0.0, %v6003_v8  ;;  %v2341_v51 = vsel %vm4488_vm2, 0.0, %v5848_v37  ;;  %v2591_v4 = vsel %vm4457_vm1, 0.0, %v5587_v45  ;;  %vm7410_vm3 = vmmov %vm7405_vm0 }
 0x273   : > { %1827 = vrot.lane.b32.xlu0 %v5993_v31, %s4331_s16  ;;  %v1761_v45 = vsel %vm7399_vm5, 0.0, %v5709_v36  ;;  %vm7406_vm14 = vcmask 31744   ;;  %vm7407_vm9 = vcmask 48128   ;;  %vm7411_vm11 = vcmask 64512  }
 0x274   : > { %vm7409_vm12 = vmmov %vm7406_vm14 }
 0x275   : > { %v6030_v24 = vpop.permute.xlu0 %1789  ;;  %v6035_v62 = vpop.permute.xlu1 %2167 }
 0x276   : > { %2197 = vrot.lane.b32.xlu1 %v6024_v38, %s4338_s22  ;;  %7397 = vst [vmem:[#allocation16_spill] sm:$0xff] %v6030_v24 }
 0x277   : > { %2159 = vrot.lane.b32.xlu0 %v5978_v56, %s4335_s14 }
 0x279   : > { %v6048_v48 = vpop.permute.xlu0 %1791  ;;  %v6050_v42 = vpop.permute.xlu1 %1895 }
 0x27a   : > { %1883 = vrot.lane.b32.xlu1 %v1741_v39, %s4336_s17  ;;  %7398 = vst [vmem:[#allocation18_spill] sm:$0xff] %v6048_v48  ;;  %v1742_v39 = vsel %vm7399_vm5, 0.0, %v6006_v11 }
 0x27b   : > { %2161 = vrot.lane.b32.xlu0 %v5987_v18, %s4335_s14 }
 0x27d   : > { %v6068_v52 = vpop.permute.xlu1 %2179 }
 0x27e   : > { %2617 = vrot.lane.b32.xlu1 %v2591_v4, %s4329_s29  ;;  %v6066_v4 = vsel %vm7359_vm15, 0.0, %v5740_v10  ;;  %v2592_v10 = vsel %vm4488_vm2, 0.0, %v5671_v60  ;;  %v6100_v60 = vsel %vm7399_vm5, 0.0, %v5743_v20 }
 0x27f   : > { %2603 = vrot.lane.b32.xlu0 %v2341_v51, %s4325_s26 }
 0x282   : > { %1899 = vrot.lane.b32.xlu1 %v5790_v50, %s4337_s21 }
 0x283   : > { %1885 = vrot.lane.b32.xlu0 %v1742_v39, %s4336_s17 }
 0x284   : > { %v6058_v24 = vpop.permute.xlu0 %2100 }
 0x285   : > { %7400 = vst [vmem:[#allocation19_spill] sm:$0xff] %v6058_v24  ;;  %v6080_v24 = vpop.permute.xlu1 %1911 }
 0x286   : > { %2183 = vrot.lane.b32.xlu1 %v6066_v4, %s4337_s21 }
 0x287   : > { %2173 = vrot.lane.b32.xlu0 %v1761_v45, %s4336_s17 }
 0x288   : > { %v6073_v39 = vpop.permute.xlu0 %1807 }
 0x289   : > { %7401 = vst [vmem:[#allocation20_spill] sm:$0xff] %v6073_v39  ;;  %v6090_v39 = vpop.permute.xlu1 %2098 }
 0x28a   : > { %2380 = vrot.lane.b32.xlu1 %v5636_v14, %s4331_s16 }
 0x28b   : > { %2370 = vrot.lane.b32.xlu0 %v2341_v51, %s4329_s29  ;;  %v6105_v51 = vsel %vm7359_vm15, 0.0, %v5958_v7 }
 0x28c   : > { %v6078_v50 = vpop.permute.xlu0 %2124 }
 0x28e   : > { %2629 = vrot.lane.b32.xlu1 %v5831_v30, %s4331_s16 }
 0x28f   : > { %2619 = vrot.lane.b32.xlu0 %v2592_v10, %s4329_s29  ;;  %v6107_v10 = vpop.permute.xlu1 %1805 }
 0x290   : > { %v6088_v48 = vpop.permute.xlu0 %2136 }
 0x292   : > { %1915 = vrot.lane.b32.xlu1 %v6066_v4, %s4338_s22 }
 0x293   : > { %1901 = vrot.lane.b32.xlu0 %v1761_v45, %s4337_s21  ;;  %v1845_v7 = vpop.permute.xlu1 %1844 }
 0x294   : > { %v6095_v14 = vpop.permute.xlu0 %1865 }
 0x296   : > { %2199 = vrot.lane.b32.xlu1 %v6105_v51, %s4338_s22 }
 0x297   : > { %2185 = vrot.lane.b32.xlu0 %v6100_v60, %s4337_s21 }
 0x298   : > { %v6113_v45 = vpop.permute.xlu0 %2128 }
 0x299   : > { %7402 = vst [vmem:[#allocation32_spill] sm:$0xff] %v6113_v45  ;;  %v6130_v45 = vsel %vm7399_vm5, 0.0, %v5961_v13  ;;  %v2342_v13 = vsel %vm4589_vm4, 0.0, %v5965_v26 }
 0x29a   : > { %2392 = vrot.lane.b32.xlu1 %v5831_v30, %s4333_s25 }
 0x29b   : > { %2382 = vrot.lane.b32.xlu0 %v5748_v47, %s4331_s16  ;;  %v6132_v47 = vpop.permute.xlu1 %2126 }
 0x29c   : > { %v6119_v20 = vpop.permute.xlu0 %1848 }
 0x29d   : > { %7403 = vst [vmem:[#allocation33_spill] sm:$0xff] %v6119_v20 }
 0x29e   : > { %2641 = vrot.lane.b32.xlu1 %v5870_v32, %s4333_s25 }
 0x29f   : > { %2631 = vrot.lane.b32.xlu0 %v5951_v23, %s4331_s16 }
 0x2a0   : > { %v6125_v36 = vpop.permute.xlu0 %1869 }
 0x2a1   : > { %7404 = vst [vmem:[#allocation34_spill] sm:$0xff] %v6125_v36  ;;  %v6144_v36 = vpop.permute.xlu1 %1846 }
 0x2a2   : > { %2201 = vrot.lane.b32.xlu1 %v6130_v45, %s4338_s22 }
 0x2a3   : > { %1917 = vrot.lane.b32.xlu0 %v6100_v60, %s4338_s22 }
 0x2a4   : > { %v6138_v30 = vpop.permute.xlu0 %2169 }
 0x2a5   : > { %v6154_v54 = vpop.permute.xlu1 %2138 }
 0x2a6   : > { %2394 = vrot.lane.b32.xlu1 %v5951_v23, %s4333_s25 }
 0x2a7   : > { %2356 = vrot.lane.b32.xlu0 %v5972_v22, %s4325_s26 }
 0x2a8   : > { %v6152_v20 = vpop.permute.xlu0 %1897 }
 0x2aa   : > { %2605 = vrot.lane.b32.xlu1 %v2342_v13, %s4325_s26 }
 0x2ab   : > { %2406 = vrot.lane.b32.xlu0 %v5870_v32, %s4335_s14  ;;  %v6165_v32 = vpop.permute.xlu1 %1867 }
 0x2ac   : > { %v6160_v23 = vpop.permute.xlu0 %2181 }
 0x2ae   : > { %2654 = vrot.lane.b32.xlu1 %v5688_v1, %s4335_s14  ;;  %v2343_v1 = vsel %vm4631_vm6, 0.0, %v5968_v21 }
 0x2af   : > { %2643 = vrot.lane.b32.xlu0 %v5998_v44, %s4333_s25  ;;  %v6179_v26 = vpop.permute.xlu1 %2140 }
 0x2b0   : > { %v6171_v22 = vpop.permute.xlu0 %1913 }
 0x2b2   : > { %2372 = vrot.lane.b32.xlu1 %v2342_v13, %s4329_s29 }
 0x2b3   : > { %2358 = vrot.lane.b32.xlu0 %v5942_v49, %s4325_s26  ;;  %v2593_v49 = vsel %vm4589_vm4, 0.0, %v5674_v5 }
 0x2b6   : > { %2418 = vrot.lane.b32.xlu1 %v5657_v2, %s4336_s17  ;;  %v6187_v2 = vpop.permute.xlu1 %2171 }
 0x2b7   : > { %2408 = vrot.lane.b32.xlu0 %v5998_v44, %s4335_s14 }
 0x2b8   : > { %v2113_v44 = vpop.permute.xlu0 %2112 }
 0x2ba   : > { %2621 = vrot.lane.b32.xlu1 %v2593_v49, %s4329_s29  ;;  %v2111_v5 = vpop.permute.xlu1 %2110  ;;  %v1707_v49 = vsel %vm4488_vm2, 0.0, %v5851_v16 }
 0x2bb   : > { %2607 = vrot.lane.b32.xlu0 %v2343_v1, %s4325_s26 }
 0x2bc   : > { %v6189_v21 = vpop.permute.xlu0 %2352 }
 0x2be   : > { %2666 = vrot.lane.b32.xlu1 %v5933_v6, %s4336_s17 }
 0x2bf   : > { %2656 = vrot.lane.b32.xlu0 %v5691_v3, %s4335_s14 }
 0x2c0   : > { %v6201_v3 = vpop.permute.xlu0 %2354 }
 0x2c2   : > { %2384 = vrot.lane.b32.xlu1 %v5751_v28, %s4331_s16  ;;  %v2594_v28 = vsel %vm4631_vm6, 0.0, %v5666_v25 }
 0x2c3   : > { %2374 = vrot.lane.b32.xlu0 %v2343_v1, %s4329_s29  ;;  %v1924_v1 = vsel %vm7405_vm0, %v1707_v49, %v5920_v43  ;;  %v2348_v43 = vsel %vm4685_vm7, 0.0, %v5875_v55  ;;  %v2207_v49 = vsel %vm7408_vm10, %v5592_v29, %v5890_v61  ;;  %vm1939_vm0 = vcmask 80896   ;;  %vm7413_vm10 = vmmov %vm7407_vm9 }
 0x2c4   : > { %v1928_v16 = vsel %vm7406_vm14, %v1924_v1, %v5990_v33  ;;  %v1923_v33 = vsel %vm7410_vm3, 0.0, %v5904_v12  ;;  %vm7412_vm14 = vmmov %vm7409_vm12 }
 0x2c5   : > { %v1927_v55 = vsel %vm7412_vm14, %v1923_v33, %v5914_v63  ;;  %vm7414_vm3 = vmmov %vm7411_vm11  ;;  %vm7137_vm14 = vcmask 113664  }
 0x2c6   : > { %2430 = vrot.lane.b32.xlu1 %v5933_v6, %s4337_s21 }
 0x2c7   : > { %2420 = vrot.lane.b32.xlu0 %v5798_v34, %s4336_s17  ;;  %v6203_v13 = vpop.permute.xlu1 %2601 }
 0x2c9   : > { %v1824_v34 = vpop.permute.xlu0 %1823 }
 0x2ca   : > { %2633 = vrot.lane.b32.xlu1 %v5978_v56, %s4331_s16  ;;  %v1932_v19 = vsel %vm7407_vm9, %v1928_v16, %v1824_v34 }
 0x2cb   : > { %2623 = vrot.lane.b32.xlu0 %v2594_v28, %s4329_s29  ;;  %v6215_v6 = vpop.permute.xlu1 %2368  ;;  %v2211_v28 = vsel %vm7409_vm12, %v2207_v49, %v2111_v5  ;;  %v1936_v1 = vsel %vm7411_vm11, %v1932_v19, %v1845_v7  ;;  %vm7138_vm12 = vcmask 97280   ;;  %vm7415_vm11 = vmmov %vm7414_vm3 }
 0x2cc   : > { %v2215_v29 = vsel %vm7407_vm9, %v2211_v28, %v5935_v35  ;;  %v1941_v12 = vsel %vm1939_vm0, %v1936_v1, %v6095_v14  ;;  %vm7136_vm9 = vcmask 130048   ;;  %v7418_v28 = vld [vmem:[#allocation24_spill] sm:$0xff] }
 0x2cd   : > { %v1882_v19 = vpop.permute.xlu0 %1881  ;;  %v2219_v35 = vsel %vm7415_vm11, %v2215_v29, %v6018_v59  ;;  %vm7417_vm11 = vcmask 31744  }
 0x2ce   : > { %2678 = vrot.lane.b32.xlu1 %v2348_v43, %s4337_s21  ;;  %v1946_v5 = vsel %vm7138_vm12, %v1941_v12, %v1882_v19  ;;  %v7423_v19 = vld [vmem:[#allocation17_spill] sm:$0xff] }
 0x2cf   : > { %2668 = vrot.lane.b32.xlu0 %v6024_v38, %s4336_s17  ;;  %v1822_v34 = vpop.permute.xlu1 %1821 }
 0x2d0   : > { %v1931_v61 = vsel %vm7413_vm10, %v1927_v55, %v1822_v34  ;;  %vm7135_vm10 = vcmask 146432   ;;  %v7421_v34 = vld [vmem:[#allocation14_spill] sm:$0xff] }
 0x2d1   : > { %v1935_v63 = vsel %vm7414_vm3, %v1931_v61, %v5980_v27  ;;  %v1951_v27 = vsel %vm7137_vm14, %v1946_v5, %v6152_v20  ;;  %vm7416_vm3 = vcmask 15360  }
 0x2d2   : > { %2396 = vrot.lane.b32.xlu1 %v5978_v56, %s4333_s25  ;;  %v1940_v14 = vsel %vm1939_vm0, %v1935_v63, %v6020_v58  ;;  %v1956_v20 = vsel %vm7136_vm9, %v1951_v27, %v6171_v22  ;;  %v7420_v22 = vld [vmem:[#allocation31_spill] sm:$0xff] }
 0x2d3   : > { %2386 = vrot.lane.b32.xlu0 %v5754_v17, %s4331_s16  ;;  %v2156_v7 = vpop.permute.xlu1 %2155 }
 0x2d4   : > { %v2223_v56 = vsel %vm1939_vm0, %v2219_v35, %v2156_v7  ;;  %v2598_v7 = vsel %vm4744_vm8, 0.0, %v7423_v19 }
 0x2d5   : > { %v2227_v59 = vsel %vm7138_vm12, %v2223_v56, %v6035_v62  ;;  %v7425_v56 = vld [vmem:[#allocation10_spill] sm:$0xff] }
 0x2d6   : > { %2446 = vrot.lane.b32.xlu1 %v2348_v43, %s4338_s22  ;;  %v2208_v43 = vsel %vm7416_vm3, %v5605_v41, %v5938_v46  ;;  %v2231_v41 = vsel %vm7137_vm14, %v2227_v59, %v6068_v52  ;;  %vm7419_vm3 = vcmask 48128   ;;  %v2349_v52 = vsel %vm4744_vm8, 0.0, %v6003_v8 }
 0x2d7   : > { %2432 = vrot.lane.b32.xlu0 %v6024_v38, %s4337_s21  ;;  %v1880_v17 = vpop.permute.xlu1 %1879  ;;  %v2212_v58 = vsel %vm7417_vm11, %v2208_v43, %v2113_v44  ;;  %v2597_v44 = vsel %vm4685_vm7, 0.0, %v7418_v28  ;;  %vm7422_vm11 = vcmask 64512   ;;  %v2350_v43 = vsel %vm7359_vm15, 0.0, %v6006_v11  ;;  %v7437_v28 = vld [vmem:[#allocation25_spill] sm:$0xff] }
 0x2d8   : > { %v1945_v16 = vsel %vm7138_vm12, %v1940_v14, %v1880_v17  ;;  %v7426_v17 = vrot.slane %v5666_v25, 1 }
 0x2d9   : > { %v1950_v38 = vsel %vm7137_vm14, %v1945_v16, %v6050_v42  ;;  %v1708_v16 = vsel %vm4589_vm4, 0.0, %v5848_v37 }
 0x2da   : > { %2645 = vrot.lane.b32.xlu1 %v5993_v31, %s4333_s25  ;;  %v1955_v62 = vsel %vm7136_vm9, %v1950_v38, %v6080_v24  ;;  %v2216_v24 = vsel %vm7419_vm3, %v2212_v58, %v6078_v50  ;;  %vm7427_vm3 = vcmask 1046528   ;;  %v7428_v38 = vld [vmem:[#allocation16_spill] sm:$0xff] }
 0x2db   : > { %2635 = vrot.lane.b32.xlu0 %v5987_v18, %s4331_s16  ;;  %v2196_v46 = vpop.permute.xlu1 %2195  ;;  %4073 = vmatprep.mubr.msk.f32.mxu0 %vm7135_vm10, %v1955_v62  ;;  %v2220_v50 = vsel %vm7422_vm11, %v2216_v24, %v6088_v48  ;;  %v2653_v14 = vsel %vm7427_vm3, %v7426_v17, %v7425_v56  ;;  %vm7429_vm11 = vcmask 15360   ;;  %vm7430_vm3 = vcmask 31744   ;;  %v7450_v17 = vld [vmem:[#allocation19_spill] sm:$0xff] }
 0x2dc   : > { %v2235_v49 = vsel %vm7136_vm9, %v2231_v41, %v2196_v46  ;;  %4074 = vmatmul.mubr.msk.f32.vlgmr.msra.gmra.mrb[8].mxu0 %vm7135_vm10, %v1956_v20  ;;  %v1925_v58 = vsel %vm7429_vm11, %v1708_v16, %v7428_v38 }
 0x2dd   : > { %v6275_v42 = vpop.permute.xlu0 %2116  ;;  %4085 = vmatprep.mubr.msk.f32.mxu1 %vm7135_vm10, %v2235_v49  ;;  %4194 = vmatpush3.bf16.msra.mxu0 %v7420_v22 }
 0x2de   : > { %2694 = vrot.lane.b32.xlu1 %v2597_v44, %s4338_s22  ;;  %4095 = vmatprep.subr.msk.mxu0 %vm7134_vm13, %v7421_v34  ;;  %v2599_v44 = vsel %vm7359_vm15, 0.0, %v7437_v28  ;;  %v7463_v28 = vld [vmem:[#allocation34_spill] sm:$0xff] }
 0x2df   : > { %2680 = vrot.lane.b32.xlu0 %v2349_v52, %s4337_s21  ;;  %v2115_v33 = vpop.permute.xlu1 %2114 }
 0x2e1   : > { %v2158_v1 = vpop.permute.xlu0 %2157  ;;  %4096 = vmatpush3.msk.msra.mxu0 %vm7134_vm13, %v7421_v34 }
 0x2e2   : > { %v2224_v55 = vsel %vm1939_vm0, %v2220_v50, %v2158_v1  ;;  %2410 = vrot.lane.b32.xlu1 %v5993_v31, %s4335_s14 }
 0x2e3   : > { %2398 = vrot.lane.b32.xlu0 %v5987_v18, %s4333_s25  ;;  %v2228_v61 = vsel %vm7138_vm12, %v2224_v55, %v6138_v30  ;;  %v7424_v30 = vld [vmem:[#allocation26_spill] sm:$0xff] }
 0x2e4   : > { %v1826_v8 = vpop.permute.xlu1 %1825  ;;  %v2232_v31 = vsel %vm7137_vm14, %v2228_v61, %v6160_v23 }
 0x2e5   : > { %v6302_v29 = vpop.permute.xlu0 %1827 }
 0x2e6   : > { %2647 = vrot.lane.b32.xlu1 %v6009_v40, %s4333_s25 }
 0x2e7   : > { %2448 = vrot.lane.b32.xlu0 %v2349_v52, %s4338_s22  ;;  %v7439_v52 = vld [vmem:[#allocation22_spill] sm:$0xff] }
 0x2e8   : > { %v2198_v48 = vpop.permute.xlu1 %2197 }
 0x2e9   : > { %v2160_v12 = vpop.permute.xlu0 %2159  ;;  %v2236_v18 = vsel %vm7136_vm9, %v2232_v31, %v2198_v48  ;;  %vm7434_vm9 = vmmov %vm7430_vm3 }
 0x2ea   : > { %2696 = vrot.lane.b32.xlu1 %v2598_v7, %s4338_s22  ;;  %4086 = vmatmul.mubr.msk.f32.vlgmr.msra.gmra.mrb[8].mxu1 %vm7135_vm10, %v2236_v18  ;;  %vm7433_vm10 = vcmask 48128   ;;  %v7446_v18 = vld [vmem:[#allocation9_spill] sm:$0xff] }
 0x2eb   : > { %2658 = vrot.lane.b32.xlu0 %v7424_v30, %s4335_s14  ;;  %4198 = vmatpush3.bf16.msra.mxu1 %v7420_v22  ;;  %v7440_v22 = vld [vmem:[#allocation15_spill] sm:$0xff]  ;;  %v1709_v19 = vsel %vm4631_vm6, 0.0, %v7446_v18  ;;  %v7448_v30 = vld [vmem:[#allocation18_spill] sm:$0xff] }
 0x2ec   : > { %v1884_v63 = vpop.permute.xlu1 %1883  ;;  %4107 = vmatprep.subr.msk.mxu1 %vm7134_vm13, %v7421_v34 }
 0x2ed   : > { %v6320_v35 = vpop.permute.xlu0 %2161 }
 0x2ee   : > { %2422 = vrot.lane.b32.xlu1 %v6066_v4, %s4336_s17 }
 0x2ef   : > { %2412 = vrot.lane.b32.xlu0 %v6009_v40, %s4335_s14  ;;  %4108 = vmatpush3.msk.msra.mxu1 %vm7134_vm13, %v7421_v34  ;;  %vm7432_vm13 = vmmov %vm7429_vm11  ;;  %vm7435_vm11 = vcmask 64512  }
 0x2f0   : > { %v6330_v23 = vpop.permute.xlu1 %2617 }
 0x2f1   : > { %v6332_v5 = vpop.permute.xlu0 %2603 }
 0x2f2   : > { %2670 = vrot.lane.b32.xlu1 %v6105_v51, %s4336_s17 }
 0x2f3   : > { %2660 = vrot.lane.b32.xlu0 %v2653_v14, %s4335_s14  ;;  %v7451_v14 = vld [vmem:[#allocation27_spill] sm:$0xff] }
 0x2f4   : > { %v1900_v4 = vpop.permute.xlu1 %1899 }
 0x2f5   : > { %v1886_v27 = vpop.permute.xlu0 %1885 }
 0x2f6   : > { %2434 = vrot.lane.b32.xlu1 %v6105_v51, %s4337_s21  ;;  %v1929_v51 = vsel %vm7430_vm3, %v1925_v58, %v6107_v10  ;;  %vm7436_vm3 = vmmov %vm7433_vm10 }
 0x2f7   : > { %2424 = vrot.lane.b32.xlu0 %v6100_v60, %s4336_s17  ;;  %v7431_v60 = vld [vmem:[#allocation11_spill] sm:$0xff]  ;;  %v1933_v37 = vsel %vm7433_vm10, %v1929_v51, %v1826_v8  ;;  %vm7444_vm10 = vcmask 130048   ;;  %v7458_v51 = vld [vmem:[#allocation32_spill] sm:$0xff] }
 0x2f8   : > { %v2184_v40 = vpop.permute.xlu1 %2183  ;;  %v2209_v62 = vsel %vm7432_vm13, %v7431_v60, %v6090_v39  ;;  %v1937_v10 = vsel %vm7435_vm11, %v1933_v37, %v6144_v36  ;;  %v7438_v36 = vld [vmem:[#allocation12_spill] sm:$0xff]  ;;  %vm7442_vm13 = vcmask 1045504  }
 0x2f9   : > { %v2174_v59 = vpop.permute.xlu0 %2173  ;;  %v2213_v41 = vsel %vm7434_vm9, %v2209_v62, %v2115_v33  ;;  %v1942_v24 = vsel %vm1939_vm0, %v1937_v10, %v6165_v32  ;;  %vm7443_vm9 = vmmov %vm7435_vm11  ;;  %vm7445_vm11 = vcmask 146432   ;;  %v7460_v62 = vld [vmem:[#allocation33_spill] sm:$0xff] }
 0x2fa   : > { %2682 = vrot.lane.b32.xlu1 %v2350_v43, %s4337_s21  ;;  %v2217_v46 = vsel %vm7436_vm3, %v2213_v41, %v6132_v47  ;;  %v7441_v47 = vrot.slane %v5666_v25, 2  ;;  %v1947_v34 = vsel %vm7138_vm12, %v1942_v24, %v1884_v63  ;;  %vm7447_vm3 = vmmov %vm7444_vm10 }
 0x2fb   : > { %2672 = vrot.lane.b32.xlu0 %v6130_v45, %s4336_s17  ;;  %v2221_v1 = vsel %vm7443_vm9, %v2217_v46, %v6154_v54  ;;  %v1952_v50 = vsel %vm7137_vm14, %v1947_v34, %v1900_v4 }
 0x2fc   : > { %v6362_v20 = vpop.permute.xlu1 %2380  ;;  %v2595_v33 = vsel %vm7442_vm13, %v7441_v47, %v7440_v22  ;;  %v2225_v32 = vsel %vm1939_vm0, %v2221_v1, %v2160_v12  ;;  %vm7449_vm13 = vcmask 15360  }
 0x2fd   : > { %v6364_v11 = vpop.permute.xlu0 %2370  ;;  %v2600_v25 = vsel %vm7399_vm5, 0.0, %v2595_v33  ;;  %v2229_v54 = vsel %vm7138_vm12, %v2225_v32, %v6187_v2  ;;  %v1926_v63 = vsel %vm7449_vm13, %v1709_v19, %v7448_v30  ;;  %vm7452_vm9 = vmmov %vm7449_vm13  ;;  %v7454_v2 = vld [vmem:[#allocation20_spill] sm:$0xff]  ;;  %vm7457_vm12 = vcmask 48128  }
 0x2fe   : > { %2450 = vrot.lane.b32.xlu1 %v2350_v43, %s4338_s22  ;;  %v2233_v48 = vsel %vm7137_vm14, %v2229_v54, %v2184_v40  ;;  %v2210_v4 = vsel %vm7452_vm9, %v7451_v14, %v7450_v17  ;;  %vm7461_vm13 = vcmask 64512  }
 0x2ff   : > { %2436 = vrot.lane.b32.xlu0 %v6130_v45, %s4337_s21  ;;  %v2351_v45 = vsel %vm7399_vm5, 0.0, %v7438_v36  ;;  %vm7462_vm9 = vmmov %vm7461_vm13 }
 0x300   : > { %v6374_v39 = vpop.permute.xlu1 %2629 }
 0x301   : > { %v6376_v49 = vpop.permute.xlu0 %2619 }
 0x302   : > { %2698 = vrot.lane.b32.xlu1 %v2599_v44, %s4338_s22 }
 0x303   : > { %2684 = vrot.lane.b32.xlu0 %v2351_v45, %s4337_s21 }
 0x304   : > { %v1916_v55 = vpop.permute.xlu1 %1915 }
 0x305   : > { %v1902_v8 = vpop.permute.xlu0 %1901  ;;  %v1957_v61 = vsel %vm7444_vm10, %v1952_v50, %v1916_v55  ;;  %vm7453_vm10 = vmmov %vm7445_vm11 }
 0x306   : > { %2700 = vrot.lane.b32.xlu1 %v2600_v25, %s4338_s22  ;;  %4076 = vmatprep.mubr.msk.f32.mxu0 %vm7445_vm11, %v1957_v61  ;;  %vm7455_vm11 = vcmask 31744  }
 0x307   : > { %2452 = vrot.lane.b32.xlu0 %v2351_v45, %s4338_s22  ;;  %v1930_v40 = vsel %vm7455_vm11, %v1926_v63, %v7454_v2  ;;  %vm7456_vm14 = vmmov %vm7455_vm11  ;;  %v7472_v2 = vld [vmem:[#allocation23_spill] sm:$0xff] }
 0x308   : > { %v2200_v31 = vpop.permute.xlu1 %2199  ;;  %v2214_v16 = vsel %vm7456_vm14, %v2210_v4, %v6275_v42  ;;  %v1934_v43 = vsel %vm7457_vm12, %v1930_v40, %v6302_v29 }
 0x309   : > { %v2186_v12 = vpop.permute.xlu0 %2185  ;;  %v2237_v7 = vsel %vm7447_vm3, %v2233_v48, %v2200_v31  ;;  %vm7459_vm3 = vmmov %vm7457_vm12  ;;  %v1938_v37 = vsel %vm7461_vm13, %v1934_v43, %v7460_v62  ;;  %vm7464_vm12 = vcmask 97280  }
 0x30a   : > { %4088 = vmatprep.mubr.msk.f32.mxu1 %vm7453_vm10, %v2237_v7  ;;  %v2218_v60 = vsel %vm7459_vm3, %v2214_v16, %v7458_v51  ;;  %v1943_v29 = vsel %vm1939_vm0, %v1938_v37, %v7463_v28  ;;  %vm7465_vm14 = vmmov %vm7464_vm12  ;;  %vm7466_vm10 = vcmask 113664   ;;  %vm7468_vm3 = vcmask 130048  }
 0x30b   : > { %v2222_v46 = vsel %vm7462_vm9, %v2218_v60, %v6179_v26  ;;  %v1948_v44 = vsel %vm7464_vm12, %v1943_v29, %v1886_v27  ;;  %vm7467_vm11 = vmmov %vm7466_vm10  ;;  %vm7470_vm9 = vcmask 146432   ;;  %vm7474_vm12 = vcmask 31744  }
 0x30c   : > { %v2393_v38 = vpop.permute.xlu1 %2392  ;;  %v2226_v42 = vsel %vm1939_vm0, %v2222_v46, %v6320_v35  ;;  %v1953_v36 = vsel %vm7466_vm10, %v1948_v44, %v1902_v8  ;;  %vm7469_vm13 = vmmov %vm7468_vm3  ;;  %vm7476_vm10 = vcmask 64512  }
 0x30d   : > { %v6422_v58 = vpop.permute.xlu0 %2382  ;;  %v2230_v24 = vsel %vm7465_vm14, %v2226_v42, %v2174_v59  ;;  %vm7471_vm5 = vmmov %vm7470_vm9  ;;  %vm7475_vm14 = vcmask 48128  }
 0x30e   : > { %v2234_v45 = vsel %vm7467_vm11, %v2230_v24, %v2186_v12  ;;  %vm7477_vm11 = vcmask 97280  }
 0x310   : > { %v2642_v41 = vpop.permute.xlu1 %2641 }
 0x311   : > { %v6428_v10 = vpop.permute.xlu0 %2631 }
 0x314   : > { %v2202_v47 = vpop.permute.xlu1 %2201 }
 0x315   : > { %v1918_v33 = vpop.permute.xlu0 %1917  ;;  %v2238_v1 = vsel %vm7468_vm3, %v2234_v45, %v2202_v47  ;;  %vm7478_vm3 = vcmask 113664  }
 0x316   : > { %v1958_v26 = vsel %vm7469_vm13, %v1953_v36, %v1918_v33  ;;  %4089 = vmatmul.mubr.msk.f32.gmra.mrb[10].mxu1 %vm7471_vm5, %v2238_v1  ;;  %vm7473_vm5 = vcmask 15360  }
 0x317   : > { %4077 = vmatmul.mubr.msk.f32.gmra.mrb[10].mxu0 %vm7470_vm9, %v1958_v26  ;;  %v2458_v40 = vsel %vm7473_vm5, %v7472_v2, %v6189_v21  ;;  %vm7480_vm9 = vmmov %vm7473_vm5  ;;  %vm7481_vm5 = vcmask 146432  }
 0x318   : > { %v2395_v35 = vpop.permute.xlu1 %2394  ;;  %v2462_v16 = vsel %vm7474_vm12, %v2458_v40, %v6215_v6  ;;  %v7479_v6 = vld [vmem:[#allocation13_spill] sm:$0xff] }
 0x319   : > { %v6444_v34 = vpop.permute.xlu0 %2356  ;;  %v2466_v43 = vsel %vm7475_vm14, %v2462_v16, %v6362_v20  ;;  %v2706_v44 = vsel %vm7480_vm9, %v7479_v6, %v6203_v13  ;;  %vm7482_vm9 = vmmov %vm7481_vm5  ;;  %v7499_v6 = vld [vmem:[#allocation28_spill] sm:$0xff] }
 0x31a   : > { %v2470_v62 = vsel %vm7476_vm10, %v2466_v43, %v2393_v38  ;;  %v2710_v20 = vsel %vm7474_vm12, %v2706_v44, %v6330_v23  ;;  %v7483_v23 = vld [vmem:[#allocation21_spill] sm:$0xff] }
 0x31b   : > { %v2714_v38 = vsel %vm7475_vm14, %v2710_v20, %v6374_v39 }
 0x31c   : > { %v6446_v27 = vpop.permute.xlu1 %2605  ;;  %v2718_v45 = vsel %vm7476_vm10, %v2714_v38, %v2642_v41 }
 0x31d   : > { %v2407_v59 = vpop.permute.xlu0 %2406 }
 0x31e   : > { %v2474_v37 = vsel %vm1939_vm0, %v2470_v62, %v2407_v59 }
 0x320   : > { %v2655_v32 = vpop.permute.xlu1 %2654 }
 0x321   : > { %v2644_v50 = vpop.permute.xlu0 %2643  ;;  %v2722_v47 = vsel %vm1939_vm0, %v2718_v45, %v2655_v32 }
 0x324   : > { %v6448_v55 = vpop.permute.xlu1 %2372 }
 0x325   : > { %v6450_v8 = vpop.permute.xlu0 %2358 }
 0x328   : > { %v2419_v61 = vpop.permute.xlu1 %2418 }
 0x329   : > { %v2409_v25 = vpop.permute.xlu0 %2408  ;;  %v2478_v46 = vsel %vm7477_vm11, %v2474_v37, %v2419_v61 }
 0x32c   : > { %v6452_v54 = vpop.permute.xlu1 %2621 }
 0x32d   : > { %v6454_v48 = vpop.permute.xlu0 %2607 }
 0x330   : > { %v2667_v31 = vpop.permute.xlu1 %2666 }
 0x331   : > { %v2657_v12 = vpop.permute.xlu0 %2656  ;;  %v2726_v33 = vsel %vm7477_vm11, %v2722_v47, %v2667_v31  ;;  %vm7487_vm11 = vcmask 64512  }
 0x334   : > { %v6456_v18 = vpop.permute.xlu1 %2384 }
 0x335   : > { %v6458_v19 = vpop.permute.xlu0 %2374 }
 0x338   : > { %v2431_v7 = vpop.permute.xlu1 %2430 }
 0x339   : > { %v2421_v30 = vpop.permute.xlu0 %2420  ;;  %v2482_v42 = vsel %vm7478_vm3, %v2478_v46, %v2431_v7  ;;  %v7485_v7 = vld [vmem:[#allocation30_spill] sm:$0xff] }
 0x33c   : > { %v6460_v63 = vpop.permute.xlu1 %2633 }
 0x33d   : > { %v6462_v17 = vpop.permute.xlu0 %2623 }
 0x340   : > { %v2679_v14 = vpop.permute.xlu1 %2678 }
 0x341   : > { %v2669_v4 = vpop.permute.xlu0 %2668  ;;  %v2730_v1 = vsel %vm7478_vm3, %v2726_v33, %v2679_v14  ;;  %vm7488_vm3 = vmmov %vm7474_vm12  ;;  %v7504_v33 = vld [vmem:[#allocation8_spill] sm:$0xff] }
 0x344   : > { %v2397_v51 = vpop.permute.xlu1 %2396 }
 0x345   : > { %v6471_v60 = vpop.permute.xlu0 %2386 }
 0x348   : > { %v2447_v28 = vpop.permute.xlu1 %2446 }
 0x349   : > { %v2433_v29 = vpop.permute.xlu0 %2432  ;;  %v2486_v21 = vsel %vm7469_vm13, %v2482_v42, %v2447_v28 }
 0x34a   : > { %4097 = vmatprep.mubr.msk.f32.mxu0 %vm7481_vm5, %v2486_v21  ;;  %vm7484_vm5 = vcmask 15360  }
 0x34b   : > { %v2459_v39 = vsel %vm7484_vm5, %v7483_v23, %v6201_v3  ;;  %vm7486_vm10 = vmmov %vm7484_vm5 }
 0x34c   : > { %v2646_v24 = vpop.permute.xlu1 %2645  ;;  %v2463_v61 = vsel %vm7474_vm12, %v2459_v39, %v6364_v11  ;;  %v2707_v14 = vsel %vm7486_vm10, %v7485_v7, %v6332_v5  ;;  %vm7491_vm5 = vmmov %vm7487_vm11  ;;  %vm7492_vm12 = vcmask 113664  }
 0x34d   : > { %v6486_v36 = vpop.permute.xlu0 %2635  ;;  %v2467_v32 = vsel %vm7475_vm14, %v2463_v61, %v6422_v58  ;;  %v2711_v40 = vsel %vm7488_vm3, %v2707_v14, %v6376_v49  ;;  %vm7496_vm3 = vmmov %vm7492_vm12 }
 0x34e   : > { %v2471_v2 = vsel %vm7487_vm11, %v2467_v32, %v2395_v35  ;;  %vm7495_vm11 = vcmask 146432  }
 0x34f   : > { %v2475_v16 = vsel %vm1939_vm0, %v2471_v2, %v2409_v25 }
 0x350   : > { %v2695_v13 = vpop.permute.xlu1 %2694 }
 0x351   : > { %v2734_v26 = vsel %vm7469_vm13, %v2730_v1, %v2695_v13  ;;  %v2681_v59 = vpop.permute.xlu0 %2680  ;;  %vm7489_vm13 = vmmov %vm7475_vm14  ;;  %vm7493_vm14 = vcmask 130048  }
 0x352   : > { %4109 = vmatprep.mubr.msk.f32.mxu1 %vm7482_vm9, %v2734_v26  ;;  %v2715_v3 = vsel %vm7489_vm13, %v2711_v40, %v6428_v10  ;;  %vm7490_vm9 = vcmask 97280   ;;  %vm7497_vm13 = vmmov %vm7493_vm14 }
 0x353   : > { %v2479_v11 = vsel %vm7490_vm9, %v2475_v16, %v2421_v30  ;;  %v2719_v58 = vsel %vm7491_vm5, %v2715_v3, %v2644_v50  ;;  %vm7494_vm10 = vmmov %vm7490_vm9  ;;  %vm7500_vm5 = vcmask 15360  }
 0x354   : > { %v2411_v41 = vpop.permute.xlu1 %2410  ;;  %v2483_v62 = vsel %vm7492_vm12, %v2479_v11, %v2433_v29  ;;  %v2723_v5 = vsel %vm1939_vm0, %v2719_v58, %v2657_v12  ;;  %vm7498_vm9 = vmmov %vm7495_vm11  ;;  %vm7501_vm12 = vcmask 31744  }
 0x355   : > { %v2399_v31 = vpop.permute.xlu0 %2398  ;;  %v2727_v46 = vsel %vm7494_vm10, %v2723_v5, %v2669_v4  ;;  %v2460_v4 = vsel %vm7500_vm5, %v7499_v6, %v6444_v34  ;;  %vm7503_vm10 = vcmask 64512  }
 0x356   : > { %v2731_v49 = vsel %vm7496_vm3, %v2727_v46, %v2681_v59  ;;  %v2464_v44 = vsel %vm7501_vm12, %v2460_v4, %v6448_v55  ;;  %vm7506_vm3 = vmmov %vm7501_vm12 }
 0x357   : > { %vm7510_vm12 = vmmov %vm7503_vm10 }
 0x358   : > { %v2648_v43 = vpop.permute.xlu1 %2647 }
 0x359   : > { %v2449_v37 = vpop.permute.xlu0 %2448 }
 0x35a   : > { %v2487_v35 = vsel %vm7493_vm14, %v2483_v62, %v2449_v37  ;;  %vm7502_vm14 = vcmask 48128  }
 0x35b   : > { %4098 = vmatmul.mubr.msk.f32.vlgmr.msra.gmra.mrb[12].mxu0 %vm7495_vm11, %v2487_v35  ;;  %v2468_v20 = vsel %vm7502_vm14, %v2464_v44, %v6456_v18  ;;  %vm7505_vm11 = vmmov %vm7500_vm5  ;;  %vm7509_vm5 = vcmask 113664  }
 0x35c   : > { %v2697_v25 = vpop.permute.xlu1 %2696  ;;  %v2472_v45 = vsel %vm7503_vm10, %v2468_v20, %v2397_v51  ;;  %v2708_v1 = vsel %vm7505_vm11, %v7504_v33, %v6446_v27  ;;  %v7512_v27 = vld [vmem:[#allocation6_spill] sm:$0xff]  ;;  %vm7513_vm10 = vmmov %vm7505_vm11  ;;  %vm7514_vm11 = vcmask 146432  }
 0x35d   : > { %v2735_v10 = vsel %vm7497_vm13, %v2731_v49, %v2697_v25  ;;  %v2659_v30 = vpop.permute.xlu0 %2658  ;;  %v2476_v13 = vsel %vm1939_vm0, %v2472_v45, %v2411_v41  ;;  %v2712_v26 = vsel %vm7506_vm3, %v2708_v1, %v6452_v54  ;;  %vm7507_vm13 = vcmask 97280   ;;  %v7515_v54 = vld [vmem:[#allocation29_spill] sm:$0xff]  ;;  %vm7516_vm3 = vmmov %vm7513_vm10  ;;  %v6575_v49 = vld [vmem:[%s7042_s4] ss:$0 sm:$0xff] }
 0x35e   : > { %4110 = vmatmul.mubr.msk.f32.vlgmr.msra.gmra.mrb[12].mxu1 %vm7498_vm9, %v2735_v10  ;;  %vm7508_vm9 = vmmov %vm7502_vm14  ;;  %vm7511_vm14 = vcmask 130048   ;;  %v2709_v61 = vsel %vm7513_vm10, %v7512_v27, %v6454_v48 }
 0x35f   : > { %v2716_v55 = vsel %vm7508_vm9, %v2712_v26, %v6460_v63  ;;  %v2461_v63 = vsel %vm7516_vm3, %v7515_v54, %v6450_v8  ;;  %vm7518_vm9 = vcmask 97280   ;;  %vm7524_vm3 = vcmask 130048  }
 0x360   : > { %v2423_v50 = vpop.permute.xlu1 %2422  ;;  %v2720_v51 = vsel %vm7510_vm12, %v2716_v55, %v2646_v24  ;;  %vm7520_vm12 = vcmask 48128  }
 0x361   : > { %v2413_v42 = vpop.permute.xlu0 %2412  ;;  %v2480_v34 = vsel %vm7507_vm13, %v2476_v13, %v2423_v50  ;;  %v2724_v41 = vsel %vm1939_vm0, %v2720_v51, %v2659_v30  ;;  %vm7517_vm13 = vcmask 31744   ;;  %vm7522_vm10 = vmmov %vm7520_vm12 }
 0x362   : > { %v2713_v32 = vsel %vm7517_vm13, %v2709_v61, %v6462_v17 }
 0x363   : > { %v2717_v14 = vsel %vm7520_vm12, %v2713_v32, %v6486_v36 }
 0x364   : > { %v2671_v28 = vpop.permute.xlu1 %2670 }
 0x365   : > { %v2661_v29 = vpop.permute.xlu0 %2660  ;;  %v2728_v24 = vsel %vm7518_vm9, %v2724_v41, %v2671_v28  ;;  %vm7526_vm9 = vcmask 146432  }
 0x366   : > { %vm7532_vm15 = vmmov %vm7526_vm9 }
 0x368   : > { %v2435_v21 = vpop.permute.xlu1 %2434 }
 0x369   : > { %v2425_v12 = vpop.permute.xlu0 %2424  ;;  %v2484_v18 = vsel %vm7509_vm5, %v2480_v34, %v2435_v21  ;;  %vm7519_vm5 = vmmov %vm7517_vm13 }
 0x36a   : > { %v2465_v7 = vsel %vm7519_vm5, %v2461_v63, %v6458_v19  ;;  %vm7527_vm5 = vcmask 97280  }
 0x36b   : > { %v2469_v40 = vsel %vm7522_vm10, %v2465_v7, %v6471_v60  ;;  %vm7528_vm12 = vmmov %vm7527_vm5 }
 0x36c   : > { %v2683_v38 = vpop.permute.xlu1 %2682 }
 0x36d   : > { %v2673_v47 = vpop.permute.xlu0 %2672 }
 0x370   : > { %v2451_v59 = vpop.permute.xlu1 %2450 }
 0x371   : > { %v2488_v23 = vsel %vm7511_vm14, %v2484_v18, %v2451_v59  ;;  %v2437_v39 = vpop.permute.xlu0 %2436  ;;  %vm7521_vm14 = vcmask 113664  }
 0x372   : > { %4100 = vmatprep.mubr.msk.f32.mxu0 %vm7514_vm11, %v2488_v23  ;;  %v2732_v48 = vsel %vm7521_vm14, %v2728_v24, %v2683_v38  ;;  %vm7523_vm11 = vcmask 64512   ;;  %vm7529_vm10 = vmmov %vm7521_vm14 }
 0x373   : > { %v2721_v16 = vsel %vm7523_vm11, %v2717_v14, %v2648_v43  ;;  %vm7525_vm13 = vmmov %vm7523_vm11 }
 0x374   : > { %v2699_v2 = vpop.permute.xlu1 %2698  ;;  %v2473_v17 = vsel %vm7525_vm13, %v2469_v40, %v2399_v31  ;;  %v2725_v11 = vsel %vm1939_vm0, %v2721_v16, %v2661_v29  ;;  %vm7530_vm11 = vmmov %vm7524_vm3 }
 0x375   : > { %v2736_v8 = vsel %vm7524_vm3, %v2732_v48, %v2699_v2  ;;  %v2685_v3 = vpop.permute.xlu0 %2684  ;;  %v2477_v19 = vsel %vm1939_vm0, %v2473_v17, %v2413_v42  ;;  %v2729_v36 = vsel %vm7527_vm5, %v2725_v11, %v2673_v47  ;;  %vm7531_vm13 = vmmov %vm7526_vm9  ;;  %vm7536_vm5 = vcmask 1046528  }
 0x376   : > { %4112 = vmatprep.mubr.msk.f32.mxu1 %vm7526_vm9, %v2736_v8  ;;  %v2481_v58 = vsel %vm7528_vm12, %v2477_v19, %v2425_v12  ;;  %v2733_v62 = vsel %vm7521_vm14, %v2729_v36, %v2685_v3  ;;  %vm7537_vm12 = vcmask 1045504  }
 0x377   : > { %v2485_v43 = vsel %vm7529_vm10, %v2481_v58, %v2437_v39 }
 0x378   : > { %v2701_v60 = vpop.permute.xlu1 %2700 }
 0x379   : > { %v2737_v37 = vsel %vm7530_vm11, %v2733_v62, %v2701_v60  ;;  %v2453_v5 = vpop.permute.xlu0 %2452 }
 0x37a   : > { %v2489_v31 = vsel %vm7524_vm3, %v2485_v43, %v2453_v5  ;;  %4113 = vmatmul.mubr.msk.f32.gmra.mrb[14].mxu1 %vm7531_vm13, %v2737_v37  ;;  %vm7542_vm3 = vmmov %vm7536_vm5 }
 0x37b   : > { %4101 = vmatmul.mubr.msk.f32.gmra.mrb[14].mxu0 %vm7532_vm15, %v2489_v31  ;;  %vm7533_vm15 = vcmask 1040384   ;;  %vm7543_vm13 = vmmov %vm7542_vm3 }
 0x37c   : > { %vm7534_vm9 = vmmov %vm7533_vm15 }
 0x37d   : > { %vm7539_vm14 = vmmov %vm7534_vm9 }
 0x37e   : > { %vm7540_vm10 = vmmov %vm7534_vm9 }
 0x37f   : > { %vm7541_vm11 = vmmov %vm7534_vm9 }
 0x3af   : > { %v4075_v35 = vpop.f32.mrb[8].mxu0 }
 0x3b0   : > { %v2048_v46 = vpop.f32.mrb[9].mxu0  ;;  %v2054_v25 = vadd.f32 %v4075_v35, %v6575_v49 }
 0x3b1   : > { %v2049_v10 = vadd.f32 %v6575_v49, %v2048_v46 }
 0x3b2   : > { %v2068_v29 = vmax.f32 %v2054_v25, 0.0 }
 0x3b3   : > { %v2067_v12 = vmax.f32 %v2049_v10, 0.0 }
 0x3bd   : > { %v4087_v30 = vpop.f32.mrb[8].mxu1 }
 0x3be   : > { %v2323_v50 = vadd.f32 %v4087_v30, %v6575_v49  ;;  %v2317_v42 = vpop.f32.mrb[9].mxu1 }
 0x3bf   : > { %v2318_v28 = vadd.f32 %v6575_v49, %v2317_v42 }
 0x3c0   : > { %v2337_v21 = vmax.f32 %v2323_v50, 0.0 }
 0x3c1   : > { %v2336_v6 = vmax.f32 %v2318_v28, 0.0 }
 0x3c2   : > { %v2840_v4 = vmax.f32 %v2068_v29, %v2337_v21 }
 0x3c3   : > { %v2839_v44 = vmax.f32 %v2067_v12, %v2336_v6 }
 0x3c4   : > { %v2852_v20 = vrot.slane %v2840_v4, 7 }
 0x3c5   : > { %v2851_v38 = vrot.slane %v2839_v44, 7 }
 0x3c7   : > { %v2863_v45 = vsel %vm7533_vm15, 0.0, %v2851_v38  ;;  %v2853_v47 = vsel %vm7534_vm9, %v2851_v38, %v2852_v20  ;;  %vm7544_vm15 = vmmov %vm7542_vm3 }
 0x3c8   : > { %v2913_v33 = vrot.slane %v2863_v45, 2  ;;  %v2990_v1 = vrot.slane %v2863_v45, 1  ;;  %v6585_v26 = vsel %vm4457_vm1, 0.0, %v2863_v45  ;;  %v3215_v34 = vsel %vm4457_vm1, 0.0, %v2853_v47  ;;  %vm7545_vm9 = vmmov %vm7537_vm12 }
 0x3c9   : > { %2942 = vrot.lane.b32.xlu0 %v6585_v26, %s4325_s26  ;;  %3241 = vrot.lane.b32.xlu1 %v3215_v34, %s4329_s29  ;;  %v2991_v55 = vrot.slane %v2853_v47, 1  ;;  %v2914_v18 = vrot.slane %v2853_v47, 2  ;;  %v6596_v39 = vsel %vm4488_vm2, 0.0, %v2853_v47 }
 0x3cb   : > { %v2992_v59 = vsel %vm7536_vm5, %v2990_v1, %v2991_v55  ;;  %v2915_v51 = vsel %vm7537_vm12, %v2913_v33, %v2914_v18  ;;  %vm7546_vm5 = vmmov %vm7545_vm9 }
 0x3cc   : > { %v2926_v27 = vsel %vm4685_vm7, 0.0, %v2915_v51  ;;  %vm7547_vm12 = vmmov %vm7546_vm5 }
 0x3cd   : > { %3253 = vrot.lane.b32.xlu1 %v2992_v59, %s4331_s16  ;;  %2944 = vrot.lane.b32.xlu0 %v6596_v39, %s4325_s26 }
 0x3d1   : > { %2999 = vrot.lane.b32.xlu1 %v2992_v59, %s4333_s25 }
 0x3d5   : > { %3290 = vrot.lane.b32.xlu1 %v2926_v27, %s4336_s17 }
 0x3d9   : > { %3045 = vrot.lane.b32.xlu1 %v2926_v27, %s4337_s21 }
 0x3e9   : > { %v4090_v41 = vpop.f32.mrb[10].mxu1 }
 0x3ea   : > { %v4078_v61 = vpop.f32.mrb[10].mxu0  ;;  %v2333_v63 = vadd.f32 %v4090_v41, %v6575_v49  ;;  %v2327_v24 = vpop.f32.mrb[11].mxu1 }
 0x3eb   : > { %v2064_v54 = vadd.f32 %v4078_v61, %v6575_v49  ;;  %v2058_v32 = vpop.f32.mrb[11].mxu0  ;;  %v2328_v14 = vadd.f32 %v6575_v49, %v2327_v24 }
 0x3ec   : > { %v2059_v7 = vadd.f32 %v6575_v49, %v2058_v32  ;;  %v2339_v2 = vmax.f32 %v2333_v63, 0.0 }
 0x3ed   : > { %v2070_v48 = vmax.f32 %v2064_v54, 0.0  ;;  %v2338_v16 = vmax.f32 %v2328_v14, 0.0 }
 0x3ee   : > { %v2069_v40 = vmax.f32 %v2059_v7, 0.0 }
 0x3ef   : > { %v2842_v8 = vmax.f32 %v2070_v48, %v2339_v2 }
 0x3f0   : > { %v2841_v3 = vmax.f32 %v2069_v40, %v2338_v16 }
 0x3f1   : > { %v2856_v17 = vrot.slane %v2842_v8, 7 }
 0x3f2   : > { %v2854_v11 = vrot.slane %v2841_v3, 7 }
 0x3f3   : > { %v6611_v19 = vsel %vm7539_vm14, %v2856_v17, 0.0  ;;  %vm7548_vm14 = vmmov %vm7542_vm3 }
 0x3f4   : > { %v2997_v36 = vrot.slane %v6611_v19, 1  ;;  %v3218_v58 = vsel %vm4631_vm6, 0.0, %v6611_v19  ;;  %v2857_v62 = vsel %vm7540_vm10, %v2854_v11, %v2856_v17  ;;  %v2920_v60 = vrot.slane %v6611_v19, 2 }
 0x3f5   : > { %3247 = vrot.lane.b32.xlu0 %v3218_v58, %s4329_s29  ;;  %v3217_v43 = vsel %vm4589_vm4, 0.0, %v2857_v62  ;;  %v2855_v37 = vsel %vm7541_vm11, %v2852_v20, %v2854_v11  ;;  %v2995_v5 = vrot.slane %v2857_v62, 1  ;;  %v2918_v46 = vrot.slane %v2857_v62, 2 }
 0x3f6   : > { %3245 = vrot.lane.b32.xlu1 %v3217_v43, %s4329_s29  ;;  %v2993_v31 = vrot.slane %v2855_v37, 1  ;;  %v2916_v35 = vrot.slane %v2855_v37, 2  ;;  %v3216_v10 = vsel %vm4488_vm2, 0.0, %v2855_v37  ;;  %v6638_v21 = vsel %vm4589_vm4, 0.0, %v2855_v37 }
 0x3f7   : > { %v2998_v25 = vsel %vm7542_vm3, %v2995_v5, %v2997_v36  ;;  %v2921_v29 = vsel %vm7547_vm12, %v2918_v46, %v2920_v60  ;;  %v6645_v12 = vsel %vm4631_vm6, 0.0, %v2857_v62  ;;  %v3277_v6 = vsel %vm7548_vm14, %v2997_v36, %v7425_v56 }
 0x3f8   : > { %v2994_v30 = vsel %vm7543_vm13, %v2991_v55, %v2993_v31  ;;  %v2996_v50 = vsel %vm7544_vm15, %v2993_v31, %v2995_v5  ;;  %v2917_v42 = vsel %vm7545_vm9, %v2914_v18, %v2916_v35  ;;  %v2919_v28 = vsel %vm7546_vm5, %v2916_v35, %v2918_v46  ;;  %vm7553_vm15 = vmmov %vm7548_vm14 }
 0x3f9   : > { %3243 = vrot.lane.b32.xlu0 %v3216_v10, %s4329_s29  ;;  %v3221_v4 = vsel %vm4685_vm7, 0.0, %v2917_v42  ;;  %v3222_v44 = vsel %vm4744_vm8, 0.0, %v2919_v28  ;;  %vm7549_vm10 = vnez %v7177_v15  ;;  %v2927_v45 = vsel %vm4744_vm8, 0.0, %v2917_v42 }
 0x3fa   : > { %3001 = vrot.lane.b32.xlu1 %v2994_v30, %s4333_s25  ;;  %v2928_v20 = vsel %vm7549_vm10, 0.0, %v2919_v28  ;;  %v3223_v38 = vsel %vm7549_vm10, 0.0, %v2921_v29  ;;  %vm7550_vm11 = vnez %v7439_v52  ;;  %vm7551_vm3 = vcmask 1040384  }
 0x3fb   : > { %v2929_v47 = vsel %vm7550_vm11, 0.0, %v2921_v29  ;;  %vm7552_vm13 = vmmov %vm7551_vm3  ;;  %vm7555_vm9 = vcmask 15360  }
 0x3fc   : > { %vm7558_vm12 = vmmov %vm7551_vm3 }
 0x3fd   : > { %2946 = vrot.lane.b32.xlu0 %v6638_v21, %s4325_s26 }
 0x3fe   : > { %3278 = vrot.lane.b32.xlu1 %v2994_v30, %s4335_s14 }
 0x401   : > { %2948 = vrot.lane.b32.xlu0 %v6645_v12, %s4325_s26 }
 0x402   : > { %3257 = vrot.lane.b32.xlu1 %v2996_v50, %s4331_s16 }
 0x405   : > { %3284 = vrot.lane.b32.xlu0 %v3277_v6, %s4335_s14 }
 0x406   : > { %3003 = vrot.lane.b32.xlu1 %v2996_v50, %s4333_s25 }
 0x409   : > { %3255 = vrot.lane.b32.xlu0 %v2994_v30, %s4331_s16 }
 0x40a   : > { %3318 = vrot.lane.b32.xlu1 %v3221_v4, %s4338_s22 }
 0x40d   : > { %3280 = vrot.lane.b32.xlu0 %v2996_v50, %s4335_s14 }
 0x40e   : > { %3320 = vrot.lane.b32.xlu1 %v3222_v44, %s4338_s22 }
 0x411   : > { %3259 = vrot.lane.b32.xlu0 %v2998_v25, %s4331_s16 }
 0x412   : > { %3294 = vrot.lane.b32.xlu1 %v2928_v20, %s4336_s17 }
 0x415   : > { %3005 = vrot.lane.b32.xlu0 %v2998_v25, %s4333_s25 }
 0x416   : > { %3049 = vrot.lane.b32.xlu1 %v2928_v20, %s4337_s21 }
 0x419   : > { %3282 = vrot.lane.b32.xlu0 %v2998_v25, %s4335_s14 }
 0x41a   : > { %3322 = vrot.lane.b32.xlu1 %v3223_v38, %s4338_s22 }
 0x41d   : > { %3292 = vrot.lane.b32.xlu0 %v2927_v45, %s4336_s17 }
 0x421   : > { %3047 = vrot.lane.b32.xlu0 %v2927_v45, %s4337_s21 }
 0x425   : > { %3296 = vrot.lane.b32.xlu0 %v2929_v47, %s4336_s17 }
 0x429   : > { %3051 = vrot.lane.b32.xlu0 %v2929_v47, %s4337_s21 }
 0x42e   : > { %v4099_v33 = vpop.f32.mrb[12].mxu0 }
 0x42f   : > { %v2568_v1 = vpop.f32.mrb[13].mxu0  ;;  %v2574_v34 = vadd.f32 %v4099_v33, %v6575_v49 }
 0x430   : > { %v2569_v55 = vadd.f32 %v6575_v49, %v2568_v1 }
 0x431   : > { %v4111_v18 = vpop.f32.mrb[12].mxu1  ;;  %v2588_v61 = vmax.f32 %v2574_v34, 0.0 }
 0x432   : > { %v2822_v59 = vadd.f32 %v4111_v18, %v6575_v49  ;;  %v2816_v51 = vpop.f32.mrb[13].mxu1  ;;  %v2587_v54 = vmax.f32 %v2569_v55, 0.0 }
 0x433   : > { %v2817_v27 = vadd.f32 %v6575_v49, %v2816_v51 }
 0x434   : > { %v2836_v41 = vmax.f32 %v2822_v59, 0.0 }
 0x435   : > { %v2835_v63 = vmax.f32 %v2817_v27, 0.0 }
 0x436   : > { %v2844_v32 = vmax.f32 %v2588_v61, %v2836_v41 }
 0x437   : > { %v2843_v24 = vmax.f32 %v2587_v54, %v2835_v63 }
 0x438   : > { %v2870_v7 = vrot.slane %v2844_v32, 7 }
 0x439   : > { %v2869_v14 = vrot.slane %v2843_v24, 7 }
 0x43b   : > { %v2881_v48 = vsel %vm7551_vm3, 0.0, %v2869_v14  ;;  %v6685_v2 = vpop.permute.xlu0 %2942  ;;  %v6688_v40 = vsel %vm7552_vm13, %v2869_v14, %v2870_v7  ;;  %v6733_v18 = vpop.permute.xlu1 %3241 }
 0x43c   : > { %v2890_v16 = vsel %vm4457_vm1, 0.0, %v2881_v48  ;;  %v2891_v8 = vsel %vm4488_vm2, 0.0, %v6688_v40  ;;  %v2970_v3 = vrot.slane %v2881_v48, 1  ;;  %v2972_v17 = vrot.slane %v6688_v40, 1  ;;  %vm7554_vm1 = vmmov %vm7546_vm5 }
 0x43d   : > { %3225 = vrot.lane.b32.xlu1 %v2890_v16, %s4325_s26  ;;  %3227 = vrot.lane.b32.xlu0 %v2891_v8, %s4325_s26  ;;  %v2895_v11 = vrot.slane %v2881_v48, 2  ;;  %v2897_v36 = vrot.slane %v6688_v40, 2  ;;  %v2883_v58 = vsel %vm4488_vm2, 0.0, %v2881_v48  ;;  %vm7556_vm5 = vmmov %vm7548_vm14 }
 0x43e   : > { %v2973_v13 = vsel %vm7553_vm15, %v2970_v3, %v2972_v17  ;;  %v2971_v5 = vsel %vm7556_vm5, %v7425_v56, %v2970_v3  ;;  %vm7557_vm2 = vmmov %vm7554_vm1  ;;  %v419_v3 = vld [vmem:[%s7043_s5 + $0x8] sm:$0xff] }
 0x43f   : > { %v2945_v62 = vpop.permute.xlu0 %2944  ;;  %v2898_v43 = vsel %vm7554_vm1, %v2895_v11, %v2897_v36  ;;  %v2896_v23 = vsel %vm7557_vm2, %v7440_v22, %v2895_v11  ;;  %vm7559_vm14 = vmmov %vm7551_vm3 }
 0x440   : > { %v6704_v37 = vsel %vm7555_vm9, %v2883_v58, %v2945_v62  ;;  %v2907_v31 = vsel %vm4685_vm7, 0.0, %v2896_v23  ;;  %v2908_v35 = vsel %vm4744_vm8, 0.0, %v2898_v43  ;;  %v2934_v6 = vsel %vm4685_vm7, 0.0, %v2898_v43  ;;  %vm7560_vm7 = vmmov %vm7556_vm5  ;;  %v420_v58 = vld [vmem:[%s7043_s5 + $0x10] sm:$0x3] }
 0x441   : > { %2958 = vrot.lane.b32.xlu1 %v2890_v16, %s4329_s29  ;;  %2960 = vrot.lane.b32.xlu0 %v2891_v8, %s4329_s29  ;;  %vm7561_vm13 = vmmov %vm7554_vm1  ;;  %v6749_v16 = vpop.permute.xlu1 %3253  ;;  %v418_v8 = vld [vmem:[%s7043_s5] sm:$0xff]  ;;  %v7570_v62 = vmov 0.0  }
 0x442   : > { %vm7562_vm15 = vmmov %vm7556_vm5 }
 0x443   : > { %vm7563_vm1 = vmmov %vm7556_vm5 }
 0x444   : > { %vm7564_vm9 = vmmov %vm7557_vm2 }
 0x445   : > { %2978 = vrot.lane.b32.xlu1 %v2971_v5, %s4331_s16  ;;  %2980 = vrot.lane.b32.xlu0 %v2973_v13, %s4331_s16  ;;  %vm7565_vm5 = vmmov %vm7557_vm2  ;;  %v6759_v11 = vpop.permute.xlu1 %2999  ;;  %vm7566_vm2 = vcmask 1041408   ;;  %v2884_v5 = vsel %vm4589_vm4, 0.0, %v6688_v40 }
 0x449   : > { %3265 = vrot.lane.b32.xlu1 %v2973_v13, %s4333_s25  ;;  %3013 = vrot.lane.b32.xlu0 %v2973_v13, %s4335_s14  ;;  %v6778_v43 = vpop.permute.xlu1 %3290 }
 0x44d   : > { %3029 = vrot.lane.b32.xlu1 %v2907_v31, %s4336_s17  ;;  %3031 = vrot.lane.b32.xlu0 %v2908_v35, %s4336_s17  ;;  %v4114_v56 = vpop.f32.mrb[14].mxu1  ;;  %v3046_v35 = vpop.permute.xlu1 %3045 }
 0x44e   : > { %v4102_v46 = vpop.f32.mrb[14].mxu0  ;;  %v2832_v25 = vadd.f32 %v4114_v56, %v6575_v49  ;;  %v2826_v10 = vpop.f32.mrb[15].mxu1 }
 0x44f   : > { %v2584_v30 = vadd.f32 %v4102_v46, %v6575_v49  ;;  %v2578_v50 = vpop.f32.mrb[15].mxu0  ;;  %v2827_v42 = vadd.f32 %v6575_v49, %v2826_v10 }
 0x450   : > { %v2838_v28 = vmax.f32 %v2832_v25, 0.0  ;;  %v2579_v29 = vadd.f32 %v6575_v49, %v2578_v50 }
 0x451   : > { %v2590_v4 = vmax.f32 %v2584_v30, 0.0  ;;  %v2837_v44 = vmax.f32 %v2827_v42, 0.0  ;;  %3302 = vrot.lane.b32.xlu1 %v2934_v6, %s4337_s21 }
 0x452   : > { %v2589_v20 = vmax.f32 %v2579_v29, 0.0 }
 0x453   : > { %v2846_v38 = vmax.f32 %v2590_v4, %v2838_v28 }
 0x454   : > { %v2845_v45 = vmax.f32 %v2589_v20, %v2837_v44 }
 0x455   : > { %v2874_v47 = vrot.slane %v2846_v38, 7  ;;  %3061 = vrot.lane.b32.xlu1 %v2934_v6, %s4338_s22 }
 0x456   : > { %v2872_v33 = vrot.slane %v2845_v45, 7 }
 0x457   : > { %v2882_v1 = vsel %vm7558_vm12, %v2874_v47, 0.0  ;;  %vm7567_vm12 = vmmov %vm7566_vm2 }
 0x458   : > { %v2931_v34 = vrot.slane %v2882_v1, 2  ;;  %v3011_v55 = vrot.slane %v2882_v1, 1  ;;  %v2875_v49 = vsel %vm7559_vm14, %v2872_v33, %v2874_v47  ;;  %v2873_v57 = vsel %vm7551_vm3, %v2870_v7, %v2872_v33  ;;  %vm7568_vm14 = vmmov %vm7566_vm2 }
 0x459   : > { %v2893_v59 = vsel %vm4631_vm6, 0.0, %v2875_v49  ;;  %v2901_v51 = vrot.slane %v2875_v49, 2  ;;  %v2892_v27 = vsel %vm4589_vm4, 0.0, %v2873_v57  ;;  %v2974_v61 = vrot.slane %v2873_v57, 1  ;;  %vm7569_vm3 = vmmov %vm7566_vm2 }
 0x45a   : > { %3231 = vrot.lane.b32.xlu0 %v2893_v59, %s4325_s26  ;;  %3229 = vrot.lane.b32.xlu1 %v2892_v27, %s4325_s26  ;;  %v2976_v41 = vrot.slane %v2875_v49, 1  ;;  %v2899_v54 = vrot.slane %v2873_v57, 2  ;;  %v2885_v25 = vsel %vm4631_vm6, 0.0, %v2873_v57  ;;  %vm7573_vm6 = vmmov %vm7565_vm5 }
 0x45b   : > { %v2975_v63 = vsel %vm7560_vm7, %v2972_v17, %v2974_v61  ;;  %v2932_v32 = vsel %vm7561_vm13, %v2901_v51, %v2931_v34  ;;  %v4199_v17 = vpack.c.bf16 %v419_v3, %v418_v8  ;;  %vm7571_vm7 = vcmask 15360  }
 0x45c   : > { %v2977_v24 = vsel %vm7562_vm15, %v2974_v61, %v2976_v41  ;;  %v3012_v7 = vsel %vm7563_vm1, %v2976_v41, %v3011_v55  ;;  %v2900_v14 = vsel %vm7564_vm9, %v2897_v36, %v2899_v54  ;;  %v2902_v48 = vsel %vm7565_vm5, %v2899_v54, %v2901_v51  ;;  %vm7572_vm4 = vmmov %vm7571_vm7 }
 0x45d   : > { %4204 = vmatprep.subr.bf16.mxu1 %v4199_v17  ;;  %4200 = vmatprep.subr.bf16.mxu0 %v4199_v17  ;;  %v2935_v56 = vsel %vm4744_vm8, 0.0, %v2900_v14  ;;  %v2909_v46 = vsel %vm7549_vm10, 0.0, %v2900_v14  ;;  %v2936_v0 = vsel %vm7549_vm10, 0.0, %v2902_v48  ;;  %v2910_v50 = vsel %vm7550_vm11, 0.0, %v2902_v48  ;;  %vm7574_vm8 = vmmov %vm7572_vm4 }
 0x45e   : > { %2964 = vrot.lane.b32.xlu0 %v2893_v59, %s4329_s29  ;;  %2962 = vrot.lane.b32.xlu1 %v2892_v27, %s4329_s29  ;;  %v3219_v9 = vsel %vm7573_vm6, %v2920_v60, %v7440_v22  ;;  %v2937_v28 = vsel %vm7550_vm11, 0.0, %v2932_v32  ;;  %vm7575_vm10 = vmmov %vm7572_vm4  ;;  %vm7578_vm15 = vcmask 48128   ;;  %vm7580_vm9 = vcmask 64512   ;;  %s323_s29 = sand.u32 1, %s4315_s10  }
 0x45f   : > { %4206 = vmatpush3.bf16.msra.mxu1 %v4199_v17  ;;  %4202 = vmatpush3.bf16.msra.mxu0 %v4199_v17  ;;  %v3224_v29 = vsel %vm7550_vm11, 0.0, %v3219_v9  ;;  %vm7576_vm11 = vcmask 31744   ;;  %vm7579_vm1 = vmmov %vm7578_vm15  ;;  %s3868_s28 = sshll.u32 %s323_s29, 3  ;;  %s3792_s24 = scalar_lea.sflag [#allocation3], %s323_s29 }
 0x460   : > { %4131 = vmatprep.subr.msk.mxu1 %vm7566_vm2, %v420_v58  ;;  %4119 = vmatprep.subr.msk.mxu0 %vm7567_vm12, %v420_v58  ;;  %vm7577_vm13 = vmmov %vm7576_vm11  ;;  %vm7582_vm2 = vcmask 97280   ;;  %vm7583_vm12 = vcmask 113664  }
 0x461   : > { %vm7581_vm5 = vmmov %vm7580_vm9 }
 0x462   : > { %3267 = vrot.lane.b32.xlu0 %v2975_v63, %s4333_s25  ;;  %2982 = vrot.lane.b32.xlu1 %v2975_v63, %s4331_s16 }
 0x463   : > { %4132 = vmatpush3.msk.msra.mxu1 %vm7568_vm14, %v420_v58  ;;  %4120 = vmatpush3.msk.msra.mxu0 %vm7569_vm3, %v420_v58  ;;  %vm7584_vm14 = vmmov %vm7582_vm2 }
 0x464   : > { %4139 = vmatprep.subr.mxu0 %v7570_v62  ;;  %4144 = vmatprep.subr.mxu1 %v7570_v62  ;;  %vm7585_vm3 = vmmov %vm7583_vm12 }
 0x466   : > { %3015 = vrot.lane.b32.xlu0 %v2975_v63, %s4335_s14  ;;  %3269 = vrot.lane.b32.xlu1 %v2977_v24, %s4333_s25  ;;  %v3073_v63 = vsel %vm7575_vm10, 0.0, %v6685_v2 }
 0x467   : > { %v6763_v36 = vpop.permute.xlu0 %3247 }
 0x468   : > { %v6799_v10 = vpop.permute.xlu1 %3245 }
 0x46a   : > { %2984 = vrot.lane.b32.xlu0 %v2977_v24, %s4331_s16  ;;  %3017 = vrot.lane.b32.xlu1 %v2977_v24, %s4335_s14 }
 0x46b   : > { %v6776_v13 = vpop.permute.xlu0 %3243 }
 0x46c   : > { %v6815_v15 = vpop.permute.xlu1 %3001 }
 0x46e   : > { %3019 = vrot.lane.b32.xlu0 %v3012_v7, %s4335_s14  ;;  %3271 = vrot.lane.b32.xlu1 %v3012_v7, %s4333_s25  ;;  %s3949_s14 = sshll.u32 %s4412_s13, 7  ;;  %s4340_s13 = smov [#allocation2]  }
 0x46f   : > { %v2947_v23 = vpop.permute.xlu0 %2946  ;;  %s6996_s23 = scalar_lea.hbm %s7047_s9, %s3949_s14 }
 0x470   : > { %v6786_v31 = vsel %vm7571_vm7, %v2884_v5, %v2947_v23  ;;  %v3279_v6 = vpop.permute.xlu1 %3278  ;;  %vm7586_vm7 = vcmask 130048  }
 0x471   : > { %vm7588_vm6 = vmmov %vm7586_vm7 }
 0x472   : > { %3304 = vrot.lane.b32.xlu0 %v2935_v56, %s4337_s21  ;;  %3033 = vrot.lane.b32.xlu1 %v2909_v46, %s4336_s17 }
 0x473   : > { %v2949_v53 = vpop.permute.xlu0 %2948 }
 0x474   : > { %v6797_v40 = vsel %vm7572_vm4, %v2885_v25, %v2949_v53  ;;  %v6828_v22 = vpop.permute.xlu1 %3257  ;;  %vm7587_vm4 = vcmask 146432  }
 0x476   : > { %3063 = vrot.lane.b32.xlu0 %v2935_v56, %s4338_s22  ;;  %3306 = vrot.lane.b32.xlu1 %v2936_v0, %s4337_s21 }
 0x477   : > { %v6805_v30 = vpop.permute.xlu0 %3284 }
 0x478   : > { %v6832_v60 = vpop.permute.xlu1 %3003 }
 0x47a   : > { %3035 = vrot.lane.b32.xlu0 %v2910_v50, %s4336_s17  ;;  %3065 = vrot.lane.b32.xlu1 %v2936_v0, %s4338_s22  ;;  %s325_s17 = scalar_lea.vmem [#allocation2], %s3868_s28  ;;  %s4265_s28 = sshll.u32 %s4340_s13, 4  ;;  %s4266_s28 = int_to_ptr.vmem [resolvable:$false] %s4265_s28 }
 0x47b   : > { %v6817_v42 = vpop.permute.xlu0 %3255  ;;  %s4267_s16 = scalar_lea.vmem %s4266_s28, 256 }
 0x47c   : > { %v3319_v20 = vpop.permute.xlu1 %3318 }
 0x47e   : > { %3308 = vrot.lane.b32.xlu0 %v2937_v28, %s4337_s21  ;;  %3324 = vrot.lane.b32.xlu1 %v3224_v29, %s4338_s22  ;;  %s3805_s21 = sshll.u32 %s325_s17, 4  ;;  %s6998_s21 = int_to_ptr.vmem [resolvable:$true] %s3805_s21 }
 0x47f   : > { %v6825_v4 = vpop.permute.xlu0 %3280  ;;  %s4261_s27 = scalar_lea.vmem %s6998_s21, 128  ;;  %p4268_p0 = scmp.lt.s32.totalorder %s6998_s21, %s4266_s28 }
 0x480   : > { %v6838_v38 = vpop.permute.xlu1 %3320  ;;  %p4262_p11 = scmp.ne.s32.totalorder %s6998_s21, %s4261_s27  ;;  %p4269_p1 = scmp.lt.s32.totalorder %s4267_s16, %s4261_s27 }
 0x482   : > { %3067 = vrot.lane.b32.xlu0 %v2937_v28, %s4338_s22  ;;  %p4263_p12 = pnand %p4262_p11, %p4429_p5  ;;  %p4270_p2 = por %p4269_p1, %p4268_p0 }
 0x483   : > { %v6830_v19 = vpop.permute.xlu0 %3259 }
 0x484   : > { %v6842_v47 = vpop.permute.xlu1 %3294  ;;  %p4264_p13 = pneg %p4263_p12 }
 0x486   : > { %p4271_p3 = pnand %p4270_p2, %p4264_p13 }
 0x487   : > { %v6834_v44 = vpop.permute.xlu0 %3005 }
 0x488   : > { %v6846_v1 = vpop.permute.xlu1 %3049 }
 0x48b   : > { %v6836_v52 = vpop.permute.xlu0 %3282 }
 0x48c   : > { %v6850_v55 = vpop.permute.xlu1 %3322 }
 0x48f   : > { %v6840_v45 = vpop.permute.xlu0 %3292 }
 0x493   : > { %v6844_v33 = vpop.permute.xlu0 %3047 }
 0x497   : > { %v6848_v34 = vpop.permute.xlu0 %3296 }
 0x49b   : > { %v6852_v49 = vpop.permute.xlu0 %3051 }
 0x4af   : > { %v3226_v57 = vpop.permute.xlu1 %3225  ;;  %v3228_v59 = vpop.permute.xlu0 %3227 }
 0x4b0   : > { %v3330_v61 = vsel %vm7574_vm8, %v6585_v26, %v3226_v57  ;;  %vm7589_vm8 = vmmov %vm7587_vm4 }
 0x4b1   : > { %v3334_v32 = vsel %vm7576_vm11, %v3330_v61, %v6733_v18 }
 0x4b2   : > { %v3338_v48 = vsel %vm7579_vm1, %v3334_v32, %v6749_v16 }
 0x4b3   : > { %v2959_v51 = vpop.permute.xlu1 %2958  ;;  %v2961_v27 = vpop.permute.xlu0 %2960 }
 0x4b4   : > { %v3077_v24 = vsel %vm7577_vm13, %v3073_v63, %v2959_v51  ;;  %vm7590_vm13 = vmmov %vm7575_vm10 }
 0x4b7   : > { %v2979_v41 = vpop.permute.xlu1 %2978  ;;  %v2981_v54 = vpop.permute.xlu0 %2980 }
 0x4b8   : > { %v3081_v7 = vsel %vm7578_vm15, %v3077_v24, %v2979_v41  ;;  %vm7591_vm15 = vmmov %vm7576_vm11 }
 0x4b9   : > { %v3085_v26 = vsel %vm7581_vm5, %v3081_v7, %v6759_v11  ;;  %v3078_v63 = vsel %vm7591_vm15, %v6704_v37, %v2961_v27  ;;  %vm7593_vm5 = vmmov %vm7576_vm11  ;;  %vm7605_vm15 = vcmask 130048  }
 0x4bb   : > { %v3266_v14 = vpop.permute.xlu1 %3265  ;;  %v3014_v8 = vpop.permute.xlu0 %3013 }
 0x4bc   : > { %v3342_v3 = vsel %vm7580_vm9, %v3338_v48, %v3266_v14  ;;  %v3089_v17 = vsel %vm1939_vm0, %v3085_v26, %v3014_v8  ;;  %vm7592_vm9 = vmmov %vm7579_vm1 }
 0x4bd   : > { %v3346_v58 = vsel %vm1939_vm0, %v3342_v3, %v3279_v6  ;;  %v3082_v24 = vsel %vm7592_vm9, %v3078_v63, %v2981_v54  ;;  %vm7607_vm9 = vcmask 146432  }
 0x4be   : > { %v3350_v23 = vsel %vm7584_vm14, %v3346_v58, %v6778_v43  ;;  %v3331_v43 = vsel %vm7575_vm10, %v6596_v39, %v3228_v59 }
 0x4bf   : > { %v3030_v2 = vpop.permute.xlu1 %3029  ;;  %v3032_v25 = vpop.permute.xlu0 %3031 }
 0x4c0   : > { %v3093_v18 = vsel %vm7582_vm2, %v3089_v17, %v3030_v2  ;;  %vm7594_vm2 = vcmask 64512  }
 0x4c1   : > { %v3097_v5 = vsel %vm7583_vm12, %v3093_v18, %v3046_v35  ;;  %vm7595_vm12 = vmmov %vm7579_vm1 }
 0x4c2   : > { %vm7596_vm14 = vmmov %vm7594_vm2 }
 0x4c3   : > { %v3303_v56 = vpop.permute.xlu1 %3302  ;;  %v3086_v37 = vsel %vm7596_vm14, %v3082_v24, %v6815_v15 }
 0x4c4   : > { %v3354_v16 = vsel %vm7585_vm3, %v3350_v23, %v3303_v56  ;;  %vm7597_vm3 = vmmov %vm7594_vm2 }
 0x4c5   : > { %v3358_v46 = vsel %vm7586_vm7, %v3354_v16, %v3319_v20  ;;  %v3335_v20 = vsel %vm7576_vm11, %v3331_v43, %v6776_v13  ;;  %vm7598_vm7 = vmmov %vm7575_vm10  ;;  %vm7603_vm11 = vcmask 113664  }
 0x4c6   : > { %4133 = vmatprep.mubr.msk.f32.mxu1 %vm7587_vm4, %v3358_v46  ;;  %v3339_v32 = vsel %vm7579_vm1, %v3335_v20, %v6817_v42  ;;  %vm7599_vm4 = vmmov %vm7593_vm5 }
 0x4c7   : > { %v3062_v11 = vpop.permute.xlu1 %3061 }
 0x4c8   : > { %v3101_v53 = vsel %vm7588_vm6, %v3097_v5, %v3062_v11  ;;  %vm7600_vm6 = vmmov %vm7579_vm1 }
 0x4c9   : > { %4121 = vmatprep.mubr.msk.f32.mxu0 %vm7589_vm8, %v3101_v53  ;;  %vm7601_vm8 = vcmask 97280   ;;  %vm7606_vm1 = vmmov %vm7594_vm2 }
 0x4ca   : > { %vm7602_vm10 = vmmov %vm7601_vm8 }
 0x4cc   : > { %v3230_v0 = vpop.permute.xlu1 %3229  ;;  %v3232_v50 = vpop.permute.xlu0 %3231 }
 0x4cd   : > { %v3332_v51 = vsel %vm7590_vm13, %v6638_v21, %v3230_v0  ;;  %vm7604_vm13 = vmmov %vm7599_vm4 }
 0x4ce   : > { %v3336_v39 = vsel %vm7593_vm5, %v3332_v51, %v6799_v10  ;;  %v3333_v10 = vsel %vm7598_vm7, %v6645_v12, %v3232_v50  ;;  %vm7608_vm5 = vmmov %vm7601_vm8 }
 0x4cf   : > { %v3340_v14 = vsel %vm7595_vm12, %v3336_v39, %v6828_v22  ;;  %v3337_v12 = vsel %vm7604_vm13, %v3333_v10, %v6763_v36  ;;  %vm7610_vm12 = vmmov %vm7600_vm6 }
 0x4d0   : > { %v2963_v9 = vpop.permute.xlu1 %2962  ;;  %v2965_v35 = vpop.permute.xlu0 %2964  ;;  %v3341_v36 = vsel %vm7610_vm12, %v3337_v12, %v6830_v19  ;;  %vm7611_vm14 = vmmov %vm7608_vm5 }
 0x4d1   : > { %v3079_v54 = vsel %vm7599_vm4, %v6786_v31, %v2963_v9  ;;  %vm7613_vm7 = vmmov %vm7605_vm15 }
 0x4d2   : > { %vm7614_vm4 = vmmov %vm7606_vm1 }
 0x4d4   : > { %v2983_v28 = vpop.permute.xlu1 %2982  ;;  %v3268_v29 = vpop.permute.xlu0 %3267 }
 0x4d5   : > { %v3343_v59 = vsel %vm7594_vm2, %v3339_v32, %v3268_v29  ;;  %v3083_v48 = vsel %vm7600_vm6, %v3079_v54, %v2983_v28  ;;  %vm7609_vm2 = vmmov %vm7603_vm11  ;;  %v3925_v29 = vld [vmem:[%s7044_s6] ss:$0 sm:$0xff] }
 0x4d6   : > { %v3347_v21 = vsel %vm1939_vm0, %v3343_v59, %v6825_v4  ;;  %v3087_v17 = vsel %vm7606_vm1, %v3083_v48, %v6832_v60  ;;  %vm7615_vm6 = vmmov %vm7607_vm9 }
 0x4d7   : > { %v3351_v4 = vsel %vm7601_vm8, %v3347_v21, %v6840_v45  ;;  %vm7616_vm8 = vmmov %vm7613_vm7 }
 0x4d8   : > { %v3270_v6 = vpop.permute.xlu1 %3269  ;;  %v3016_v57 = vpop.permute.xlu0 %3015  ;;  %vm7621_vm1 = vmmov %vm7613_vm7 }
 0x4d9   : > { %v3344_v42 = vsel %vm7597_vm3, %v3340_v14, %v3270_v6  ;;  %v3090_v27 = vsel %vm1939_vm0, %v3086_v37, %v3016_v57  ;;  %vm7612_vm3 = vmmov %vm7609_vm2  ;;  %v3944_v14 = vld [vmem:[%s7045_s7 + $0xc] sm:$0xf] }
 0x4da   : > { %v3348_v15 = vsel %vm1939_vm0, %v3344_v42, %v6836_v52  ;;  %v3094_v3 = vsel %vm7602_vm10, %v3090_v27, %v3032_v25  ;;  %vm7617_vm10 = vmmov %vm7604_vm13 }
 0x4db   : > { %v3352_v52 = vsel %vm7608_vm5, %v3348_v15, %v6842_v47  ;;  %v3098_v58 = vsel %vm7609_vm2, %v3094_v3, %v6844_v33  ;;  %v3080_v33 = vsel %vm7617_vm10, %v6797_v40, %v2965_v35  ;;  %vm7619_vm13 = vmmov %vm7610_vm12  ;;  %vm4339_vm10 = vmmov 0  }
 0x4dc   : > { %v3018_v61 = vpop.permute.xlu1 %3017  ;;  %v2985_v41 = vpop.permute.xlu0 %2984  ;;  %vm7623_vm5 = vmmov %vm7614_vm4 }
 0x4dd   : > { %v3091_v45 = vsel %vm1939_vm0, %v3087_v17, %v3018_v61  ;;  %v3084_v19 = vsel %vm7619_vm13, %v3080_v33, %v2985_v41 }
 0x4e0   : > { %v3272_v7 = vpop.permute.xlu1 %3271  ;;  %v3020_v13 = vpop.permute.xlu0 %3019 }
 0x4e1   : > { %v3345_v23 = vsel %vm7614_vm4, %v3341_v36, %v3272_v7 }
 0x4e2   : > { %v3349_v11 = vsel %vm1939_vm0, %v3345_v23, %v6805_v30 }
 0x4e4   : > { %v3034_v8 = vpop.permute.xlu1 %3033  ;;  %v3305_v22 = vpop.permute.xlu0 %3304 }
 0x4e5   : > { %v3355_v26 = vsel %vm7603_vm11, %v3351_v4, %v3305_v22  ;;  %vm7618_vm11 = vmmov %vm7615_vm6 }
 0x4e6   : > { %v3359_v31 = vsel %vm7605_vm15, %v3355_v26, %v6838_v38  ;;  %v3095_v38 = vsel %vm7611_vm14, %v3091_v45, %v3034_v8  ;;  %vm7620_vm15 = vmmov %vm7609_vm2 }
 0x4e7   : > { %4134 = vmatmul.mubr.msk.f32.vlgmr.msra.gmra.mrb[16].mxu1 %vm7607_vm9, %v3359_v31  ;;  %v3099_v16 = vsel %vm7620_vm15, %v3095_v38, %v6846_v1  ;;  %vm7622_vm9 = vmmov %vm7615_vm6 }
 0x4e8   : > { %v3307_v2 = vpop.permute.xlu1 %3306  ;;  %v3064_v18 = vpop.permute.xlu0 %3063  ;;  %vm7624_vm2 = vmmov %vm7611_vm14 }
 0x4e9   : > { %v3356_v5 = vsel %vm7612_vm3, %v3352_v52, %v3307_v2  ;;  %v3102_v60 = vsel %vm7613_vm7, %v3098_v58, %v3064_v18  ;;  %v3353_v0 = vsel %vm7624_vm2, %v3349_v11, %v6848_v34  ;;  %vm7625_vm12 = vmmov %vm7624_vm2  ;;  %v3936_v34 = vld [vmem:[%s7045_s7 + $0x4] sm:$0xf] }
 0x4ea   : > { %4122 = vmatmul.mubr.msk.f32.vlgmr.msra.gmra.mrb[16].mxu0 %vm7615_vm6, %v3102_v60  ;;  %v3360_v47 = vsel %vm7616_vm8, %v3356_v5, %v6850_v55  ;;  %v3088_v55 = vsel %vm7623_vm5, %v3084_v19, %v6834_v44  ;;  %vm7626_vm14 = vmmov %vm7612_vm3  ;;  %vm3473_vm8 = vcmask 1043456   ;;  %v3947_v60 = vld [vmem:[%s7046_s8] ss:$0 sm:$0xff] }
 0x4eb   : > { %4136 = vmatprep.mubr.msk.f32.mxu1 %vm7618_vm11, %v3360_v47  ;;  %v3092_v40 = vsel %vm1939_vm0, %v3088_v55, %v3020_v13  ;;  %vm7627_vm3 = vmmov %vm7621_vm1  ;;  %4140 = vmatpush3.msk.msra.mxu0 %vm3473_vm8, %v3936_v34  ;;  %v3941_v13 = vld [vmem:[%s7045_s7 + $0x8] sm:$0xf]  ;;  %vm7632_vm11 = vcmask 31744  }
 0x4ec   : > { %v3066_v56 = vpop.permute.xlu1 %3065  ;;  %v3036_v46 = vpop.permute.xlu0 %3035  ;;  %vm7628_vm7 = vmmov %vm7615_vm6  ;;  %4149 = vmatprep.subr.mxu0 %v7570_v62 }
 0x4ed   : > { %v3103_v25 = vsel %vm7621_vm1, %v3099_v16, %v3066_v56  ;;  %v3096_v1 = vsel %vm7625_vm12, %v3092_v40, %v3036_v46  ;;  %vm7629_vm4 = vmmov %vm7626_vm14 }
 0x4ee   : > { %4124 = vmatprep.mubr.msk.f32.mxu0 %vm7622_vm9, %v3103_v25  ;;  %v3100_v35 = vsel %vm7629_vm4, %v3096_v1, %v6852_v49  ;;  %vm7630_vm6 = vmmov %vm7621_vm1  ;;  %v3467_v49 = vld [vmem:[%s7045_s7] sm:$0xf]  ;;  %vm3789_vm9 = vcmask 261120  }
 0x4ef   : > { %vm7631_vm0 = vmmov %vm7628_vm7  ;;  %4145 = vmatpush3.msk.msra.mxu1 %vm3473_vm8, %v3467_v49 }
 0x4f0   : > { %v3325_v53 = vpop.permute.xlu1 %3324  ;;  %v3309_v50 = vpop.permute.xlu0 %3308  ;;  %4154 = vmatprep.subr.mxu1 %v7570_v62  ;;  %vm7633_vm13 = vmmov %vm7632_vm11 }
 0x4f1   : > { %v3357_v9 = vsel %vm7626_vm14, %v3353_v0, %v3309_v50  ;;  %vm7634_vm15 = vmmov %vm7632_vm11 }
 0x4f2   : > { %v3361_v30 = vsel %vm7627_vm3, %v3357_v9, %v3325_v53  ;;  %vm7635_vm1 = vmmov %vm7632_vm11 }
 0x4f3   : > { %4137 = vmatmul.mubr.msk.f32.gmra.mrb[18].mxu1 %vm7628_vm7, %v3361_v30 }
 0x4f4   : > { %v3068_v28 = vpop.permute.xlu0 %3067  ;;  %4146 = vmatprep.mubr.msk.f32.mxu1 %vm4339_vm10, %v7570_v62 }
 0x4f5   : > { %v3104_v44 = vsel %vm7630_vm6, %v3100_v35, %v3068_v28 }
 0x4f6   : > { %4125 = vmatmul.mubr.msk.f32.gmra.mrb[18].mxu0 %vm7631_vm0, %v3104_v44 }
 0x4f7   : > { %4141 = vmatprep.mubr.msk.f32.mxu0 %vm4339_vm10, %v7570_v62 }
 0x5ba   : > { %v4135_v43 = vpop.f32.mrb[16].mxu1 }
 0x5bb   : > { %v3440_v6 = vpop.f32.mrb[17].mxu1  ;;  %v3446_v57 = vadd.f32 %v4135_v43, %v3925_v29 }
 0x5bc   : > { %v3441_v20 = vadd.f32 %v3925_v29, %v3440_v6 }
 0x5bd   : > { %v4123_v51 = vpop.f32.mrb[16].mxu0  ;;  %v3460_v32 = vmax.f32 %v3446_v57, 0.0 }
 0x5be   : > { %v3198_v61 = vadd.f32 %v4123_v51, %v3925_v29  ;;  %v3192_v41 = vpop.f32.mrb[17].mxu0  ;;  %v3459_v39 = vmax.f32 %v3441_v20, 0.0 }
 0x5bf   : > { %v3193_v63 = vadd.f32 %v3925_v29, %v3192_v41 }
 0x5c0   : > { %v3212_v24 = vmax.f32 %v3198_v61, 0.0 }
 0x5c1   : > { %v3211_v59 = vmax.f32 %v3193_v63, 0.0 }
 0x5c2   : > { %v3464_v7 = vmax.f32 %v3212_v24, %v3460_v32 }
 0x5c3   : > { %v3463_v21 = vmax.f32 %v3211_v59, %v3459_v39 }
 0x5c4   : > { %4142 = vmatmul.mubr.msk.f32.vlgmr.msra.gmra.mrb[20].mxu0 %vm7632_vm11, %v3464_v7 }
 0x5c5   : > { %4147 = vmatmul.mubr.msk.f32.vlgmr.msra.gmra.mrb[20].mxu1 %vm7633_vm13, %v3463_v21  ;;  %4150 = vmatpush3.msk.msra.mxu0 %vm3473_vm8, %v3941_v13 }
 0x5c6   : > { %v4138_v37 = vpop.f32.mrb[18].mxu1  ;;  %4155 = vmatpush3.msk.msra.mxu1 %vm3473_vm8, %v3944_v14  ;;  %4156 = vmatprep.mubr.msk.f32.mxu1 %vm4339_vm10, %v7570_v62 }
 0x5c7   : > { %v3450_v42 = vpop.f32.mrb[19].mxu1  ;;  %4151 = vmatprep.mubr.msk.f32.mxu0 %vm4339_vm10, %v7570_v62  ;;  %v3456_v27 = vadd.f32 %v4138_v37, %v3925_v29 }
 0x5c8   : > { %v3451_v10 = vadd.f32 %v3925_v29, %v3450_v42 }
 0x5c9   : > { %v4126_v54 = vpop.f32.mrb[18].mxu0  ;;  %v3462_v22 = vmax.f32 %v3456_v27, 0.0 }
 0x5ca   : > { %v3208_v48 = vadd.f32 %v4126_v54, %v3925_v29  ;;  %v3202_v8 = vpop.f32.mrb[19].mxu0  ;;  %v3461_v3 = vmax.f32 %v3451_v10, 0.0 }
 0x5cb   : > { %v3203_v4 = vadd.f32 %v3925_v29, %v3202_v8 }
 0x5cc   : > { %v3214_v15 = vmax.f32 %v3208_v48, 0.0 }
 0x5cd   : > { %v3213_v26 = vmax.f32 %v3203_v4, 0.0 }
 0x5ce   : > { %v3466_v12 = vmax.f32 %v3214_v15, %v3462_v22 }
 0x5cf   : > { %v3465_v31 = vmax.f32 %v3213_v26, %v3461_v3 }
 0x5d0   : > { %4157 = vmatmul.mubr.msk.f32.vlgmr.msra.gmra.mrb[22].mxu1 %vm7634_vm15, %v3466_v12 }
 0x5d1   : > { %4152 = vmatmul.mubr.msk.f32.vlgmr.msra.gmra.mrb[22].mxu0 %vm7635_vm1, %v3465_v31 }
 0x697   : > { %v3543_v17 = vpop.f32.mrb[20].mxu0 }
 0x698   : > { %v4143_v62 = vpop.f32.mrb[21].mxu0  ;;  %v3619_v45 = vpop.f32.mrb[20].mxu1 }
 0x699   : > { %v3620_v2 = vadd.f32 %v3619_v45, %v3543_v17  ;;  %v4148_v52 = vpop.f32.mrb[21].mxu1 }
 0x6a3   : > { %v3776_v58 = vpop.f32.mrb[22].mxu1 }
 0x6a4   : > { %v3697_v18 = vpop.f32.mrb[22].mxu0  ;;  %v4158_v36 = vpop.f32.mrb[23].mxu1 }
 0x6a5   : > { %v3701_v38 = vadd.f32 %v3697_v18, %v3620_v2  ;;  %v4153_v5 = vpop.f32.mrb[23].mxu0 }
 0x6a7   : > { %v3780_v23 = vadd.f32 %v3776_v58, %v3701_v38 }
 0x6a9   : > { %v3788_v47 = vadd.f32 %v3947_v60, %v3780_v23 }
 0x6ab   : > { %3790 = vst.msk [vmem:[%s325_s17] sm:$0xff] %vm3789_vm9, %v3788_v47 }
 0x6ac   : > { %4274 = shalt.err (!%p4271_p3)
}
 0x6ad   : > { %s4275_s29 = scalar_lea.hbm %s6996_s23, 128  ;;  %s4279_s17 = scalar_lea.hbm %s7047_s9, 256 }
 0x6ae   : > { %p4276_p4 = scmp.ne.s32.totalorder %s6996_s23, %s4275_s29  ;;  %p4280_p9 = scmp.lt.u32.totalorder %s6996_s23, %s7047_s9 }
 0x6af   : > { %p4281_p10 = scmp.lt.u32.totalorder %s4279_s17, %s4275_s29  ;;  %p4283_p12 = scmp.lt.u32.totalorder %s4275_s29, %s6996_s23 }
 0x6b0   : > { %p4277_p7 = pnand %p4276_p4, %p4429_p5 }
 0x6b1   : > { %p4282_p11 = por %p4281_p10, %p4280_p9 }
 0x6b2   : > { %p4278_p8 = pneg %p4277_p7 }
 0x6b3   : > { %p4284_p13 = por %p4283_p12, %p4282_p11 }
 0x6b5   : > { %p4285_p0 = pnand %p4284_p13, %p4278_p8 }
 0x6b7   : > { %4288 = shalt.err (!%p4285_p0)
}
 0x6b8   : > { %4207 = dma.vmem_to_hbm [thread:$0]  (%p4429_p5), %s6998_s21, 128, %s6996_s23, %s3792_s24  }
 0x6b9 PF: > { %p4213_p1 = scmp.ge.s32.totalorder %s4323_s12, 2  ;;  %s3817_s27 = sand.u32 1, %s4311_s30  }
 0x6ba   : > { %s3818_s13 = scalar_lea.sflag [#allocation3], %s3817_s27 }
 0x6bb   : > { %p4210_p2 = pnand %p4213_p1, %p4433_p6 }
 0x6bd   : > { %4306 = dma.done.wait (!%p4210_p2), %s3818_s13, 128  }
 0x6be   : > { %4308 = vsyncadd (!%p4210_p2), %s3818_s13, 4294967168  ;;  %p19_p3 = scmp.ge.s32.totalorder %s4416_s15, 4   ;;  %s7636_s30 = smov %s4315_s10 }
 0x6bf   : > { %s7637_s10 = smov %s4319_s11  ;;  %s7638_s11 = smov %s4427_s18 }
 0x6c0   : > { %s7639_s12 = smov %s4416_s15  ;;  %21 = sbr.rel (!%p19_p3) target bundleno = 3 (0x3), region = 97 }
 0x6c7   :  { %3823 = vsyncpa [#allocation3], 1 }
 0x6c8   :  { %3825 = vsyncpa [#allocation3 + $0x1], 1 }

</bundles_post_ra>
